<compile_context>
chip_gen: v7x
topology: tpu7x:2x2x1
jax: 0.10.0
libtpu: 0.0.40
codegen_flags: <defaults>
</compile_context>

<pallas_src>
import jax
import jax.numpy as jnp
from jax import lax
from jax.experimental import pallas as pl
from jax.experimental.pallas import tpu as pltpu


def _leaky_relu(v, negative_slope=0.01):
    # max(v, a*v) == leaky_relu(v) for 0 < a < 1  (drops a compare+select).
    return jnp.maximum(v, negative_slope * v)


def _round_up(n, m):
    return ((n + m - 1) // m) * m


def _cdiv(a, b):
    return -(-a // b)


# (lhs contracting, rhs contracting), (no batch dims)
_CONTRACT_LAST_LAST = (((1,), (1,)), ((), ()))    # w[o,i] . x[b,i]  -> [o, b]
_CONTRACT_FIRST_FIRST = (((0,), (0,)), ((), ()))  # h[i,b] . wT[i,o] -> [b, o]


def mlp_kernel(x_ref, w1_ref, w2_ref, w25_ref, w5_ref, w3_ref, w4t_ref, o_ref):
    """One TB-row batch tile of the whole forward pass, entirely in VMEM.

    x arrives in its natural [TB, D_in] layout.  The first dot_general
    contracts x's last axis so the hidden activations are lane-dense
    [features, TB] (batch on the 128-lane axis); the final dot_general
    contracts the feature axis again so the result is produced directly in
    the natural [TB, D_out] layout -- no transposes in HBM or in the wrapper.
    """
    # Layer 1: [H1, D_in] . [TB, D_in] (contract D_in) -> [H1, TB]
    h = _leaky_relu(lax.dot_general(w1_ref[...], x_ref[...], _CONTRACT_LAST_LAST,
                                    preferred_element_type=jnp.float32))
    # Layers 2..5: canonical W @ h, activations stay lane-dense [feat, TB].
    for w_ref in (w2_ref, w25_ref, w5_ref, w3_ref):
        h = _leaky_relu(jnp.dot(w_ref[...], h,
                                preferred_element_type=jnp.float32))
    # Layer 6: [H3, TB] . [H3, D_out] (contract H3) -> [TB, D_out]
    logits = lax.dot_general(h, w4t_ref[...], _CONTRACT_FIRST_FIRST,
                             preferred_element_type=jnp.float32)

    # Numerically stable softmax over the feature axis (PyTorch dim=-1).
    m = jnp.max(logits, axis=-1, keepdims=True)
    e = jnp.exp(logits - m)
    s = jnp.sum(e, axis=-1, keepdims=True)
    # EUP reciprocal + one Newton step: no vector divide, ~f32-exact (s >= 1).
    r = pl.reciprocal(s, approx=True)
    r = r * (2.0 - s * r)
    o_ref[...] = (e * r).astype(o_ref.dtype)


def net_forward(x, weights, *, max_tb=2048):
    """x: [B, D_in] float32; weights: 6 arrays in PyTorch [out, in] layout.

    Returns softmax probabilities of shape [B, D_out]."""
    B, d_in = x.shape
    d_out = weights[-1].shape[0]

    # Pad the batch only up to a 128-lane multiple (waste < 128 rows), then
    # pick a lane-aligned tile size <= max_tb.  Force >= 2 tiles whenever the
    # batch allows it so both v7x TensorCores get work; on single-TC chips
    # this only adds one ~0.35us grid step.
    b128 = _round_up(B, 128)
    n_tiles = max(1, _cdiv(b128, max_tb))
    if b128 >= 256:
        n_tiles = max(n_tiles, 2)
    tb = _round_up(_cdiv(b128, n_tiles), 128)
    n_tiles = _cdiv(b128, tb)
    b_pad = n_tiles * tb

    x_p = x if b_pad == B else jnp.pad(x, ((0, b_pad - B), (0, 0)))

    # Pre-transpose only the last (16x16) weight on the host side so the
    # kernel's final matmul is a plain "TN" dot_general (no in-kernel
    # standalone transpose needed).
    w1, w2, w25, w5, w3, w4 = weights
    kernel_weights = (w1, w2, w25, w5, w3, w4.T)

    in_specs = [pl.BlockSpec((tb, d_in), lambda i: (i, 0))]
    # Weights: full block, constant index_map -> DMA'd once, VMEM-resident.
    in_specs += [pl.BlockSpec(w.shape, lambda i: (0, 0)) for w in kernel_weights]
    out_specs = pl.BlockSpec((tb, d_out), lambda i: (i, 0))

    matmul_flops = 2 * b_pad * sum(int(w.shape[0]) * int(w.shape[1]) for w in weights)
    bytes_accessed = 4 * (int(x_p.size) + sum(int(w.size) for w in weights)
                          + d_out * b_pad)

    out = pl.pallas_call(
        mlp_kernel,
        out_shape=jax.ShapeDtypeStruct((b_pad, d_out), jnp.float32),
        grid=(n_tiles,),
        in_specs=in_specs,
        out_specs=out_specs,
        compiler_params=pltpu.CompilerParams(
            # Batch tiles are independent; lets Mosaic shard the grid across
            # TensorCores where supported (no-op on single-TC chips).
            dimension_semantics=("parallel",),
        ),
        cost_estimate=pl.CostEstimate(
            flops=matmul_flops,
            transcendentals=b_pad * d_out,        # softmax exp
            bytes_accessed=bytes_accessed,
        ),
    )(x_p, *kernel_weights)

    return out[:B] if b_pad != B else out


def make_params(key, dims):
    """Deterministic weights in PyTorch nn.Linear layout [out, in]."""
    ws = []
    for i, (di, do) in enumerate(dims):
        k = jax.random.fold_in(key, i)
        bound = 1.0 / jnp.sqrt(di)                # nn.Linear default init bound
        ws.append(jax.random.uniform(k, (do, di), jnp.float32, -bound, bound))
    return ws


def reference_forward(x, weights):
    h = x
    for w in weights[:-1]:
        h = jax.nn.leaky_relu(h @ w.T, negative_slope=0.01)
    return jax.nn.softmax(h @ weights[-1].T, axis=-1)


if __name__ == "__main__":
    key = jax.random.PRNGKey(0)

    # Net(input, H1, H2, H3, H4, output)
    D_in, H1, H2, H3, H4, D_out = 16, 32, 32, 16, 8, 16
    dims = [(D_in, H1), (H1, H2), (H2, H4), (H4, H2), (H2, H3), (H3, D_out)]

    kx, kw = jax.random.split(key)
    weights = make_params(kw, dims)

    # Case 1: multi-tile batch (>= 2 tiles -> pipelining + both-TC path).
    B = 2048
    raw = jax.random.uniform(kx, (B, D_in), jnp.float32, 0.0, 1.0)
    x = raw / jnp.sum(raw, axis=-1, keepdims=True)        # normalized profiles

    out = jax.block_until_ready(net_forward(x, weights))
    ref = reference_forward(x, weights)
    assert out.shape == (B, D_out)
    assert jnp.allclose(out, ref, atol=2e-5, rtol=2e-5)
    assert jnp.allclose(jnp.sum(out, axis=-1), 1.0, atol=1e-5)

    # Case 2: ragged small batch (exercises the 128-row padding path).
    B2 = 10
    raw2 = jax.random.uniform(jax.random.fold_in(kx, 1), (B2, D_in),
                              jnp.float32, 0.0, 1.0)
    x2 = raw2 / jnp.sum(raw2, axis=-1, keepdims=True)
    out2 = jax.block_until_ready(net_forward(x2, weights))
    ref2 = reference_forward(x2, weights)
    assert out2.shape == (B2, D_out)
    assert jnp.allclose(out2, ref2, atol=2e-5, rtol=2e-5)

    print("KERNEL_OK")
</pallas_src>

<mosaic_0001>
module attributes {stable_mosaic.version = 11 : i64} {
  func.func @mlp_kernel(%arg0: i32, %arg1: memref<1024x16xf32, #tpu.memory_space<vmem>>, %arg2: memref<32x16xf32, #tpu.memory_space<vmem>>, %arg3: memref<32x32xf32, #tpu.memory_space<vmem>>, %arg4: memref<8x32xf32, #tpu.memory_space<vmem>>, %arg5: memref<32x8xf32, #tpu.memory_space<vmem>>, %arg6: memref<16x32xf32, #tpu.memory_space<vmem>>, %arg7: memref<16x16xf32, #tpu.memory_space<vmem>>, %arg8: memref<1024x16xf32, #tpu.memory_space<vmem>>) attributes {dimension_semantics = [#tpu.dimension_semantics<parallel>], iteration_bounds = array<i64: 2>, scalar_prefetch = 0 : i64, scratch_operands = 0 : i64, tpu.core_type = #tpu.core_type<tc>, window_params = [{transform_indices = @transform_0, window_bounds = array<i64: 1024, 16>}, {pipeline_mode = #tpu.pipeline_mode<synchronous>, transform_indices = @transform_1, window_bounds = array<i64: 32, 16>}, {pipeline_mode = #tpu.pipeline_mode<synchronous>, transform_indices = @transform_2, window_bounds = array<i64: 32, 32>}, {pipeline_mode = #tpu.pipeline_mode<synchronous>, transform_indices = @transform_3, window_bounds = array<i64: 8, 32>}, {pipeline_mode = #tpu.pipeline_mode<synchronous>, transform_indices = @transform_4, window_bounds = array<i64: 32, 8>}, {pipeline_mode = #tpu.pipeline_mode<synchronous>, transform_indices = @transform_5, window_bounds = array<i64: 16, 32>}, {pipeline_mode = #tpu.pipeline_mode<synchronous>, transform_indices = @transform_6, window_bounds = array<i64: 16, 16>}, {transform_indices = @transform_7, window_bounds = array<i64: 1024, 16>}]} {
    %c0 = arith.constant 0 : index
    %c0_0 = arith.constant 0 : index
    %0 = vector.load %arg2[%c0, %c0_0] : memref<32x16xf32, #tpu.memory_space<vmem>>, vector<32x16xf32>
    %c0_1 = arith.constant 0 : index
    %c0_2 = arith.constant 0 : index
    %1 = vector.load %arg1[%c0_1, %c0_2] : memref<1024x16xf32, #tpu.memory_space<vmem>>, vector<1024x16xf32>
    %cst = arith.constant dense<0.000000e+00> : vector<32x1024xf32>
    %2 = tpu.matmul %0, %1, %cst {dimension_numbers = #tpu.dot_dimension_numbers<[1], [1], [0], [0], [0, 0, 1, 0], [], []>} : vector<32x16xf32>, vector<1024x16xf32>, vector<32x1024xf32> -> vector<32x1024xf32>
    %cst_3 = arith.constant 0.00999999977 : f32
    %3 = vector.broadcast %cst_3 : f32 to vector<32x1024xf32>
    %4 = arith.mulf %3, %2 : vector<32x1024xf32>
    %5 = arith.maximumf %2, %4 : vector<32x1024xf32>
    %c0_4 = arith.constant 0 : index
    %c0_5 = arith.constant 0 : index
    %6 = vector.load %arg3[%c0_4, %c0_5] : memref<32x32xf32, #tpu.memory_space<vmem>>, vector<32x32xf32>
    %cst_6 = arith.constant dense<0.000000e+00> : vector<32x1024xf32>
    %7 = tpu.matmul %6, %5, %cst_6 {dimension_numbers = #tpu.dot_dimension_numbers<[1], [0], [0], [1], [0, 0, 1, 1], [], []>} : vector<32x32xf32>, vector<32x1024xf32>, vector<32x1024xf32> -> vector<32x1024xf32>
    %cst_7 = arith.constant 0.00999999977 : f32
    %8 = vector.broadcast %cst_7 : f32 to vector<32x1024xf32>
    %9 = arith.mulf %8, %7 : vector<32x1024xf32>
    %10 = arith.maximumf %7, %9 : vector<32x1024xf32>
    %c0_8 = arith.constant 0 : index
    %c0_9 = arith.constant 0 : index
    %11 = vector.load %arg4[%c0_8, %c0_9] : memref<8x32xf32, #tpu.memory_space<vmem>>, vector<8x32xf32>
    %cst_10 = arith.constant dense<0.000000e+00> : vector<8x1024xf32>
    %12 = tpu.matmul %11, %10, %cst_10 {dimension_numbers = #tpu.dot_dimension_numbers<[1], [0], [0], [1], [0, 0, 1, 1], [], []>} : vector<8x32xf32>, vector<32x1024xf32>, vector<8x1024xf32> -> vector<8x1024xf32>
    %cst_11 = arith.constant 0.00999999977 : f32
    %13 = vector.broadcast %cst_11 : f32 to vector<8x1024xf32>
    %14 = arith.mulf %13, %12 : vector<8x1024xf32>
    %15 = arith.maximumf %12, %14 : vector<8x1024xf32>
    %c0_12 = arith.constant 0 : index
    %c0_13 = arith.constant 0 : index
    %16 = vector.load %arg5[%c0_12, %c0_13] : memref<32x8xf32, #tpu.memory_space<vmem>>, vector<32x8xf32>
    %cst_14 = arith.constant dense<0.000000e+00> : vector<32x1024xf32>
    %17 = tpu.matmul %16, %15, %cst_14 {dimension_numbers = #tpu.dot_dimension_numbers<[1], [0], [0], [1], [0, 0, 1, 1], [], []>} : vector<32x8xf32>, vector<8x1024xf32>, vector<32x1024xf32> -> vector<32x1024xf32>
    %cst_15 = arith.constant 0.00999999977 : f32
    %18 = vector.broadcast %cst_15 : f32 to vector<32x1024xf32>
    %19 = arith.mulf %18, %17 : vector<32x1024xf32>
    %20 = arith.maximumf %17, %19 : vector<32x1024xf32>
    %c0_16 = arith.constant 0 : index
    %c0_17 = arith.constant 0 : index
    %21 = vector.load %arg6[%c0_16, %c0_17] : memref<16x32xf32, #tpu.memory_space<vmem>>, vector<16x32xf32>
    %cst_18 = arith.constant dense<0.000000e+00> : vector<16x1024xf32>
    %22 = tpu.matmul %21, %20, %cst_18 {dimension_numbers = #tpu.dot_dimension_numbers<[1], [0], [0], [1], [0, 0, 1, 1], [], []>} : vector<16x32xf32>, vector<32x1024xf32>, vector<16x1024xf32> -> vector<16x1024xf32>
    %cst_19 = arith.constant 0.00999999977 : f32
    %23 = vector.broadcast %cst_19 : f32 to vector<16x1024xf32>
    %24 = arith.mulf %23, %22 : vector<16x1024xf32>
    %25 = arith.maximumf %22, %24 : vector<16x1024xf32>
    %c0_20 = arith.constant 0 : index
    %c0_21 = arith.constant 0 : index
    %26 = vector.load %arg7[%c0_20, %c0_21] : memref<16x16xf32, #tpu.memory_space<vmem>>, vector<16x16xf32>
    %cst_22 = arith.constant dense<0.000000e+00> : vector<1024x16xf32>
    %27 = tpu.matmul %25, %26, %cst_22 {dimension_numbers = #tpu.dot_dimension_numbers<[0], [0], [1], [1], [0, 1, 1, 1], [], []>} : vector<16x1024xf32>, vector<16x16xf32>, vector<1024x16xf32> -> vector<1024x16xf32>
    %cst_23 = arith.constant dense<0xFF800000> : vector<1024xf32>
    %28 = vector.multi_reduction <maximumf>, %27, %cst_23 [1] : vector<1024x16xf32> to vector<1024xf32>
    %29 = vector.shape_cast %28 : vector<1024xf32> to vector<1024x1xf32>
    %30 = vector.broadcast %29 : vector<1024x1xf32> to vector<1024x16xf32>
    %31 = arith.subf %27, %30 : vector<1024x16xf32>
    %32 = math.exp %31 : vector<1024x16xf32>
    %cst_24 = arith.constant dense<0.000000e+00> : vector<1024xf32>
    %33 = vector.multi_reduction <add>, %32, %cst_24 [1] : vector<1024x16xf32> to vector<1024xf32>
    %34 = vector.shape_cast %33 : vector<1024xf32> to vector<1024x1xf32>
    %35 = tpu.reciprocal %34 {approx = true} : vector<1024x1xf32> -> vector<1024x1xf32>
    %36 = arith.mulf %34, %35 : vector<1024x1xf32>
    %cst_25 = arith.constant 2.000000e+00 : f32
    %37 = vector.broadcast %cst_25 : f32 to vector<1024x1xf32>
    %38 = arith.subf %37, %36 : vector<1024x1xf32>
    %39 = arith.mulf %35, %38 : vector<1024x1xf32>
    %40 = vector.broadcast %39 : vector<1024x1xf32> to vector<1024x16xf32>
    %41 = arith.mulf %32, %40 : vector<1024x16xf32>
    %c0_26 = arith.constant 0 : index
    %c0_27 = arith.constant 0 : index
    %42 = vector.load %arg8[%c0_26, %c0_27] : memref<1024x16xf32, #tpu.memory_space<vmem>>, vector<1024x16xf32>
    tpu.vector_store %arg8[%c0_26, %c0_27], %41 {strides = array<i32>} : memref<1024x16xf32, #tpu.memory_space<vmem>>, vector<1024x16xf32>,
    return
  }
  func.func @transform_0(%arg0: i32) -> (i32, i32) {
    %c0_i32 = arith.constant 0 : i32
    %c0_i32_0 = arith.constant 0 : i32
    return %arg0, %c0_i32 : i32, i32
  }
  func.func @transform_1(%arg0: i32) -> (i32, i32) {
    %c0_i32 = arith.constant 0 : i32
    %c0_i32_0 = arith.constant 0 : i32
    %c0_i32_1 = arith.constant 0 : i32
    return %c0_i32, %c0_i32_0 : i32, i32
  }
  func.func @transform_2(%arg0: i32) -> (i32, i32) {
    %c0_i32 = arith.constant 0 : i32
    %c0_i32_0 = arith.constant 0 : i32
    %c0_i32_1 = arith.constant 0 : i32
    return %c0_i32, %c0_i32_0 : i32, i32
  }
  func.func @transform_3(%arg0: i32) -> (i32, i32) {
    %c0_i32 = arith.constant 0 : i32
    %c0_i32_0 = arith.constant 0 : i32
    %c0_i32_1 = arith.constant 0 : i32
    return %c0_i32, %c0_i32_0 : i32, i32
  }
  func.func @transform_4(%arg0: i32) -> (i32, i32) {
    %c0_i32 = arith.constant 0 : i32
    %c0_i32_0 = arith.constant 0 : i32
    %c0_i32_1 = arith.constant 0 : i32
    return %c0_i32, %c0_i32_0 : i32, i32
  }
  func.func @transform_5(%arg0: i32) -> (i32, i32) {
    %c0_i32 = arith.constant 0 : i32
    %c0_i32_0 = arith.constant 0 : i32
    %c0_i32_1 = arith.constant 0 : i32
    return %c0_i32, %c0_i32_0 : i32, i32
  }
  func.func @transform_6(%arg0: i32) -> (i32, i32) {
    %c0_i32 = arith.constant 0 : i32
    %c0_i32_0 = arith.constant 0 : i32
    %c0_i32_1 = arith.constant 0 : i32
    return %c0_i32, %c0_i32_0 : i32, i32
  }
  func.func @transform_7(%arg0: i32) -> (i32, i32) {
    %c0_i32 = arith.constant 0 : i32
    %c0_i32_0 = arith.constant 0 : i32
    return %arg0, %c0_i32 : i32, i32
  }
}

</mosaic_0001>

<bundles_post_ra>
// kernel: tpu_custom_call.1
= control target key start
LH: loop header
LB: loop body
LE: loop exit
PB: predicated region body
PF: predicated region fallthrough
CT: control target
= control target key end

     0   :  { %s7757_s24 = smov 0   ;;  %s10842_s0 = inlined_call_operand.vmem [shape: f32[2048,16], index: 0, kind: input, shape index: {}]   ;;  %s10843_s1 = inlined_call_operand.vmem [shape: f32[32,16], index: 1, kind: input, shape index: {}]   ;;  %s10844_s2 = inlined_call_operand.vmem [shape: f32[32,32], index: 2, kind: input, shape index: {}]   ;;  %s10845_s3 = inlined_call_operand.vmem [shape: f32[8,32], index: 3, kind: input, shape index: {}]   ;;  %s10846_s4 = inlined_call_operand.vmem [shape: f32[32,8], index: 4, kind: input, shape index: {}]   ;;  %s10847_s5 = inlined_call_operand.vmem [shape: f32[16,32], index: 5, kind: input, shape index: {}]   ;;  %s10848_s6 = inlined_call_operand.vmem [shape: f32[16,16], index: 6, kind: input, shape index: {}]   ;;  %s10849_s7 = inlined_call_operand.vmem [shape: f32[2048,16], index: 7, kind: output, shape index: {}]  }
   0x1 LB: > { %s6080_s25 = sadd.s32 4294967295, %s7714_s24   ;;  %p6084_p0 = scmp.ge.s32.totalorder %s7714_s24, 1  ;;  %s7714_s24 = sphi %s7757_s24, %s17_s24  }
   0x2   : > { %p238_p1 = scmp.lt.s32.totalorder %s7714_s24, 3 }
   0x4   : > { %p239_p2 = pnand %p6084_p0, %p238_p1 }
   0x6   : > { %242 = sbr.rel (%p239_p2) target bundleno = 2336 (0x920), region = 48 }
   0xd   : > { %s6085_s26 = sshll.u32 %s6080_s25, 7  ;;  %vm414_vm0 = vcmask 130048   ;;  %v7768_v0 = vld [vmem:[%s10843_s1] sm:$0xff]  ;;  %vm1235_vm2 = vcmask 261120   ;;  %vm1976_vm3 = vcmask 64512  }
   0xe   : > { %p271_p3 = scmp.lt.s32.totalorder %s6085_s26, 255  ;;  %6439 = vmatprep.mubr.msk.f32.mxu0 %vm414_vm0, %v7768_v0  ;;  %6479 = vmatprep.mubr.msk.f32.mxu1 %vm414_vm0, %v7768_v0  ;;  %vm7786_vm1 = vmpackc.low %vm414_vm0, %vm414_vm0 }
  0x10   : > { %s11913_s26 = smov (!%p271_p3, %s6085_s26), 255 }
  0x11   : > { %s6086_s29 = sshll.u32 %s11913_s26, 3 }
  0x12   : > { %s7782_s9 = scalar_lea.vmem %s10842_s0, %s6086_s29  ;;  %s9713_s25 = scalar_lea.vmem %s10849_s7, %s6086_s29 }
  0x13   : > { %v302_v2 = vld [vmem:[%s7782_s9 + $0x80] sm:$0xff]  ;;  %v303_v3 = vld [vmem:[%s7782_s9 + $0x88] sm:$0xff]  ;;  %v304_v7 = vld [vmem:[%s7782_s9 + $0x90] sm:$0xff] }
  0x14   : > { %v286_v4 = vld [vmem:[%s7782_s9] sm:$0xff]  ;;  %v6893_v5 = vpack.c.bf16 %v303_v3, %v302_v2  ;;  %v287_v6 = vld [vmem:[%s7782_s9 + $0x8] sm:$0xff]  ;;  %v305_v8 = vld [vmem:[%s7782_s9 + $0x98] sm:$0xff] }
  0x15   : > { %v6896_v9 = vpack.c.bf16 %v287_v6, %v286_v4  ;;  %v6899_v10 = vpack.c.bf16 %v305_v8, %v304_v7  ;;  %v288_v11 = vld [vmem:[%s7782_s9 + $0x10] sm:$0xff]  ;;  %v289_v12 = vld [vmem:[%s7782_s9 + $0x18] sm:$0xff]  ;;  %v306_v13 = vld [vmem:[%s7782_s9 + $0xa0] sm:$0xff] }
  0x16   : > { %6895 = vmatprep.subr.msk.bf16.mxu0 %vm7786_vm1, %v6893_v5  ;;  %v307_v14 = vld [vmem:[%s7782_s9 + $0xa8] sm:$0xff]  ;;  %v6902_v15 = vpack.c.bf16 %v289_v12, %v288_v11  ;;  %v334_v17 = vld [vmem:[%s7782_s9 + $0x180] sm:$0xff]  ;;  %v336_v23 = vld [vmem:[%s7782_s9 + $0x190] sm:$0xff] }
  0x17   : > { %6898 = vmatpush3.bf16.xpose.msk.msra.mxu0 %vm7786_vm1, %v6896_v9  ;;  %v6905_v16 = vpack.c.bf16 %v307_v14, %v306_v13  ;;  %v335_v18 = vld [vmem:[%s7782_s9 + $0x188] sm:$0xff]  ;;  %v318_v20 = vld [vmem:[%s7782_s9 + $0x100] sm:$0xff]  ;;  %v337_v24 = vld [vmem:[%s7782_s9 + $0x198] sm:$0xff] }
  0x18   : > { %6901 = vmatprep.subr.msk.bf16.mxu0 %vm7786_vm1, %v6899_v10  ;;  %v6941_v19 = vpack.c.bf16 %v335_v18, %v334_v17  ;;  %v319_v21 = vld [vmem:[%s7782_s9 + $0x108] sm:$0xff]  ;;  %v290_v25 = vld [vmem:[%s7782_s9 + $0x20] sm:$0xff]  ;;  %v6947_v27 = vpack.c.bf16 %v337_v24, %v336_v23  ;;  %v308_v28 = vld [vmem:[%s7782_s9 + $0xb0] sm:$0xff] }
  0x19   : > { %v6944_v22 = vpack.c.bf16 %v319_v21, %v318_v20  ;;  %v291_v26 = vld [vmem:[%s7782_s9 + $0x28] sm:$0xff]  ;;  %v309_v29 = vld [vmem:[%s7782_s9 + $0xb8] sm:$0xff]  ;;  %v320_v30 = vld [vmem:[%s7782_s9 + $0x110] sm:$0xff] }
  0x1a   : > { %6943 = vmatprep.subr.msk.bf16.mxu1 %vm7786_vm1, %v6941_v19  ;;  %v321_v31 = vld [vmem:[%s7782_s9 + $0x118] sm:$0xff]  ;;  %v6908_v32 = vpack.c.bf16 %v291_v26, %v290_v25  ;;  %v338_v33 = vld [vmem:[%s7782_s9 + $0x1a0] sm:$0xff]  ;;  %v339_v34 = vld [vmem:[%s7782_s9 + $0x1a8] sm:$0xff]  ;;  %v6911_v35 = vpack.c.bf16 %v309_v29, %v308_v28 }
  0x1b   : > { %6946 = vmatpush3.bf16.xpose.msk.msra.mxu1 %vm7786_vm1, %v6944_v22  ;;  %v6950_v36 = vpack.c.bf16 %v321_v31, %v320_v30  ;;  %v6953_v37 = vpack.c.bf16 %v339_v34, %v338_v33  ;;  %v292_v38 = vld [vmem:[%s7782_s9 + $0x30] sm:$0xff]  ;;  %v293_v39 = vld [vmem:[%s7782_s9 + $0x38] sm:$0xff]  ;;  %v310_v40 = vld [vmem:[%s7782_s9 + $0xc0] sm:$0xff] }
  0x1c   : > { %6949 = vmatprep.subr.msk.bf16.mxu1 %vm7786_vm1, %v6947_v27  ;;  %v311_v41 = vld [vmem:[%s7782_s9 + $0xc8] sm:$0xff]  ;;  %v322_v42 = vld [vmem:[%s7782_s9 + $0x120] sm:$0xff]  ;;  %v6914_v44 = vpack.c.bf16 %v293_v39, %v292_v38  ;;  %v340_v45 = vld [vmem:[%s7782_s9 + $0x1b0] sm:$0xff] }
  0x1d   : > { %v323_v43 = vld [vmem:[%s7782_s9 + $0x128] sm:$0xff]  ;;  %v341_v46 = vld [vmem:[%s7782_s9 + $0x1b8] sm:$0xff]  ;;  %v6917_v47 = vpack.c.bf16 %v311_v41, %v310_v40  ;;  %v294_v50 = vld [vmem:[%s7782_s9 + $0x40] sm:$0xff] }
  0x1e   : > { %v6956_v48 = vpack.c.bf16 %v323_v43, %v322_v42  ;;  %v6959_v49 = vpack.c.bf16 %v341_v46, %v340_v45  ;;  %v295_v51 = vld [vmem:[%s7782_s9 + $0x48] sm:$0xff]  ;;  %v312_v52 = vld [vmem:[%s7782_s9 + $0xd0] sm:$0xff]  ;;  %v313_v53 = vld [vmem:[%s7782_s9 + $0xd8] sm:$0xff] }
  0x1f   : > { %6904 = vmatpush3.bf16.xpose.msk.msra.mxu0 %vm7786_vm1, %v6902_v15  ;;  %v324_v54 = vld [vmem:[%s7782_s9 + $0x130] sm:$0xff]  ;;  %v325_v55 = vld [vmem:[%s7782_s9 + $0x138] sm:$0xff]  ;;  %v6920_v56 = vpack.c.bf16 %v295_v51, %v294_v50  ;;  %v342_v57 = vld [vmem:[%s7782_s9 + $0x1c0] sm:$0xff]  ;;  %v6923_v59 = vpack.c.bf16 %v313_v53, %v312_v52 }
  0x20   : > { %6907 = vmatprep.subr.msk.bf16.mxu0 %vm7786_vm1, %v6905_v16  ;;  %v343_v58 = vld [vmem:[%s7782_s9 + $0x1c8] sm:$0xff]  ;;  %v6962_v60 = vpack.c.bf16 %v325_v55, %v324_v54  ;;  %v296_v62 = vld [vmem:[%s7782_s9 + $0x50] sm:$0xff]  ;;  %v297_v63 = vld [vmem:[%s7782_s9 + $0x58] sm:$0xff] }
  0x21   : > { %v6965_v61 = vpack.c.bf16 %v343_v58, %v342_v57  ;;  %v314_v2 = vld [vmem:[%s7782_s9 + $0xe0] sm:$0xff]  ;;  %v315_v3 = vld [vmem:[%s7782_s9 + $0xe8] sm:$0xff]  ;;  %v6926_v6 = vpack.c.bf16 %v297_v63, %v296_v62  ;;  %v344_v7 = vld [vmem:[%s7782_s9 + $0x1d0] sm:$0xff] }
  0x22   : > { %v326_v4 = vld [vmem:[%s7782_s9 + $0x140] sm:$0xff]  ;;  %v327_v5 = vld [vmem:[%s7782_s9 + $0x148] sm:$0xff]  ;;  %v345_v8 = vld [vmem:[%s7782_s9 + $0x1d8] sm:$0xff]  ;;  %v6929_v9 = vpack.c.bf16 %v315_v3, %v314_v2 }
  0x23   : > { %6952 = vmatpush3.bf16.xpose.msk.msra.mxu1 %vm7786_vm1, %v6950_v36  ;;  %v6968_v10 = vpack.c.bf16 %v327_v5, %v326_v4  ;;  %v6971_v11 = vpack.c.bf16 %v345_v8, %v344_v7  ;;  %v298_v12 = vld [vmem:[%s7782_s9 + $0x60] sm:$0xff]  ;;  %v299_v13 = vld [vmem:[%s7782_s9 + $0x68] sm:$0xff]  ;;  %v316_v14 = vld [vmem:[%s7782_s9 + $0xf0] sm:$0xff] }
  0x24   : > { %6955 = vmatprep.subr.msk.bf16.mxu1 %vm7786_vm1, %v6953_v37  ;;  %v317_v15 = vld [vmem:[%s7782_s9 + $0xf8] sm:$0xff]  ;;  %v328_v16 = vld [vmem:[%s7782_s9 + $0x150] sm:$0xff]  ;;  %v6932_v18 = vpack.c.bf16 %v299_v13, %v298_v12  ;;  %v346_v19 = vld [vmem:[%s7782_s9 + $0x1e0] sm:$0xff] }
  0x25   : > { %v329_v17 = vld [vmem:[%s7782_s9 + $0x158] sm:$0xff]  ;;  %v347_v20 = vld [vmem:[%s7782_s9 + $0x1e8] sm:$0xff]  ;;  %v6935_v21 = vpack.c.bf16 %v317_v15, %v316_v14  ;;  %v300_v24 = vld [vmem:[%s7782_s9 + $0x70] sm:$0xff] }
  0x26   : > { %v6974_v22 = vpack.c.bf16 %v329_v17, %v328_v16  ;;  %v6977_v23 = vpack.c.bf16 %v347_v20, %v346_v19  ;;  %v301_v25 = vld [vmem:[%s7782_s9 + $0x78] sm:$0xff]  ;;  %v366_v26 = vld [vmem:[%s7782_s9 + $0x280] sm:$0xff]  ;;  %v367_v27 = vld [vmem:[%s7782_s9 + $0x288] sm:$0xff] }
  0x27   : > { %6910 = vmatpush3.bf16.xpose.msk.msra.mxu0 %vm7786_vm1, %v6908_v32  ;;  %v330_v28 = vld [vmem:[%s7782_s9 + $0x160] sm:$0xff]  ;;  %v331_v29 = vld [vmem:[%s7782_s9 + $0x168] sm:$0xff]  ;;  %v6938_v30 = vpack.c.bf16 %v301_v25, %v300_v24  ;;  %v348_v31 = vld [vmem:[%s7782_s9 + $0x1f0] sm:$0xff]  ;;  %v6989_v33 = vpack.c.bf16 %v367_v27, %v366_v26 }
  0x28   : > { %6913 = vmatprep.subr.msk.bf16.mxu0 %vm7786_vm1, %v6911_v35  ;;  %v349_v32 = vld [vmem:[%s7782_s9 + $0x1f8] sm:$0xff]  ;;  %v6980_v34 = vpack.c.bf16 %v331_v29, %v330_v28  ;;  %v350_v36 = vld [vmem:[%s7782_s9 + $0x200] sm:$0xff]  ;;  %v351_v37 = vld [vmem:[%s7782_s9 + $0x208] sm:$0xff] }
  0x29   : > { %v6983_v35 = vpack.c.bf16 %v349_v32, %v348_v31  ;;  %v368_v38 = vld [vmem:[%s7782_s9 + $0x290] sm:$0xff]  ;;  %v369_v39 = vld [vmem:[%s7782_s9 + $0x298] sm:$0xff]  ;;  %v6992_v42 = vpack.c.bf16 %v351_v37, %v350_v36  ;;  %v398_v43 = vld [vmem:[%s7782_s9 + $0x380] sm:$0xff] }
  0x2a   : > { %v332_v40 = vld [vmem:[%s7782_s9 + $0x170] sm:$0xff]  ;;  %v333_v41 = vld [vmem:[%s7782_s9 + $0x178] sm:$0xff]  ;;  %v7929_v45 = vld [vmem:[%s10843_s1 + $0x8] sm:$0xff]  ;;  %v6995_v46 = vpack.c.bf16 %v369_v39, %v368_v38 }
  0x2b   : > { %6958 = vmatpush3.bf16.xpose.msk.msra.mxu1 %vm7786_vm1, %v6956_v48  ;;  %v352_v50 = vld [vmem:[%s7782_s9 + $0x210] sm:$0xff]  ;;  %v353_v51 = vld [vmem:[%s7782_s9 + $0x218] sm:$0xff]  ;;  %v370_v52 = vld [vmem:[%s7782_s9 + $0x2a0] sm:$0xff] }
  0x2c   : > { %6961 = vmatprep.subr.msk.bf16.mxu1 %vm7786_vm1, %v6959_v49  ;;  %v7940_v49 = vld [vmem:[%s10843_s1 + $0x10] sm:$0xff]  ;;  %v371_v53 = vld [vmem:[%s7782_s9 + $0x2a8] sm:$0xff]  ;;  %v382_v54 = vld [vmem:[%s7782_s9 + $0x300] sm:$0xff] }
  0x2d   : > { %v383_v55 = vld [vmem:[%s7782_s9 + $0x308] sm:$0xff]  ;;  %v400_v57 = vld [vmem:[%s7782_s9 + $0x390] sm:$0xff]  ;;  %v401_v58 = vld [vmem:[%s7782_s9 + $0x398] sm:$0xff] }
  0x2e   : > { %v7043_v62 = vpack.c.bf16 %v401_v58, %v400_v57  ;;  %v354_v63 = vld [vmem:[%s7782_s9 + $0x220] sm:$0xff]  ;;  %v355_v2 = vld [vmem:[%s7782_s9 + $0x228] sm:$0xff]  ;;  %v372_v3 = vld [vmem:[%s7782_s9 + $0x2b0] sm:$0xff] }
  0x2f   : > { %6916 = vmatpush3.bf16.xpose.msk.msra.mxu0 %vm7786_vm1, %v6914_v44  ;;  %v399_v44 = vld [vmem:[%s7782_s9 + $0x388] sm:$0xff]  ;;  %v373_v4 = vld [vmem:[%s7782_s9 + $0x2b8] sm:$0xff]  ;;  %v384_v5 = vld [vmem:[%s7782_s9 + $0x310] sm:$0xff]  ;;  %v7004_v7 = vpack.c.bf16 %v355_v2, %v354_v63 }
  0x30   : > { %6919 = vmatprep.subr.msk.bf16.mxu0 %vm7786_vm1, %v6917_v47  ;;  %v6986_v47 = vpack.c.bf16 %v333_v41, %v332_v40  ;;  %v7037_v48 = vpack.c.bf16 %v399_v44, %v398_v43  ;;  %v402_v8 = vld [vmem:[%s7782_s9 + $0x3a0] sm:$0xff]  ;;  %v356_v13 = vld [vmem:[%s7782_s9 + $0x230] sm:$0xff]  ;;  %v357_v14 = vld [vmem:[%s7782_s9 + $0x238] sm:$0xff] }
  0x31   : > { %v374_v15 = vld [vmem:[%s7782_s9 + $0x2c0] sm:$0xff]  ;;  %v375_v16 = vld [vmem:[%s7782_s9 + $0x2c8] sm:$0xff]  ;;  %v7010_v19 = vpack.c.bf16 %v357_v14, %v356_v13  ;;  %v404_v20 = vld [vmem:[%s7782_s9 + $0x3b0] sm:$0xff]  ;;  %v7716_v13 = vmov 0.0  }
  0x32   : > { %v386_v17 = vld [vmem:[%s7782_s9 + $0x320] sm:$0xff]  ;;  %v359_v26 = vld [vmem:[%s7782_s9 + $0x248] sm:$0xff]  ;;  %v376_v27 = vld [vmem:[%s7782_s9 + $0x2d0] sm:$0xff] }
  0x33   : > { %6964 = vmatpush3.bf16.xpose.msk.msra.mxu1 %vm7786_vm1, %v6962_v60  ;;  %v7001_v60 = vpack.c.bf16 %v371_v53, %v370_v52  ;;  %v358_v25 = vld [vmem:[%s7782_s9 + $0x240] sm:$0xff]  ;;  %v377_v28 = vld [vmem:[%s7782_s9 + $0x2d8] sm:$0xff]  ;;  %v388_v29 = vld [vmem:[%s7782_s9 + $0x330] sm:$0xff] }
  0x34   : > { %6967 = vmatprep.subr.msk.bf16.mxu1 %vm7786_vm1, %v6965_v61  ;;  %v7040_v61 = vpack.c.bf16 %v383_v55, %v382_v54  ;;  %v7016_v31 = vpack.c.bf16 %v359_v26, %v358_v25  ;;  %v406_v32 = vld [vmem:[%s7782_s9 + $0x3c0] sm:$0xff]  ;;  %v360_v37 = vld [vmem:[%s7782_s9 + $0x250] sm:$0xff]  ;;  %v361_v38 = vld [vmem:[%s7782_s9 + $0x258] sm:$0xff] }
  0x35   : > { %v378_v39 = vld [vmem:[%s7782_s9 + $0x2e0] sm:$0xff]  ;;  %v379_v40 = vld [vmem:[%s7782_s9 + $0x2e8] sm:$0xff]  ;;  %v7022_v41 = vpack.c.bf16 %v361_v38, %v360_v37  ;;  %v365_v52 = vld [vmem:[%s7782_s9 + $0x278] sm:$0xff] }
  0x36   : > { %v362_v43 = vld [vmem:[%s7782_s9 + $0x260] sm:$0xff]  ;;  %v363_v44 = vld [vmem:[%s7782_s9 + $0x268] sm:$0xff]  ;;  %v408_v57 = vld [vmem:[%s7782_s9 + $0x3d0] sm:$0xff] }
  0x37   : > { %6922 = vmatpush3.bf16.xpose.msk.msra.mxu0 %vm7786_vm1, %v6920_v56  ;;  %v6998_v56 = vpack.c.bf16 %v353_v51, %v352_v50  ;;  %v364_v51 = vld [vmem:[%s7782_s9 + $0x270] sm:$0xff]  ;;  %v390_v54 = vld [vmem:[%s7782_s9 + $0x340] sm:$0xff]  ;;  %v391_v55 = vld [vmem:[%s7782_s9 + $0x348] sm:$0xff] }
  0x38   : > { %6925 = vmatprep.subr.msk.bf16.mxu0 %vm7786_vm1, %v6923_v59  ;;  %v7963_v59 = vld [vmem:[%s10843_s1 + $0x18] sm:$0xff]  ;;  %v7034_v53 = vpack.c.bf16 %v365_v52, %v364_v51  ;;  %v410_v2 = vld [vmem:[%s7782_s9 + $0x3e0] sm:$0xff] }
  0x39   : > { %v409_v58 = vld [vmem:[%s7782_s9 + $0x3d8] sm:$0xff] }
  0x3b   : > { %6970 = vmatpush3.bf16.xpose.msk.msra.mxu1 %vm7786_vm1, %v6968_v10  ;;  %v7007_v10 = vpack.c.bf16 %v373_v4, %v372_v3  ;;  %v411_v3 = vld [vmem:[%s7782_s9 + $0x3e8] sm:$0xff] }
  0x3c   : > { %6973 = vmatprep.subr.msk.bf16.mxu1 %vm7786_vm1, %v6971_v11  ;;  %v7073_v4 = vpack.c.bf16 %v411_v3, %v410_v2 }
  0x3f   : > { %6928 = vmatpush3.bf16.xpose.msk.msra.mxu0 %vm7786_vm1, %v6926_v6  ;;  %v385_v6 = vld [vmem:[%s7782_s9 + $0x318] sm:$0xff] }
  0x40   : > { %6931 = vmatprep.subr.msk.bf16.mxu0 %vm7786_vm1, %v6929_v9  ;;  %v403_v9 = vld [vmem:[%s7782_s9 + $0x3a8] sm:$0xff]  ;;  %v7046_v11 = vpack.c.bf16 %v385_v6, %v384_v5  ;;  %v394_v5 = vld [vmem:[%s7782_s9 + $0x360] sm:$0xff] }
  0x41   : > { %v7049_v12 = vpack.c.bf16 %v403_v9, %v402_v8  ;;  %v395_v6 = vld [vmem:[%s7782_s9 + $0x368] sm:$0xff]  ;;  %v412_v8 = vld [vmem:[%s7782_s9 + $0x3f0] sm:$0xff]  ;;  %v413_v9 = vld [vmem:[%s7782_s9 + $0x3f8] sm:$0xff] }
  0x43   : > { %6976 = vmatpush3.bf16.xpose.msk.msra.mxu1 %vm7786_vm1, %v6974_v22  ;;  %v7013_v22 = vpack.c.bf16 %v375_v16, %v374_v15 }
  0x44   : > { %6979 = vmatprep.subr.msk.bf16.mxu1 %vm7786_vm1, %v6977_v23 }
  0x47   : > { %6934 = vmatpush3.bf16.xpose.msk.msra.mxu0 %vm7786_vm1, %v6932_v18  ;;  %v387_v18 = vld [vmem:[%s7782_s9 + $0x328] sm:$0xff] }
  0x48   : > { %6937 = vmatprep.subr.msk.bf16.mxu0 %vm7786_vm1, %v6935_v21  ;;  %v405_v21 = vld [vmem:[%s7782_s9 + $0x3b8] sm:$0xff]  ;;  %v7052_v23 = vpack.c.bf16 %v387_v18, %v386_v17 }
  0x49   : > { %v7055_v24 = vpack.c.bf16 %v405_v21, %v404_v20 }
  0x4b   : > { %6982 = vmatpush3.bf16.xpose.msk.msra.mxu1 %vm7786_vm1, %v6980_v34  ;;  %v7019_v34 = vpack.c.bf16 %v377_v28, %v376_v27 }
  0x4c   : > { %6985 = vmatprep.subr.msk.bf16.mxu1 %vm7786_vm1, %v6983_v35 }
  0x4f   : > { %6940 = vmatpush3.bf16.xpose.msk.msra.mxu0 %vm7786_vm1, %v6938_v30  ;;  %v389_v30 = vld [vmem:[%s7782_s9 + $0x338] sm:$0xff] }
  0x50   : > { %6991 = vmatprep.subr.msk.bf16.mxu0 %vm7786_vm1, %v6989_v33  ;;  %v407_v33 = vld [vmem:[%s7782_s9 + $0x3c8] sm:$0xff]  ;;  %v7058_v35 = vpack.c.bf16 %v389_v30, %v388_v29 }
  0x51   : > { %v7061_v36 = vpack.c.bf16 %v407_v33, %v406_v32 }
  0x53   : > { %6988 = vmatpush3.bf16.xpose.msk.msra.mxu1 %vm7786_vm1, %v6986_v47  ;;  %v381_v47 = vld [vmem:[%s7782_s9 + $0x2f8] sm:$0xff] }
  0x54   : > { %7039 = vmatprep.subr.msk.bf16.mxu1 %vm7786_vm1, %v7037_v48  ;;  %v7028_v48 = vpack.c.bf16 %v363_v44, %v362_v43 }
  0x56   : > { %6440 = vmatmul.mubr.msk.f32.vlgmr.msra.gmra.mrb[0].mxu0 %vm414_vm0, %v7768_v0 }
  0x57   : > { %6441 = vmatprep.mubr.msk.f32.mxu0 %vm414_vm0, %v7929_v45  ;;  %6994 = vmatpush3.bf16.xpose.msk.msra.mxu0 %vm7786_vm1, %v6992_v42  ;;  %v7025_v42 = vpack.c.bf16 %v379_v40, %v378_v39 }
  0x58   : > { %6997 = vmatprep.subr.msk.bf16.mxu0 %vm7786_vm1, %v6995_v46  ;;  %v380_v46 = vld [vmem:[%s7782_s9 + $0x2f0] sm:$0xff] }
  0x59   : > { %v7031_v50 = vpack.c.bf16 %v381_v47, %v380_v46 }
  0x5a   : > { %6442 = vmatmul.mubr.msk.f32.gmra.mrb[2].mxu0 %vm414_vm0, %v7929_v45  ;;  %6480 = vmatmul.mubr.msk.f32.vlgmr.msra.gmra.mrb[0].mxu1 %vm414_vm0, %v7768_v0 }
  0x5b   : > { %6443 = vmatprep.mubr.msk.f32.mxu0 %vm414_vm0, %v7940_v49  ;;  %6481 = vmatprep.mubr.msk.f32.mxu1 %vm414_vm0, %v7929_v45 }
  0x5c   : > { %7042 = vmatpush3.bf16.xpose.msk.msra.mxu1 %vm7786_vm1, %v7040_v61  ;;  %v392_v61 = vld [vmem:[%s7782_s9 + $0x350] sm:$0xff] }
  0x5d   : > { %7045 = vmatprep.subr.msk.bf16.mxu1 %vm7786_vm1, %v7043_v62  ;;  %v393_v62 = vld [vmem:[%s7782_s9 + $0x358] sm:$0xff] }
  0x5e   : > { %6444 = vmatmul.mubr.msk.f32.gmra.mrb[4].mxu0 %vm414_vm0, %v7940_v49  ;;  %6482 = vmatmul.mubr.msk.f32.gmra.mrb[2].mxu1 %vm414_vm0, %v7929_v45  ;;  %v7070_v63 = vpack.c.bf16 %v393_v62, %v392_v61 }
  0x5f   : > { %6445 = vmatprep.mubr.msk.f32.mxu0 %vm414_vm0, %v7963_v59  ;;  %7000 = vmatpush3.bf16.xpose.msk.msra.mxu0 %vm7786_vm1, %v6998_v56  ;;  %v7064_v56 = vpack.c.bf16 %v391_v55, %v390_v54 }
  0x60   : > { %7003 = vmatprep.subr.msk.bf16.mxu0 %vm7786_vm1, %v7001_v60  ;;  %6483 = vmatprep.mubr.msk.f32.mxu1 %vm414_vm0, %v7940_v49  ;;  %v7067_v60 = vpack.c.bf16 %v409_v58, %v408_v57  ;;  %v8126_v58 = vld [vmem:[%s10844_s2] sm:$0xff] }
  0x62   : > { %6446 = vmatmul.mubr.msk.f32.gmra.mrb[6].mxu0 %vm414_vm0, %v7963_v59  ;;  %6484 = vmatmul.mubr.msk.f32.gmra.mrb[4].mxu1 %vm414_vm0, %v7940_v49 }
  0x63   : > { %6519 = vmatprep.mubr.msk.f32.mxu0 %vm414_vm0, %v7768_v0  ;;  %6485 = vmatprep.mubr.msk.f32.mxu1 %vm414_vm0, %v7963_v59 }
  0x64   : > { %7048 = vmatpush3.bf16.xpose.msk.msra.mxu1 %vm7786_vm1, %v7046_v11  ;;  %v396_v11 = vld [vmem:[%s7782_s9 + $0x370] sm:$0xff] }
  0x65   : > { %7051 = vmatprep.subr.msk.bf16.mxu1 %vm7786_vm1, %v7049_v12  ;;  %v397_v12 = vld [vmem:[%s7782_s9 + $0x378] sm:$0xff] }
  0x66   : > { %6486 = vmatmul.mubr.msk.f32.gmra.mrb[6].mxu1 %vm414_vm0, %v7963_v59  ;;  %v7082_v14 = vpack.c.bf16 %v397_v12, %v396_v11 }
  0x67   : > { %7006 = vmatpush3.bf16.xpose.msk.msra.mxu0 %vm7786_vm1, %v7004_v7  ;;  %6559 = vmatprep.mubr.msk.f32.mxu1 %vm414_vm0, %v7768_v0  ;;  %v7076_v7 = vpack.c.bf16 %v395_v6, %v394_v5 }
  0x68   : > { %7009 = vmatprep.subr.msk.bf16.mxu0 %vm7786_vm1, %v7007_v10  ;;  %v7079_v10 = vpack.c.bf16 %v413_v9, %v412_v8  ;;  %v8142_v9 = vld [vmem:[%s10844_s2 + $0x10] sm:$0xff] }
  0x6c   : > { %7054 = vmatpush3.bf16.xpose.msk.msra.mxu1 %vm7786_vm1, %v7052_v23 }
  0x6d   : > { %7057 = vmatprep.subr.msk.bf16.mxu1 %vm7786_vm1, %v7055_v24 }
  0x6f   : > { %7012 = vmatpush3.bf16.xpose.msk.msra.mxu0 %vm7786_vm1, %v7010_v19 }
  0x70   : > { %7015 = vmatprep.subr.msk.bf16.mxu0 %vm7786_vm1, %v7013_v22 }
  0x74   : > { %7060 = vmatpush3.bf16.xpose.msk.msra.mxu1 %vm7786_vm1, %v7058_v35 }
  0x75   : > { %7063 = vmatprep.subr.msk.bf16.mxu1 %vm7786_vm1, %v7061_v36 }
  0x77   : > { %7018 = vmatpush3.bf16.xpose.msk.msra.mxu0 %vm7786_vm1, %v7016_v31 }
  0x78   : > { %7021 = vmatprep.subr.msk.bf16.mxu0 %vm7786_vm1, %v7019_v34 }
  0x7c   : > { %7066 = vmatpush3.bf16.xpose.msk.msra.mxu1 %vm7786_vm1, %v7064_v56 }
  0x7d   : > { %7069 = vmatprep.subr.msk.bf16.mxu1 %vm7786_vm1, %v7067_v60 }
  0x7f   : > { %7024 = vmatpush3.bf16.xpose.msk.msra.mxu0 %vm7786_vm1, %v7022_v41 }
  0x80   : > { %7027 = vmatprep.subr.msk.bf16.mxu0 %vm7786_vm1, %v7025_v42 }
  0x84   : > { %7072 = vmatpush3.bf16.xpose.msk.msra.mxu1 %vm7786_vm1, %v7070_v63 }
  0x85   : > { %7075 = vmatprep.subr.msk.bf16.mxu1 %vm7786_vm1, %v7073_v4  ;;  %v8134_v4 = vld [vmem:[%s10844_s2 + $0x8] sm:$0xff] }
  0x87   : > { %7030 = vmatpush3.bf16.xpose.msk.msra.mxu0 %vm7786_vm1, %v7028_v48 }
  0x88   : > { %7033 = vmatprep.subr.msk.bf16.mxu0 %vm7786_vm1, %v7031_v50 }
  0x8c   : > { %7078 = vmatpush3.bf16.xpose.msk.msra.mxu1 %vm7786_vm1, %v7076_v7 }
  0x8d   : > { %7081 = vmatprep.subr.msk.bf16.mxu1 %vm7786_vm1, %v7079_v10  ;;  %v8150_v10 = vld [vmem:[%s10844_s2 + $0x18] sm:$0xff] }
  0x8f   : > { %7036 = vmatpush3.bf16.xpose.msk.msra.mxu0 %vm7786_vm1, %v7034_v53 }
  0x94   : > { %7084 = vmatpush3.bf16.xpose.msk.msra.mxu1 %vm7786_vm1, %v7082_v14 }
  0x96   : > { %6520 = vmatmul.mubr.msk.f32.vlgmr.msra.gmra.mrb[8].mxu0 %vm414_vm0, %v7768_v0 }
  0x97   : > { %6521 = vmatprep.mubr.msk.f32.mxu0 %vm414_vm0, %v7929_v45 }
  0x9a   : > { %6522 = vmatmul.mubr.msk.f32.gmra.mrb[10].mxu0 %vm414_vm0, %v7929_v45 }
  0x9b   : > { %6523 = vmatprep.mubr.msk.f32.mxu0 %vm414_vm0, %v7940_v49  ;;  %6560 = vmatmul.mubr.msk.f32.vlgmr.msra.gmra.mrb[8].mxu1 %vm414_vm0, %v7768_v0 }
  0x9c   : > { %6561 = vmatprep.mubr.msk.f32.mxu1 %vm414_vm0, %v7929_v45 }
  0x9e   : > { %6524 = vmatmul.mubr.msk.f32.gmra.mrb[12].mxu0 %vm414_vm0, %v7940_v49 }
  0x9f   : > { %6525 = vmatprep.mubr.msk.f32.mxu0 %vm414_vm0, %v7963_v59  ;;  %6562 = vmatmul.mubr.msk.f32.gmra.mrb[10].mxu1 %vm414_vm0, %v7929_v45 }
  0xa0   : > { %6563 = vmatprep.mubr.msk.f32.mxu1 %vm414_vm0, %v7940_v49 }
  0xa2   : > { %6526 = vmatmul.mubr.msk.f32.gmra.mrb[14].mxu0 %vm414_vm0, %v7963_v59 }
  0xa3   : > { %1312 = vmatprep.mubr.f32.mxu0 %v7716_v13  ;;  %6564 = vmatmul.mubr.msk.f32.gmra.mrb[12].mxu1 %vm414_vm0, %v7940_v49 }
  0xa4   : > { %6565 = vmatprep.mubr.msk.f32.mxu1 %vm414_vm0, %v7963_v59 }
  0xa7   : > { %6566 = vmatmul.mubr.msk.f32.gmra.mrb[14].mxu1 %vm414_vm0, %v7963_v59 }
  0xa8   : > { %1401 = vmatprep.mubr.f32.mxu1 %v7716_v13 }
 0x129   : > { %v877_v0 = vpop.f32.mrb[0].mxu0 }
 0x12a   : > { %v879_v1 = vpop.f32.mrb[1].mxu0  ;;  %v1167_v15 = vmul.f32 0.01, %v877_v0 }
 0x12b   : > { %v1168_v16 = vmul.f32 0.01, %v879_v1 }
 0x12c   : > { %v1199_v20 = vmax.f32 %v877_v0, %v1167_v15 }
 0x12d   : > { %v883_v17 = vpop.f32.mrb[2].mxu0  ;;  %v1200_v22 = vmax.f32 %v879_v1, %v1168_v16  ;;  %v966_v27 = vpop.f32.mrb[0].mxu1 }
 0x12e   : > { %v1175_v45 = vmul.f32 0.01, %v883_v17  ;;  %v885_v18 = vpop.f32.mrb[3].mxu0  ;;  %v1169_v28 = vmul.f32 0.01, %v966_v27  ;;  %v968_v29 = vpop.f32.mrb[1].mxu1 }
 0x12f   : > { %v1176_v19 = vmul.f32 0.01, %v885_v18  ;;  %v1170_v32 = vmul.f32 0.01, %v968_v29 }
 0x130   : > { %v1207_v21 = vmax.f32 %v883_v17, %v1175_v45  ;;  %v1201_v39 = vmax.f32 %v966_v27, %v1169_v28 }
 0x131   : > { %v1208_v49 = vmax.f32 %v885_v18, %v1176_v19  ;;  %v889_v23 = vpop.f32.mrb[4].mxu0  ;;  %v972_v36 = vpop.f32.mrb[2].mxu1  ;;  %v1202_v44 = vmax.f32 %v968_v29, %v1170_v32 }
 0x132   : > { %v7087_v24 = vpack.c.bf16 %v1207_v21, %v1199_v20  ;;  %v891_v25 = vpop.f32.mrb[5].mxu0  ;;  %v1183_v59 = vmul.f32 0.01, %v889_v23  ;;  %v1177_v40 = vmul.f32 0.01, %v972_v36  ;;  %v974_v41 = vpop.f32.mrb[3].mxu1 }
 0x133   : > { %v7085_v26 = vpack.c.bf16 %v1208_v49, %v1200_v22  ;;  %v1184_v30 = vmul.f32 0.01, %v891_v25  ;;  %v1178_v46 = vmul.f32 0.01, %v974_v41 }
 0x134   : > { %v1215_v37 = vmax.f32 %v889_v23, %v1183_v59  ;;  %v1209_v48 = vmax.f32 %v972_v36, %v1177_v40 }
 0x135   : > { %v895_v31 = vpop.f32.mrb[6].mxu0  ;;  %7086 = vmatprep.subr.bf16.mxu0 %v7085_v26  ;;  %v1216_v42 = vmax.f32 %v891_v25, %v1184_v30  ;;  %v1210_v51 = vmax.f32 %v974_v41, %v1178_v46  ;;  %v978_v52 = vpop.f32.mrb[4].mxu1 }
 0x136   : > { %v1191_v33 = vmul.f32 0.01, %v895_v31  ;;  %v897_v34 = vpop.f32.mrb[7].mxu0  ;;  %7088 = vmatpush1.bf16.msra.mxu0 %v7087_v24  ;;  %v7095_v53 = vpack.c.bf16 %v1209_v48, %v1201_v39  ;;  %v1185_v54 = vmul.f32 0.01, %v978_v52  ;;  %v980_v55 = vpop.f32.mrb[5].mxu1 }
 0x137   : > { %v1192_v35 = vmul.f32 0.01, %v897_v34  ;;  %v7093_v56 = vpack.c.bf16 %v1210_v51, %v1202_v44  ;;  %v1186_v57 = vmul.f32 0.01, %v980_v55 }
 0x138   : > { %v1223_v38 = vmax.f32 %v895_v31, %v1191_v33  ;;  %v1217_v61 = vmax.f32 %v978_v52, %v1185_v54 }
 0x139   : > { %v1224_v43 = vmax.f32 %v897_v34, %v1192_v35  ;;  %v984_v60 = vpop.f32.mrb[6].mxu1  ;;  %7094 = vmatprep.subr.bf16.mxu1 %v7093_v56  ;;  %v1218_v2 = vmax.f32 %v980_v55, %v1186_v57 }
 0x13a   : > { %v7091_v47 = vpack.c.bf16 %v1223_v38, %v1215_v37  ;;  %v1193_v62 = vmul.f32 0.01, %v984_v60  ;;  %v986_v63 = vpop.f32.mrb[7].mxu1  ;;  %7096 = vmatpush1.bf16.msra.mxu1 %v7095_v53 }
 0x13b   : > { %v7089_v50 = vpack.c.bf16 %v1224_v43, %v1216_v42  ;;  %v1194_v3 = vmul.f32 0.01, %v986_v63 }
 0x13c   : > { %v1225_v5 = vmax.f32 %v984_v60, %v1193_v62 }
 0x13d   : > { %7090 = vmatprep.subr.bf16.mxu0 %v7089_v50  ;;  %v1226_v6 = vmax.f32 %v986_v63, %v1194_v3 }
 0x13e   : > { %7092 = vmatpush1.bf16.msra.mxu0 %v7091_v47  ;;  %v7099_v7 = vpack.c.bf16 %v1225_v5, %v1217_v61 }
 0x13f   : > { %v7097_v8 = vpack.c.bf16 %v1226_v6, %v1218_v2 }
 0x141   : > { %6233 = vmatmul.mubr.msk.f32.vlgmr.msra.gmra.mrb[16].mxu0 %vm1235_vm2, %v8126_v58  ;;  %7098 = vmatprep.subr.bf16.mxu1 %v7097_v8 }
 0x142   : > { %1318 = vmatprep.mubr.f32.mxu0 %v7716_v13  ;;  %7100 = vmatpush1.bf16.msra.mxu1 %v7099_v7 }
 0x145   : > { %6234 = vmatmul.mubr.msk.f32.gmra.mrb[18].mxu0 %vm1235_vm2, %v8134_v4  ;;  %6237 = vmatmul.mubr.msk.f32.vlgmr.msra.gmra.mrb[16].mxu1 %vm1235_vm2, %v8126_v58 }
 0x146   : > { %1324 = vmatprep.mubr.f32.mxu0 %v7716_v13  ;;  %1407 = vmatprep.mubr.f32.mxu1 %v7716_v13 }
 0x149   : > { %6235 = vmatmul.mubr.msk.f32.gmra.mrb[20].mxu0 %vm1235_vm2, %v8142_v9  ;;  %6238 = vmatmul.mubr.msk.f32.gmra.mrb[18].mxu1 %vm1235_vm2, %v8134_v4 }
 0x14a   : > { %1330 = vmatprep.mubr.f32.mxu0 %v7716_v13  ;;  %1413 = vmatprep.mubr.f32.mxu1 %v7716_v13 }
 0x14d   : > { %6236 = vmatmul.mubr.msk.f32.gmra.mrb[22].mxu0 %vm1235_vm2, %v8150_v10  ;;  %6239 = vmatmul.mubr.msk.f32.gmra.mrb[20].mxu1 %vm1235_vm2, %v8142_v9 }
 0x14e   : > { %1490 = vmatprep.mubr.f32.mxu0 %v7716_v13  ;;  %1419 = vmatprep.mubr.f32.mxu1 %v7716_v13 }
 0x151   : > { %6240 = vmatmul.mubr.msk.f32.gmra.mrb[22].mxu1 %vm1235_vm2, %v8150_v10 }
 0x152   : > { %1579 = vmatprep.mubr.f32.mxu1 %v7716_v13 }
 0x169   : > { %v1055_v11 = vpop.f32.mrb[8].mxu0 }
 0x16a   : > { %v1171_v12 = vmul.f32 0.01, %v1055_v11  ;;  %v1057_v14 = vpop.f32.mrb[9].mxu0 }
 0x16b   : > { %v1172_v0 = vmul.f32 0.01, %v1057_v14 }
 0x16c   : > { %v1203_v15 = vmax.f32 %v1055_v11, %v1171_v12 }
 0x16d   : > { %v1061_v1 = vpop.f32.mrb[10].mxu0  ;;  %v1204_v45 = vmax.f32 %v1057_v14, %v1172_v0 }
 0x16e   : > { %v1179_v16 = vmul.f32 0.01, %v1061_v1  ;;  %v1063_v17 = vpop.f32.mrb[11].mxu0  ;;  %v1144_v35 = vpop.f32.mrb[8].mxu1 }
 0x16f   : > { %v1180_v18 = vmul.f32 0.01, %v1063_v17  ;;  %v1146_v36 = vpop.f32.mrb[9].mxu1  ;;  %v1173_v39 = vmul.f32 0.01, %v1144_v35 }
 0x170   : > { %v1211_v19 = vmax.f32 %v1061_v1, %v1179_v16  ;;  %v1174_v40 = vmul.f32 0.01, %v1146_v36 }
 0x171   : > { %v1212_v20 = vmax.f32 %v1063_v17, %v1180_v18  ;;  %v1067_v21 = vpop.f32.mrb[12].mxu0  ;;  %v1205_v44 = vmax.f32 %v1144_v35, %v1173_v39 }
 0x172   : > { %v7103_v22 = vpack.c.bf16 %v1211_v19, %v1203_v15  ;;  %v1187_v49 = vmul.f32 0.01, %v1067_v21  ;;  %v1069_v23 = vpop.f32.mrb[13].mxu0  ;;  %v1150_v37 = vpop.f32.mrb[10].mxu1  ;;  %v1206_v46 = vmax.f32 %v1146_v36, %v1174_v40 }
 0x173   : > { %v7101_v24 = vpack.c.bf16 %v1212_v20, %v1204_v45  ;;  %v1188_v25 = vmul.f32 0.01, %v1069_v23  ;;  %v1152_v38 = vpop.f32.mrb[11].mxu1  ;;  %v1181_v42 = vmul.f32 0.01, %v1150_v37 }
 0x174   : > { %v1219_v27 = vmax.f32 %v1067_v21, %v1187_v49  ;;  %v1182_v41 = vmul.f32 0.01, %v1152_v38 }
 0x175   : > { %v1073_v26 = vpop.f32.mrb[14].mxu0  ;;  %7102 = vmatprep.subr.bf16.mxu0 %v7101_v24  ;;  %v1220_v29 = vmax.f32 %v1069_v23, %v1188_v25  ;;  %v1213_v51 = vmax.f32 %v1150_v37, %v1181_v42 }
 0x176   : > { %v1195_v59 = vmul.f32 0.01, %v1073_v26  ;;  %v1075_v28 = vpop.f32.mrb[15].mxu0  ;;  %7104 = vmatpush1.bf16.msra.mxu0 %v7103_v22  ;;  %v1156_v43 = vpop.f32.mrb[12].mxu1  ;;  %v1214_v47 = vmax.f32 %v1152_v38, %v1182_v41 }
 0x177   : > { %v1196_v30 = vmul.f32 0.01, %v1075_v28  ;;  %v1189_v48 = vmul.f32 0.01, %v1156_v43  ;;  %v1158_v50 = vpop.f32.mrb[13].mxu1  ;;  %v7111_v60 = vpack.c.bf16 %v1213_v51, %v1205_v44 }
 0x178   : > { %v1227_v31 = vmax.f32 %v1073_v26, %v1195_v59  ;;  %v1190_v52 = vmul.f32 0.01, %v1158_v50  ;;  %v7109_v54 = vpack.c.bf16 %v1214_v47, %v1206_v46  ;;  %v8194_v47 = vld [vmem:[%s10845_s3] sm:$0xff] }
 0x179   : > { %v1228_v32 = vmax.f32 %v1075_v28, %v1196_v30  ;;  %v1221_v55 = vmax.f32 %v1156_v43, %v1189_v48 }
 0x17a   : > { %v7107_v33 = vpack.c.bf16 %v1227_v31, %v1219_v27  ;;  %v1162_v53 = vpop.f32.mrb[14].mxu1  ;;  %v1222_v61 = vmax.f32 %v1158_v50, %v1190_v52  ;;  %7110 = vmatprep.subr.bf16.mxu1 %v7109_v54 }
 0x17b   : > { %v7105_v34 = vpack.c.bf16 %v1228_v32, %v1220_v29  ;;  %v1197_v56 = vmul.f32 0.01, %v1162_v53  ;;  %v1164_v57 = vpop.f32.mrb[15].mxu1  ;;  %7112 = vmatpush1.bf16.msra.mxu1 %v7111_v60 }
 0x17c   : > { %v1198_v62 = vmul.f32 0.01, %v1164_v57 }
 0x17d   : > { %7106 = vmatprep.subr.bf16.mxu0 %v7105_v34  ;;  %v1229_v63 = vmax.f32 %v1162_v53, %v1197_v56 }
 0x17e   : > { %7108 = vmatpush1.bf16.msra.mxu0 %v7107_v33  ;;  %v1230_v2 = vmax.f32 %v1164_v57, %v1198_v62 }
 0x17f   : > { %v7115_v3 = vpack.c.bf16 %v1229_v63, %v1221_v55 }
 0x180   : > { %v7113_v5 = vpack.c.bf16 %v1230_v2, %v1222_v61 }
 0x181   : > { %6241 = vmatmul.mubr.msk.f32.vlgmr.msra.gmra.mrb[24].mxu0 %vm1235_vm2, %v8126_v58 }
 0x182   : > { %1496 = vmatprep.mubr.f32.mxu0 %v7716_v13  ;;  %7114 = vmatprep.subr.bf16.mxu1 %v7113_v5 }
 0x183   : > { %7116 = vmatpush1.bf16.msra.mxu1 %v7115_v3 }
 0x185   : > { %6242 = vmatmul.mubr.msk.f32.gmra.mrb[26].mxu0 %vm1235_vm2, %v8134_v4 }
 0x186   : > { %1502 = vmatprep.mubr.f32.mxu0 %v7716_v13  ;;  %6245 = vmatmul.mubr.msk.f32.vlgmr.msra.gmra.mrb[24].mxu1 %vm1235_vm2, %v8126_v58 }
 0x187   : > { %1585 = vmatprep.mubr.f32.mxu1 %v7716_v13 }
 0x189   : > { %6243 = vmatmul.mubr.msk.f32.gmra.mrb[28].mxu0 %vm1235_vm2, %v8142_v9 }
 0x18a   : > { %1508 = vmatprep.mubr.f32.mxu0 %v7716_v13  ;;  %6246 = vmatmul.mubr.msk.f32.gmra.mrb[26].mxu1 %vm1235_vm2, %v8134_v4 }
 0x18b   : > { %1591 = vmatprep.mubr.f32.mxu1 %v7716_v13 }
 0x18d   : > { %6244 = vmatmul.mubr.msk.f32.gmra.mrb[30].mxu0 %vm1235_vm2, %v8150_v10 }
 0x18e   : > { %1736 = vmatprep.mubr.f32.mxu0 %v7716_v13  ;;  %6247 = vmatmul.mubr.msk.f32.gmra.mrb[28].mxu1 %vm1235_vm2, %v8142_v9 }
 0x18f   : > { %1597 = vmatprep.mubr.f32.mxu1 %v7716_v13 }
 0x192   : > { %6248 = vmatmul.mubr.msk.f32.gmra.mrb[30].mxu1 %vm1235_vm2, %v8150_v10 }
 0x193   : > { %1807 = vmatprep.mubr.f32.mxu1 %v7716_v13 }
 0x214   : > { %v1314_v6 = vpop.f32.mrb[16].mxu0 }
 0x215   : > { %v1316_v7 = vpop.f32.mrb[17].mxu0  ;;  %v1604_v58 = vmul.f32 0.01, %v1314_v6 }
 0x216   : > { %v1605_v8 = vmul.f32 0.01, %v1316_v7 }
 0x217   : > { %v1636_v0 = vmax.f32 %v1314_v6, %v1604_v58 }
 0x218   : > { %v1320_v11 = vpop.f32.mrb[18].mxu0  ;;  %v1637_v15 = vmax.f32 %v1316_v7, %v1605_v8  ;;  %v1403_v19 = vpop.f32.mrb[16].mxu1 }
 0x219   : > { %v1612_v12 = vmul.f32 0.01, %v1320_v11  ;;  %v1322_v14 = vpop.f32.mrb[19].mxu0  ;;  %v1606_v20 = vmul.f32 0.01, %v1403_v19  ;;  %v1405_v21 = vpop.f32.mrb[17].mxu1 }
 0x21a   : > { %v1613_v4 = vmul.f32 0.01, %v1322_v14  ;;  %v1607_v23 = vmul.f32 0.01, %v1405_v21 }
 0x21b   : > { %v1644_v1 = vmax.f32 %v1320_v11, %v1612_v12  ;;  %v1638_v29 = vmax.f32 %v1403_v19, %v1606_v20 }
 0x21c   : > { %v1645_v16 = vmax.f32 %v1322_v14, %v1613_v4  ;;  %v1326_v9 = vpop.f32.mrb[20].mxu0  ;;  %v1409_v27 = vpop.f32.mrb[18].mxu1  ;;  %v1639_v34 = vmax.f32 %v1405_v21, %v1607_v23 }
 0x21d   : > { %v7119_v17 = vpack.c.bf16 %v1644_v1, %v1636_v0  ;;  %v1328_v45 = vpop.f32.mrb[21].mxu0  ;;  %v1620_v10 = vmul.f32 0.01, %v1326_v9  ;;  %v1614_v30 = vmul.f32 0.01, %v1409_v27  ;;  %v1411_v31 = vpop.f32.mrb[19].mxu1 }
 0x21e   : > { %v7117_v18 = vpack.c.bf16 %v1645_v16, %v1637_v15  ;;  %v1621_v22 = vmul.f32 0.01, %v1328_v45  ;;  %v1615_v35 = vmul.f32 0.01, %v1411_v31 }
 0x21f   : > { %v1652_v59 = vmax.f32 %v1326_v9, %v1620_v10  ;;  %v1646_v37 = vmax.f32 %v1409_v27, %v1614_v30 }
 0x220   : > { %v1332_v49 = vpop.f32.mrb[22].mxu0  ;;  %7118 = vmatprep.subr.bf16.mxu0 %v7117_v18  ;;  %v1653_v32 = vmax.f32 %v1328_v45, %v1621_v22  ;;  %v1647_v39 = vmax.f32 %v1411_v31, %v1615_v35  ;;  %v1415_v40 = vpop.f32.mrb[20].mxu1 }
 0x221   : > { %v1628_v24 = vmul.f32 0.01, %v1332_v49  ;;  %v1334_v25 = vpop.f32.mrb[23].mxu0  ;;  %7120 = vmatpush1.bf16.msra.mxu0 %v7119_v17  ;;  %v7127_v41 = vpack.c.bf16 %v1646_v37, %v1638_v29  ;;  %v1622_v42 = vmul.f32 0.01, %v1415_v40  ;;  %v1417_v43 = vpop.f32.mrb[21].mxu1 }
 0x222   : > { %v1629_v26 = vmul.f32 0.01, %v1334_v25  ;;  %v7125_v44 = vpack.c.bf16 %v1647_v39, %v1639_v34  ;;  %v1623_v46 = vmul.f32 0.01, %v1417_v43 }
 0x223   : > { %v1660_v28 = vmax.f32 %v1332_v49, %v1628_v24  ;;  %v1654_v50 = vmax.f32 %v1415_v40, %v1622_v42 }
 0x224   : > { %v1661_v33 = vmax.f32 %v1334_v25, %v1629_v26  ;;  %v1421_v48 = vpop.f32.mrb[22].mxu1  ;;  %7126 = vmatprep.subr.bf16.mxu1 %v7125_v44  ;;  %v1655_v53 = vmax.f32 %v1417_v43, %v1623_v46 }
 0x225   : > { %v7123_v36 = vpack.c.bf16 %v1660_v28, %v1652_v59  ;;  %v1630_v51 = vmul.f32 0.01, %v1421_v48  ;;  %v1423_v52 = vpop.f32.mrb[23].mxu1  ;;  %7128 = vmatpush1.bf16.msra.mxu1 %v7127_v41 }
 0x226   : > { %v7121_v38 = vpack.c.bf16 %v1661_v33, %v1653_v32  ;;  %v1631_v54 = vmul.f32 0.01, %v1423_v52 }
 0x227   : > { %v1662_v55 = vmax.f32 %v1421_v48, %v1630_v51 }
 0x228   : > { %7122 = vmatprep.subr.bf16.mxu0 %v7121_v38  ;;  %v1663_v56 = vmax.f32 %v1423_v52, %v1631_v54 }
 0x229   : > { %7124 = vmatpush1.bf16.msra.mxu0 %v7123_v36  ;;  %v7131_v57 = vpack.c.bf16 %v1662_v55, %v1654_v50 }
 0x22a   : > { %v7129_v60 = vpack.c.bf16 %v1663_v56, %v1655_v53 }
 0x22c   : > { %6249 = vmatmul.mubr.msk.f32.vlgmr.msra.gmra.mrb[32].mxu0 %vm1235_vm2, %v8194_v47  ;;  %7130 = vmatprep.subr.bf16.mxu1 %v7129_v60 }
 0x22d   : > { %1878 = vmatprep.mubr.f32.mxu0 %v7716_v13  ;;  %7132 = vmatpush1.bf16.msra.mxu1 %v7131_v57 }
 0x230   : > { %6250 = vmatmul.mubr.msk.f32.vlgmr.msra.gmra.mrb[32].mxu1 %vm1235_vm2, %v8194_v47 }
 0x231   : > { %1949 = vmatprep.mubr.f32.mxu1 %v7716_v13 }
 0x254   : > { %v1492_v61 = vpop.f32.mrb[24].mxu0 }
 0x255   : > { %v1608_v62 = vmul.f32 0.01, %v1492_v61  ;;  %v1494_v63 = vpop.f32.mrb[25].mxu0 }
 0x256   : > { %v1609_v2 = vmul.f32 0.01, %v1494_v63 }
 0x257   : > { %v1640_v5 = vmax.f32 %v1492_v61, %v1608_v62  ;;  %v1972_v61 = vld [vmem:[%s10846_s4] sm:$0xff] }
 0x258   : > { %v1498_v3 = vpop.f32.mrb[26].mxu0  ;;  %v1641_v58 = vmax.f32 %v1494_v63, %v1609_v2 }
 0x259   : > { %v1616_v6 = vmul.f32 0.01, %v1498_v3  ;;  %v1500_v7 = vpop.f32.mrb[27].mxu0  ;;  %v1581_v23 = vpop.f32.mrb[24].mxu1 }
 0x25a   : > { %v1617_v8 = vmul.f32 0.01, %v1500_v7  ;;  %v1610_v24 = vmul.f32 0.01, %v1581_v23  ;;  %v1583_v25 = vpop.f32.mrb[25].mxu1 }
 0x25b   : > { %v1648_v11 = vmax.f32 %v1498_v3, %v1616_v6  ;;  %v1611_v26 = vmul.f32 0.01, %v1583_v25 }
 0x25c   : > { %v1649_v12 = vmax.f32 %v1500_v7, %v1617_v8  ;;  %v1504_v14 = vpop.f32.mrb[28].mxu0  ;;  %v1642_v59 = vmax.f32 %v1581_v23, %v1610_v24 }
 0x25d   : > { %v7135_v4 = vpack.c.bf16 %v1648_v11, %v1640_v5  ;;  %v1624_v0 = vmul.f32 0.01, %v1504_v14  ;;  %v1506_v1 = vpop.f32.mrb[29].mxu0  ;;  %v1587_v27 = vpop.f32.mrb[26].mxu1  ;;  %v1643_v30 = vmax.f32 %v1583_v25, %v1611_v26  ;;  %v1974_v5 = vld [vmem:[%s10846_s4 + $0x10] sm:$0xff] }
 0x25e   : > { %v7133_v15 = vpack.c.bf16 %v1649_v12, %v1641_v58  ;;  %v1625_v16 = vmul.f32 0.01, %v1506_v1  ;;  %v1618_v28 = vmul.f32 0.01, %v1587_v27  ;;  %v1589_v29 = vpop.f32.mrb[27].mxu1  ;;  %v1975_v58 = vld [vmem:[%s10846_s4 + $0x18] sm:$0xff] }
 0x25f   : > { %v1656_v17 = vmax.f32 %v1504_v14, %v1624_v0  ;;  %v1619_v31 = vmul.f32 0.01, %v1589_v29 }
 0x260   : > { %v1510_v9 = vpop.f32.mrb[30].mxu0  ;;  %7134 = vmatprep.subr.bf16.mxu0 %v7133_v15  ;;  %v1657_v19 = vmax.f32 %v1506_v1, %v1625_v16  ;;  %v1650_v33 = vmax.f32 %v1587_v27, %v1618_v28 }
 0x261   : > { %v1632_v45 = vmul.f32 0.01, %v1510_v9  ;;  %v1512_v18 = vpop.f32.mrb[31].mxu0  ;;  %7136 = vmatpush1.bf16.msra.mxu0 %v7135_v4  ;;  %v1593_v32 = vpop.f32.mrb[28].mxu1  ;;  %v1651_v36 = vmax.f32 %v1589_v29, %v1619_v31 }
 0x262   : > { %v1633_v10 = vmul.f32 0.01, %v1512_v18  ;;  %v1626_v34 = vmul.f32 0.01, %v1593_v32  ;;  %v1595_v35 = vpop.f32.mrb[29].mxu1  ;;  %v7143_v38 = vpack.c.bf16 %v1650_v33, %v1642_v59 }
 0x263   : > { %v1664_v20 = vmax.f32 %v1510_v9, %v1632_v45  ;;  %v1627_v37 = vmul.f32 0.01, %v1595_v35  ;;  %v7141_v39 = vpack.c.bf16 %v1651_v36, %v1643_v30 }
 0x264   : > { %v1665_v21 = vmax.f32 %v1512_v18, %v1633_v10  ;;  %v1658_v41 = vmax.f32 %v1593_v32, %v1626_v34 }
 0x265   : > { %v7139_v22 = vpack.c.bf16 %v1664_v20, %v1656_v17  ;;  %v1599_v40 = vpop.f32.mrb[30].mxu1  ;;  %v1659_v44 = vmax.f32 %v1595_v35, %v1627_v37  ;;  %7142 = vmatprep.subr.bf16.mxu1 %v7141_v39 }
 0x266   : > { %v7137_v49 = vpack.c.bf16 %v1665_v21, %v1657_v19  ;;  %v1634_v42 = vmul.f32 0.01, %v1599_v40  ;;  %v1601_v43 = vpop.f32.mrb[31].mxu1  ;;  %7144 = vmatpush1.bf16.msra.mxu1 %v7143_v38 }
 0x267   : > { %v1635_v46 = vmul.f32 0.01, %v1601_v43 }
 0x268   : > { %7138 = vmatprep.subr.bf16.mxu0 %v7137_v49  ;;  %v1666_v48 = vmax.f32 %v1599_v40, %v1634_v42 }
 0x269   : > { %7140 = vmatpush1.bf16.msra.mxu0 %v7139_v22  ;;  %v1667_v50 = vmax.f32 %v1601_v43, %v1635_v46 }
 0x26a   : > { %v7147_v51 = vpack.c.bf16 %v1666_v48, %v1658_v41 }
 0x26b   : > { %v7145_v52 = vpack.c.bf16 %v1667_v50, %v1659_v44 }
 0x26c   : > { %6251 = vmatmul.mubr.msk.f32.vlgmr.msra.gmra.mrb[34].mxu0 %vm1235_vm2, %v8194_v47 }
 0x26d   : > { %2053 = vmatprep.mubr.f32.mxu0 %v7716_v13  ;;  %7146 = vmatprep.subr.bf16.mxu1 %v7145_v52 }
 0x26e   : > { %7148 = vmatpush1.bf16.msra.mxu1 %v7147_v51 }
 0x271   : > { %6252 = vmatmul.mubr.msk.f32.vlgmr.msra.gmra.mrb[34].mxu1 %vm1235_vm2, %v8194_v47  ;;  %v1973_v47 = vld [vmem:[%s10846_s4 + $0x8] sm:$0xff] }
 0x272   : > { %2142 = vmatprep.mubr.f32.mxu1 %v7716_v13 }
 0x2ff   : > { %v1738_v53 = vpop.f32.mrb[32].mxu0 }
 0x300   : > { %v1956_v54 = vmul.f32 0.01, %v1738_v53  ;;  %v1740_v55 = vpop.f32.mrb[33].mxu0 }
 0x301   : > { %v1957_v56 = vmul.f32 0.01, %v1740_v55 }
 0x302   : > { %v1964_v60 = vmax.f32 %v1738_v53, %v1956_v54 }
 0x303   : > { %v1965_v57 = vmax.f32 %v1740_v55, %v1957_v56  ;;  %v1809_v62 = vpop.f32.mrb[32].mxu1 }
 0x304   : > { %v1958_v63 = vmul.f32 0.01, %v1809_v62  ;;  %v1811_v2 = vpop.f32.mrb[33].mxu1 }
 0x305   : > { %1989 = vmatprep.subr.mxu0 %v1965_v57  ;;  %v1959_v3 = vmul.f32 0.01, %v1811_v2 }
 0x306   : > { %1990 = vmatpush1.msra.mxu0 %v1964_v60  ;;  %v1966_v6 = vmax.f32 %v1809_v62, %v1958_v63 }
 0x307   : > { %6253 = vmatmul.mubr.msk.f32.vlgmr.msra.gmra.mrb[36].mxu0 %vm1976_vm3, %v1972_v61  ;;  %v1967_v7 = vmax.f32 %v1811_v2, %v1959_v3  ;;  %v8255_v3 = vld [vmem:[%s10847_s5] sm:$0xff] }
 0x308   : > { %2059 = vmatprep.mubr.f32.mxu0 %v7716_v13 }
 0x309   : > { %2078 = vmatprep.subr.mxu1 %v1967_v7 }
 0x30a   : > { %2079 = vmatpush1.msra.mxu1 %v1966_v6 }
 0x30b   : > { %6254 = vmatmul.mubr.msk.f32.gmra.mrb[38].mxu0 %vm1976_vm3, %v1973_v47  ;;  %6257 = vmatmul.mubr.msk.f32.vlgmr.msra.gmra.mrb[36].mxu1 %vm1976_vm3, %v1972_v61 }
 0x30c   : > { %2065 = vmatprep.mubr.f32.mxu0 %v7716_v13  ;;  %2148 = vmatprep.mubr.f32.mxu1 %v7716_v13 }
 0x30f   : > { %6255 = vmatmul.mubr.msk.f32.gmra.mrb[40].mxu0 %vm1976_vm3, %v1974_v5  ;;  %6258 = vmatmul.mubr.msk.f32.gmra.mrb[38].mxu1 %vm1976_vm3, %v1973_v47 }
 0x310   : > { %2071 = vmatprep.mubr.f32.mxu0 %v7716_v13  ;;  %2154 = vmatprep.mubr.f32.mxu1 %v7716_v13 }
 0x313   : > { %6256 = vmatmul.mubr.msk.f32.gmra.mrb[42].mxu0 %vm1976_vm3, %v1975_v58  ;;  %6259 = vmatmul.mubr.msk.f32.gmra.mrb[40].mxu1 %vm1976_vm3, %v1974_v5 }
 0x314   : > { %2231 = vmatprep.mubr.f32.mxu0 %v7716_v13  ;;  %2160 = vmatprep.mubr.f32.mxu1 %v7716_v13 }
 0x317   : > { %6260 = vmatmul.mubr.msk.f32.gmra.mrb[42].mxu1 %vm1976_vm3, %v1975_v58 }
 0x318   : > { %2320 = vmatprep.mubr.f32.mxu1 %v7716_v13 }
 0x33f   : > { %v1880_v8 = vpop.f32.mrb[34].mxu0 }
 0x340   : > { %v1960_v11 = vmul.f32 0.01, %v1880_v8  ;;  %v1882_v12 = vpop.f32.mrb[35].mxu0 }
 0x341   : > { %v1961_v14 = vmul.f32 0.01, %v1882_v12 }
 0x342   : > { %v1968_v4 = vmax.f32 %v1880_v8, %v1960_v11 }
 0x343   : > { %v1969_v0 = vmax.f32 %v1882_v12, %v1961_v14  ;;  %v8263_v12 = vld [vmem:[%s10847_s5 + $0x8] sm:$0xff] }
 0x344   : > { %v1951_v1 = vpop.f32.mrb[34].mxu1 }
 0x345   : > { %2167 = vmatprep.subr.mxu0 %v1969_v0  ;;  %v1962_v15 = vmul.f32 0.01, %v1951_v1  ;;  %v1953_v16 = vpop.f32.mrb[35].mxu1 }
 0x346   : > { %2168 = vmatpush1.msra.mxu0 %v1968_v4  ;;  %v1963_v9 = vmul.f32 0.01, %v1953_v16 }
 0x347   : > { %6261 = vmatmul.mubr.msk.f32.vlgmr.msra.gmra.mrb[44].mxu0 %vm1976_vm3, %v1972_v61  ;;  %v1970_v17 = vmax.f32 %v1951_v1, %v1962_v15 }
 0x348   : > { %2237 = vmatprep.mubr.f32.mxu0 %v7716_v13  ;;  %v1971_v45 = vmax.f32 %v1953_v16, %v1963_v9 }
 0x34a   : > { %2256 = vmatprep.subr.mxu1 %v1971_v45 }
 0x34b   : > { %6262 = vmatmul.mubr.msk.f32.gmra.mrb[46].mxu0 %vm1976_vm3, %v1973_v47  ;;  %2257 = vmatpush1.msra.mxu1 %v1970_v17 }
 0x34c   : > { %2243 = vmatprep.mubr.f32.mxu0 %v7716_v13  ;;  %6265 = vmatmul.mubr.msk.f32.vlgmr.msra.gmra.mrb[44].mxu1 %vm1976_vm3, %v1972_v61 }
 0x34d   : > { %2326 = vmatprep.mubr.f32.mxu1 %v7716_v13 }
 0x34f   : > { %6263 = vmatmul.mubr.msk.f32.gmra.mrb[48].mxu0 %vm1976_vm3, %v1974_v5 }
 0x350   : > { %2249 = vmatprep.mubr.f32.mxu0 %v7716_v13  ;;  %6266 = vmatmul.mubr.msk.f32.gmra.mrb[46].mxu1 %vm1976_vm3, %v1973_v47 }
 0x351   : > { %2332 = vmatprep.mubr.f32.mxu1 %v7716_v13 }
 0x353   : > { %6264 = vmatmul.mubr.msk.f32.gmra.mrb[50].mxu0 %vm1976_vm3, %v1975_v58 }
 0x354   : > { %2481 = vmatprep.mubr.f32.mxu0 %v7716_v13  ;;  %6267 = vmatmul.mubr.msk.f32.gmra.mrb[48].mxu1 %vm1976_vm3, %v1974_v5 }
 0x355   : > { %2338 = vmatprep.mubr.f32.mxu1 %v7716_v13 }
 0x358   : > { %6268 = vmatmul.mubr.msk.f32.gmra.mrb[50].mxu1 %vm1976_vm3, %v1975_v58 }
 0x359   : > { %2558 = vmatprep.mubr.f32.mxu1 %v7716_v13 }
 0x3da   : > { %v2055_v18 = vpop.f32.mrb[36].mxu0 }
 0x3db   : > { %v2057_v19 = vpop.f32.mrb[37].mxu0  ;;  %v2345_v10 = vmul.f32 0.01, %v2055_v18 }
 0x3dc   : > { %v2346_v20 = vmul.f32 0.01, %v2057_v19 }
 0x3dd   : > { %v2377_v24 = vmax.f32 %v2055_v18, %v2345_v10 }
 0x3de   : > { %v2061_v21 = vpop.f32.mrb[38].mxu0  ;;  %v2378_v26 = vmax.f32 %v2057_v19, %v2346_v20  ;;  %v2144_v31 = vpop.f32.mrb[36].mxu1 }
 0x3df   : > { %v2353_v22 = vmul.f32 0.01, %v2061_v21  ;;  %v2063_v49 = vpop.f32.mrb[39].mxu0  ;;  %v2347_v33 = vmul.f32 0.01, %v2144_v31  ;;  %v2146_v34 = vpop.f32.mrb[37].mxu1 }
 0x3e0   : > { %v2354_v23 = vmul.f32 0.01, %v2063_v49  ;;  %v2348_v37 = vmul.f32 0.01, %v2146_v34 }
 0x3e1   : > { %v2385_v25 = vmax.f32 %v2061_v21, %v2353_v22  ;;  %v2379_v44 = vmax.f32 %v2144_v31, %v2347_v33 }
 0x3e2   : > { %v2386_v27 = vmax.f32 %v2063_v49, %v2354_v23  ;;  %v2067_v59 = vpop.f32.mrb[40].mxu0  ;;  %v2150_v41 = vpop.f32.mrb[38].mxu1  ;;  %v2380_v52 = vmax.f32 %v2146_v34, %v2348_v37 }
 0x3e3   : > { %v7151_v28 = vpack.c.bf16 %v2385_v25, %v2377_v24  ;;  %v2069_v29 = vpop.f32.mrb[41].mxu0  ;;  %v2361_v32 = vmul.f32 0.01, %v2067_v59  ;;  %v2355_v46 = vmul.f32 0.01, %v2150_v41  ;;  %v2152_v48 = vpop.f32.mrb[39].mxu1 }
 0x3e4   : > { %v7149_v30 = vpack.c.bf16 %v2386_v27, %v2378_v26  ;;  %v2362_v35 = vmul.f32 0.01, %v2069_v29  ;;  %v2356_v53 = vmul.f32 0.01, %v2152_v48 }
 0x3e5   : > { %v2393_v42 = vmax.f32 %v2067_v59, %v2361_v32  ;;  %v2387_v55 = vmax.f32 %v2150_v41, %v2355_v46 }
 0x3e6   : > { %v2073_v36 = vpop.f32.mrb[42].mxu0  ;;  %7150 = vmatprep.subr.bf16.mxu0 %v7149_v30  ;;  %v2394_v50 = vmax.f32 %v2069_v29, %v2362_v35  ;;  %v2388_v57 = vmax.f32 %v2152_v48, %v2356_v53  ;;  %v2156_v60 = vpop.f32.mrb[40].mxu1 }
 0x3e7   : > { %v2369_v38 = vmul.f32 0.01, %v2073_v36  ;;  %v2075_v39 = vpop.f32.mrb[43].mxu0  ;;  %7152 = vmatpush1.bf16.msra.mxu0 %v7151_v28  ;;  %v7159_v61 = vpack.c.bf16 %v2387_v55, %v2379_v44  ;;  %v2363_v47 = vmul.f32 0.01, %v2156_v60  ;;  %v2158_v62 = vpop.f32.mrb[41].mxu1 }
 0x3e8   : > { %v2370_v40 = vmul.f32 0.01, %v2075_v39  ;;  %v7157_v63 = vpack.c.bf16 %v2388_v57, %v2380_v52  ;;  %v2364_v2 = vmul.f32 0.01, %v2158_v62 }
 0x3e9   : > { %v2401_v43 = vmax.f32 %v2073_v36, %v2369_v38  ;;  %v2395_v6 = vmax.f32 %v2156_v60, %v2363_v47 }
 0x3ea   : > { %v2402_v51 = vmax.f32 %v2075_v39, %v2370_v40  ;;  %v2162_v5 = vpop.f32.mrb[42].mxu1  ;;  %7158 = vmatprep.subr.bf16.mxu1 %v7157_v63  ;;  %v2396_v8 = vmax.f32 %v2158_v62, %v2364_v2 }
 0x3eb   : > { %v7155_v54 = vpack.c.bf16 %v2401_v43, %v2393_v42  ;;  %v2371_v7 = vmul.f32 0.01, %v2162_v5  ;;  %v2164_v58 = vpop.f32.mrb[43].mxu1  ;;  %7160 = vmatpush1.bf16.msra.mxu1 %v7159_v61 }
 0x3ec   : > { %v7153_v56 = vpack.c.bf16 %v2402_v51, %v2394_v50  ;;  %v2372_v11 = vmul.f32 0.01, %v2164_v58 }
 0x3ed   : > { %v2403_v14 = vmax.f32 %v2162_v5, %v2371_v7 }
 0x3ee   : > { %7154 = vmatprep.subr.bf16.mxu0 %v7153_v56  ;;  %v2404_v4 = vmax.f32 %v2164_v58, %v2372_v11 }
 0x3ef   : > { %7156 = vmatpush1.bf16.msra.mxu0 %v7155_v54  ;;  %v7163_v0 = vpack.c.bf16 %v2403_v14, %v2395_v6 }
 0x3f0   : > { %v7161_v1 = vpack.c.bf16 %v2404_v4, %v2396_v8 }
 0x3f2   : > { %6269 = vmatmul.mubr.msk.f32.vlgmr.msra.gmra.mrb[52].mxu0 %vm1235_vm2, %v8255_v3  ;;  %7162 = vmatprep.subr.bf16.mxu1 %v7161_v1 }
 0x3f3   : > { %2487 = vmatprep.mubr.f32.mxu0 %v7716_v13  ;;  %7164 = vmatpush1.bf16.msra.mxu1 %v7163_v0 }
 0x3f6   : > { %6270 = vmatmul.mubr.msk.f32.gmra.mrb[54].mxu0 %vm1235_vm2, %v8263_v12  ;;  %6271 = vmatmul.mubr.msk.f32.vlgmr.msra.gmra.mrb[52].mxu1 %vm1235_vm2, %v8255_v3 }
 0x3f7   : > { %2635 = vmatprep.mubr.f32.mxu0 %v7716_v13  ;;  %2564 = vmatprep.mubr.f32.mxu1 %v7716_v13 }
 0x3fa   : > { %6272 = vmatmul.mubr.msk.f32.gmra.mrb[54].mxu1 %vm1235_vm2, %v8263_v12 }
 0x3fb   : > { %2712 = vmatprep.mubr.f32.mxu1 %v7716_v13 }
 0x41a   : > { %v2233_v15 = vpop.f32.mrb[44].mxu0 }
 0x41b   : > { %v2349_v16 = vmul.f32 0.01, %v2233_v15  ;;  %v2235_v9 = vpop.f32.mrb[45].mxu0 }
 0x41c   : > { %v2350_v17 = vmul.f32 0.01, %v2235_v9 }
 0x41d   : > { %v2381_v18 = vmax.f32 %v2233_v15, %v2349_v16  ;;  %v2757_v15 = vld [vmem:[%s10848_s6] sm:$0xff]  ;;  %v2758_v16 = vld [vmem:[%s10848_s6 + $0x8] sm:$0xff] }
 0x41e   : > { %v2239_v45 = vpop.f32.mrb[46].mxu0  ;;  %v2382_v20 = vmax.f32 %v2235_v9, %v2350_v17  ;;  %v7181_v17 = vpack.c.bf16 %v2758_v16, %v2757_v15 }
 0x41f   : > { %v2357_v19 = vmul.f32 0.01, %v2239_v45  ;;  %v2241_v10 = vpop.f32.mrb[47].mxu0  ;;  %v2322_v38 = vpop.f32.mrb[44].mxu1 }
 0x420   : > { %v2358_v21 = vmul.f32 0.01, %v2241_v10  ;;  %v2351_v39 = vmul.f32 0.01, %v2322_v38  ;;  %v2324_v40 = vpop.f32.mrb[45].mxu1 }
 0x421   : > { %v2389_v22 = vmax.f32 %v2239_v45, %v2357_v19  ;;  %v2352_v41 = vmul.f32 0.01, %v2324_v40 }
 0x422   : > { %v2390_v49 = vmax.f32 %v2241_v10, %v2358_v21  ;;  %v2245_v23 = vpop.f32.mrb[48].mxu0  ;;  %v2383_v43 = vmax.f32 %v2322_v38, %v2351_v39 }
 0x423   : > { %v7167_v24 = vpack.c.bf16 %v2389_v22, %v2381_v18  ;;  %v2365_v25 = vmul.f32 0.01, %v2245_v23  ;;  %v2247_v26 = vpop.f32.mrb[49].mxu0  ;;  %v2328_v42 = vpop.f32.mrb[46].mxu1  ;;  %v2384_v48 = vmax.f32 %v2324_v40, %v2352_v41 }
 0x424   : > { %v7165_v27 = vpack.c.bf16 %v2390_v49, %v2382_v20  ;;  %v2366_v59 = vmul.f32 0.01, %v2247_v26  ;;  %v2359_v44 = vmul.f32 0.01, %v2328_v42  ;;  %v2330_v46 = vpop.f32.mrb[47].mxu1 }
 0x425   : > { %v2397_v29 = vmax.f32 %v2245_v23, %v2365_v25  ;;  %v2360_v50 = vmul.f32 0.01, %v2330_v46 }
 0x426   : > { %v2251_v28 = vpop.f32.mrb[50].mxu0  ;;  %7166 = vmatprep.subr.bf16.mxu0 %v7165_v27  ;;  %v2398_v32 = vmax.f32 %v2247_v26, %v2366_v59  ;;  %v2391_v51 = vmax.f32 %v2328_v42, %v2359_v44 }
 0x427   : > { %v2373_v30 = vmul.f32 0.01, %v2251_v28  ;;  %v2253_v31 = vpop.f32.mrb[51].mxu0  ;;  %7168 = vmatpush1.bf16.msra.mxu0 %v7167_v24  ;;  %v2392_v52 = vmax.f32 %v2330_v46, %v2360_v50  ;;  %v2334_v53 = vpop.f32.mrb[48].mxu1 }
 0x428   : > { %v2374_v33 = vmul.f32 0.01, %v2253_v31  ;;  %v7175_v54 = vpack.c.bf16 %v2391_v51, %v2383_v43  ;;  %v2367_v55 = vmul.f32 0.01, %v2334_v53  ;;  %v2336_v56 = vpop.f32.mrb[49].mxu1 }
 0x429   : > { %v2405_v34 = vmax.f32 %v2251_v28, %v2373_v30  ;;  %v7173_v57 = vpack.c.bf16 %v2392_v52, %v2384_v48  ;;  %v2368_v60 = vmul.f32 0.01, %v2336_v56 }
 0x42a   : > { %v2406_v35 = vmax.f32 %v2253_v31, %v2374_v33  ;;  %v2399_v47 = vmax.f32 %v2334_v53, %v2367_v55 }
 0x42b   : > { %v7171_v36 = vpack.c.bf16 %v2405_v34, %v2397_v29  ;;  %v2340_v61 = vpop.f32.mrb[50].mxu1  ;;  %7174 = vmatprep.subr.bf16.mxu1 %v7173_v57  ;;  %v2400_v2 = vmax.f32 %v2336_v56, %v2368_v60 }
 0x42c   : > { %v7169_v37 = vpack.c.bf16 %v2406_v35, %v2398_v32  ;;  %v2375_v62 = vmul.f32 0.01, %v2340_v61  ;;  %v2342_v63 = vpop.f32.mrb[51].mxu1  ;;  %7176 = vmatpush1.bf16.msra.mxu1 %v7175_v54 }
 0x42d   : > { %v2376_v5 = vmul.f32 0.01, %v2342_v63 }
 0x42e   : > { %7170 = vmatprep.subr.bf16.mxu0 %v7169_v37  ;;  %v2407_v6 = vmax.f32 %v2340_v61, %v2375_v62 }
 0x42f   : > { %7172 = vmatpush1.bf16.msra.mxu0 %v7171_v36  ;;  %v2408_v7 = vmax.f32 %v2342_v63, %v2376_v5 }
 0x430   : > { %v7179_v58 = vpack.c.bf16 %v2407_v6, %v2399_v47  ;;  %7182 = vmatprep.subr.bf16.mxu0 %v7181_v17 }
 0x431   : > { %v7177_v8 = vpack.c.bf16 %v2408_v7, %v2400_v2 }
 0x432   : > { %6273 = vmatmul.mubr.msk.f32.vlgmr.msra.gmra.mrb[56].mxu0 %vm1235_vm2, %v8255_v3 }
 0x433   : > { %2641 = vmatprep.mubr.f32.mxu0 %v7716_v13  ;;  %7178 = vmatprep.subr.bf16.mxu1 %v7177_v8 }
 0x434   : > { %7180 = vmatpush1.bf16.msra.mxu1 %v7179_v58  ;;  %7184 = vmatpush3.bf16.msra.mxu0 %v7181_v17 }
 0x435   : > { %7185 = vmatprep.subr.bf16.mxu1 %v7181_v17 }
 0x436   : > { %6274 = vmatmul.mubr.msk.f32.gmra.mrb[58].mxu0 %vm1235_vm2, %v8263_v12 }
 0x437   : > { %6275 = vmatmul.mubr.msk.f32.vlgmr.msra.gmra.mrb[56].mxu1 %vm1235_vm2, %v8255_v3 }
 0x438   : > { %2718 = vmatprep.mubr.f32.mxu1 %v7716_v13  ;;  %7186 = vmatpush3.bf16.msra.mxu1 %v7181_v17 }
 0x43b   : > { %6276 = vmatmul.mubr.msk.f32.gmra.mrb[58].mxu1 %vm1235_vm2, %v8263_v12 }
 0x4c5   : > { %v2483_v11 = vpop.f32.mrb[52].mxu0 }
 0x4c6   : > { %v2725_v14 = vmul.f32 0.01, %v2483_v11  ;;  %v2485_v4 = vpop.f32.mrb[53].mxu0 }
 0x4c7   : > { %v2726_v0 = vmul.f32 0.01, %v2485_v4 }
 0x4c8   : > { %v2741_v1 = vmax.f32 %v2483_v11, %v2725_v14 }
 0x4c9   : > { %v2489_v9 = vpop.f32.mrb[54].mxu0  ;;  %v2742_v3 = vmax.f32 %v2485_v4, %v2726_v0  ;;  %v2560_v10 = vpop.f32.mrb[52].mxu1 }
 0x4ca   : > { %v2733_v13 = vmul.f32 0.01, %v2489_v9  ;;  %2759 = vxpose.xlu0.b32.start [1/2] (short) %v2741_v1, 128  ;;  %v2491_v45 = vpop.f32.mrb[55].mxu0  ;;  %v2562_v20 = vpop.f32.mrb[53].mxu1  ;;  %v2727_v49 = vmul.f32 0.01, %v2560_v10 }
 0x4cb   : > { %v2734_v12 = vmul.f32 0.01, %v2491_v45  ;;  %2791 = vxpose.xlu1.b32.start [1/2] (short) %v2742_v3, 128  ;;  %v2728_v23 = vmul.f32 0.01, %v2562_v20 }
 0x4cc   : > { %v2749_v18 = vmax.f32 %v2489_v9, %v2733_v13  ;;  %v2743_v25 = vmax.f32 %v2560_v10, %v2727_v49 }
 0x4cd   : > { %v2750_v19 = vmax.f32 %v2491_v45, %v2734_v12  ;;  %v2566_v21 = vpop.f32.mrb[54].mxu1  ;;  %v2744_v27 = vmax.f32 %v2562_v20, %v2728_v23 }
 0x4ce   : > { %2760 = vxpose.xlu0.b32.end [2/2] (short) %v2749_v18, 128  ;;  %v2568_v22 = vpop.f32.mrb[55].mxu1  ;;  %v2735_v24 = vmul.f32 0.01, %v2566_v21 }
 0x4cf   : > { %2792 = vxpose.xlu1.b32.end [2/2] (short) %v2750_v19, 128  ;;  %v2736_v26 = vmul.f32 0.01, %v2568_v22 }
 0x4d0   : > { %v2751_v29 = vmax.f32 %v2566_v21, %v2735_v24 }
 0x4d1   : > { %v2752_v30 = vmax.f32 %v2568_v22, %v2736_v26 }
 0x505   : > { %v2637_v59 = vpop.f32.mrb[56].mxu0 }
 0x506   : > { %v2639_v28 = vpop.f32.mrb[57].mxu0  ;;  %v2729_v35 = vmul.f32 0.01, %v2637_v59 }
 0x507   : > { %2823 = vxpose.xlu0.b32.start [1/2] (short) %v2743_v25, 128  ;;  %v2730_v37 = vmul.f32 0.01, %v2639_v28 }
 0x508   : > { %2855 = vxpose.xlu1.b32.start [1/2] (short) %v2744_v27, 128  ;;  %v2745_v40 = vmax.f32 %v2637_v59, %v2729_v35 }
 0x509   : > { %v2643_v31 = vpop.f32.mrb[58].mxu0  ;;  %v2746_v42 = vmax.f32 %v2639_v28, %v2730_v37 }
 0x50a   : > { %v2645_v32 = vpop.f32.mrb[59].mxu0  ;;  %v8290_v33 = vpop.f32.mrb[56].mxu1  ;;  %v2737_v39 = vmul.f32 0.01, %v2643_v31 }
 0x50b   : > { %2824 = vxpose.xlu0.b32.end [2/2] (short) %v2751_v29, 128  ;;  %v8292_v34 = vpop.f32.mrb[57].mxu1  ;;  %v2738_v41 = vmul.f32 0.01, %v2645_v32  ;;  %v2731_v1 = vmul.f32 0.01, %v8290_v33 }
 0x50c   : > { %2856 = vxpose.xlu1.b32.end [2/2] (short) %v2752_v30, 128  ;;  %v2753_v43 = vmax.f32 %v2643_v31, %v2737_v39  ;;  %v2732_v16 = vmul.f32 0.01, %v8292_v34 }
 0x50d   : > { %v2754_v44 = vmax.f32 %v2645_v32, %v2738_v41  ;;  %v2747_v3 = vmax.f32 %v8290_v33, %v2731_v1 }
 0x50e   : > { %v8294_v36 = vpop.f32.mrb[58].mxu1  ;;  %v2748_v45 = vmax.f32 %v8292_v34, %v2732_v16 }
 0x50f   : > { %v8296_v38 = vpop.f32.mrb[59].mxu1  ;;  %v2739_v17 = vmul.f32 0.01, %v8294_v36 }
 0x510   : > { %v2740_v12 = vmul.f32 0.01, %v8296_v38 }
 0x511   : > { %v2755_v19 = vmax.f32 %v8294_v36, %v2739_v17 }
 0x512   : > { %v2756_v20 = vmax.f32 %v8296_v38, %v2740_v12 }
 0x544   : > { %2887 = vxpose.xlu0.b32.start [1/2] (short) %v2745_v40, 128 }
 0x545   : > { %2919 = vxpose.xlu1.b32.start [1/2] (short) %v2746_v42, 128 }
 0x548   : > { %2888 = vxpose.xlu0.b32.end [2/2] (short) %v2753_v43, 128 }
 0x549   : > { %2920 = vxpose.xlu1.b32.end [2/2] (short) %v2754_v44, 128 }
 0x54a   : > { %v2775_v46 = vpop.trf.xlu0 }
 0x54b   : > { %6701 = vmatprep.mubr.msk.f32.mxu0 %vm414_vm0, %v2775_v46  ;;  %v2807_v48 = vpop.trf.xlu1 }
 0x54e   : > { %v2776_v50 = vpop.trf.xlu0 }
 0x54f   : > { %6702 = vmatmul.mubr.msk.f32.vlgmr.msra.gmra.mrb[60].mxu0 %vm414_vm0, %v2776_v50  ;;  %v2808_v51 = vpop.trf.xlu1 }
 0x552   : > { %v2777_v52 = vpop.trf.xlu0 }
 0x553   : > { %6704 = vmatprep.mubr.msk.f32.mxu0 %vm414_vm0, %v2777_v52  ;;  %v2809_v53 = vpop.trf.xlu1 }
 0x556   : > { %v2778_v54 = vpop.trf.xlu0 }
 0x557   : > { %6705 = vmatmul.mubr.msk.f32.gmra.mrb[62].mxu0 %vm414_vm0, %v2778_v54  ;;  %v2810_v55 = vpop.trf.xlu1 }
 0x55a   : > { %v2779_v56 = vpop.trf.xlu0 }
 0x55b   : > { %6707 = vmatprep.mubr.msk.f32.mxu0 %vm414_vm0, %v2779_v56  ;;  %v2811_v57 = vpop.trf.xlu1 }
 0x55e   : > { %v2780_v60 = vpop.trf.xlu0 }
 0x55f   : > { %6708 = vmatmul.mubr.msk.f32.gmra.mrb[64].mxu0 %vm414_vm0, %v2780_v60  ;;  %v2812_v61 = vpop.trf.xlu1 }
 0x562   : > { %v2781_v47 = vpop.trf.xlu0 }
 0x563   : > { %6710 = vmatprep.mubr.msk.f32.mxu0 %vm414_vm0, %v2781_v47  ;;  %v2813_v62 = vpop.trf.xlu1 }
 0x566   : > { %v2782_v63 = vpop.trf.xlu0 }
 0x567   : > { %6711 = vmatmul.mubr.msk.f32.gmra.mrb[66].mxu0 %vm414_vm0, %v2782_v63  ;;  %v2814_v2 = vpop.trf.xlu1 }
 0x56a   : > { %v2783_v5 = vpop.trf.xlu0 }
 0x56b   : > { %6713 = vmatprep.mubr.msk.f32.mxu0 %vm414_vm0, %v2783_v5  ;;  %v2815_v6 = vpop.trf.xlu1 }
 0x56e   : > { %v2784_v7 = vpop.trf.xlu0 }
 0x56f   : > { %6714 = vmatmul.mubr.msk.f32.gmra.mrb[68].mxu0 %vm414_vm0, %v2784_v7  ;;  %v2816_v58 = vpop.trf.xlu1 }
 0x572   : > { %v2785_v8 = vpop.trf.xlu0 }
 0x573   : > { %6716 = vmatprep.mubr.msk.f32.mxu0 %vm414_vm0, %v2785_v8  ;;  %v2817_v11 = vpop.trf.xlu1 }
 0x576   : > { %v2786_v14 = vpop.trf.xlu0 }
 0x577   : > { %6717 = vmatmul.mubr.msk.f32.gmra.mrb[70].mxu0 %vm414_vm0, %v2786_v14  ;;  %v2818_v4 = vpop.trf.xlu1 }
 0x57a   : > { %v2787_v0 = vpop.trf.xlu0 }
 0x57b   : > { %6719 = vmatprep.mubr.msk.f32.mxu0 %vm414_vm0, %v2787_v0  ;;  %v2819_v15 = vpop.trf.xlu1 }
 0x57e   : > { %v2788_v9 = vpop.trf.xlu0 }
 0x57f   : > { %6720 = vmatmul.mubr.msk.f32.gmra.mrb[72].mxu0 %vm414_vm0, %v2788_v9  ;;  %v2820_v13 = vpop.trf.xlu1 }
 0x582   : > { %v2789_v18 = vpop.trf.xlu0  ;;  %2951 = vxpose.xlu0.b32.start [1/2] (short) %v2747_v3, 128 }
 0x583   : > { %6722 = vmatprep.mubr.msk.f32.mxu0 %vm414_vm0, %v2789_v18  ;;  %v2821_v10 = vpop.trf.xlu1  ;;  %2983 = vxpose.xlu1.b32.start [1/2] (short) %v2748_v45, 128 }
 0x586   : > { %v2790_v21 = vpop.trf.xlu0  ;;  %2952 = vxpose.xlu0.b32.end [2/2] (short) %v2755_v19, 128 }
 0x587   : > { %6723 = vmatmul.mubr.msk.f32.gmra.mrb[74].mxu0 %vm414_vm0, %v2790_v21  ;;  %v2822_v22 = vpop.trf.xlu1  ;;  %2984 = vxpose.xlu1.b32.end [2/2] (short) %v2756_v20, 128 }
 0x588   : > { %6725 = vmatprep.mubr.msk.f32.mxu0 %vm414_vm0, %v2807_v48 }
 0x58a   : > { %v2839_v49 = vpop.trf.xlu0 }
 0x58b   : > { %6726 = vmatmul.mubr.msk.f32.gmra.mrb[76].mxu0 %vm414_vm0, %v2808_v51  ;;  %v2871_v23 = vpop.trf.xlu1 }
 0x58c   : > { %6728 = vmatprep.mubr.msk.f32.mxu0 %vm414_vm0, %v2809_v53 }
 0x58e   : > { %v2840_v24 = vpop.trf.xlu0 }
 0x58f   : > { %6729 = vmatmul.mubr.msk.f32.gmra.mrb[78].mxu0 %vm414_vm0, %v2810_v55  ;;  %v2872_v25 = vpop.trf.xlu1 }
 0x590   : > { %6731 = vmatprep.mubr.msk.f32.mxu0 %vm414_vm0, %v2811_v57 }
 0x592   : > { %v2841_v26 = vpop.trf.xlu0 }
 0x593   : > { %6732 = vmatmul.mubr.msk.f32.gmra.mrb[80].mxu0 %vm414_vm0, %v2812_v61  ;;  %v2873_v27 = vpop.trf.xlu1 }
 0x594   : > { %6734 = vmatprep.mubr.msk.f32.mxu0 %vm414_vm0, %v2813_v62 }
 0x596   : > { %v2842_v59 = vpop.trf.xlu0 }
 0x597   : > { %6735 = vmatmul.mubr.msk.f32.gmra.mrb[82].mxu0 %vm414_vm0, %v2814_v2  ;;  %v2874_v28 = vpop.trf.xlu1 }
 0x598   : > { %6737 = vmatprep.mubr.msk.f32.mxu0 %vm414_vm0, %v2815_v6 }
 0x59a   : > { %v2843_v29 = vpop.trf.xlu0 }
 0x59b   : > { %6738 = vmatmul.mubr.msk.f32.gmra.mrb[84].mxu0 %vm414_vm0, %v2816_v58  ;;  %v2875_v30 = vpop.trf.xlu1 }
 0x59c   : > { %6740 = vmatprep.mubr.msk.f32.mxu0 %vm414_vm0, %v2817_v11 }
 0x59e   : > { %v2844_v31 = vpop.trf.xlu0 }
 0x59f   : > { %6741 = vmatmul.mubr.msk.f32.gmra.mrb[86].mxu0 %vm414_vm0, %v2818_v4  ;;  %v2876_v32 = vpop.trf.xlu1 }
 0x5a0   : > { %6743 = vmatprep.mubr.msk.f32.mxu0 %vm414_vm0, %v2819_v15 }
 0x5a2   : > { %v2845_v33 = vpop.trf.xlu0 }
 0x5a3   : > { %6744 = vmatmul.mubr.msk.f32.gmra.mrb[88].mxu0 %vm414_vm0, %v2820_v13  ;;  %v2877_v34 = vpop.trf.xlu1 }
 0x5a4   : > { %6746 = vmatprep.mubr.msk.f32.mxu0 %vm414_vm0, %v2821_v10 }
 0x5a6   : > { %v2846_v35 = vpop.trf.xlu0 }
 0x5a7   : > { %6747 = vmatmul.mubr.msk.f32.gmra.mrb[90].mxu0 %vm414_vm0, %v2822_v22  ;;  %v2878_v36 = vpop.trf.xlu1 }
 0x5a8   : > { %6749 = vmatprep.mubr.msk.f32.mxu0 %vm414_vm0, %v2839_v49 }
 0x5aa   : > { %v2847_v37 = vpop.trf.xlu0 }
 0x5ab   : > { %6750 = vmatmul.mubr.msk.f32.gmra.mrb[92].mxu0 %vm414_vm0, %v2840_v24  ;;  %v2879_v38 = vpop.trf.xlu1 }
 0x5ac   : > { %6752 = vmatprep.mubr.msk.f32.mxu0 %vm414_vm0, %v2841_v26 }
 0x5ae   : > { %v2848_v39 = vpop.trf.xlu0 }
 0x5af   : > { %6753 = vmatmul.mubr.msk.f32.gmra.mrb[94].mxu0 %vm414_vm0, %v2842_v59  ;;  %v2880_v40 = vpop.trf.xlu1 }
 0x5b0   : > { %6755 = vmatprep.mubr.msk.f32.mxu0 %vm414_vm0, %v2843_v29 }
 0x5b2   : > { %v2849_v41 = vpop.trf.xlu0 }
 0x5b3   : > { %6756 = vmatmul.mubr.msk.f32.gmra.mrb[96].mxu0 %vm414_vm0, %v2844_v31  ;;  %v2881_v42 = vpop.trf.xlu1 }
 0x5b4   : > { %6758 = vmatprep.mubr.msk.f32.mxu0 %vm414_vm0, %v2845_v33 }
 0x5b6   : > { %v2850_v43 = vpop.trf.xlu0 }
 0x5b7   : > { %6759 = vmatmul.mubr.msk.f32.gmra.mrb[98].mxu0 %vm414_vm0, %v2846_v35  ;;  %v2882_v44 = vpop.trf.xlu1 }
 0x5b8   : > { %6761 = vmatprep.mubr.msk.f32.mxu0 %vm414_vm0, %v2847_v37 }
 0x5ba   : > { %v2851_v46 = vpop.trf.xlu0 }
 0x5bb   : > { %6762 = vmatmul.mubr.msk.f32.gmra.mrb[100].mxu0 %vm414_vm0, %v2848_v39  ;;  %v2883_v48 = vpop.trf.xlu1 }
 0x5bc   : > { %6764 = vmatprep.mubr.msk.f32.mxu0 %vm414_vm0, %v2849_v41 }
 0x5be   : > { %v2852_v50 = vpop.trf.xlu0 }
 0x5bf   : > { %6765 = vmatmul.mubr.msk.f32.gmra.mrb[102].mxu0 %vm414_vm0, %v2850_v43  ;;  %v2884_v51 = vpop.trf.xlu1 }
 0x5c0   : > { %6767 = vmatprep.mubr.msk.f32.mxu0 %vm414_vm0, %v2851_v46 }
 0x5c2   : > { %v2853_v52 = vpop.trf.xlu0 }
 0x5c3   : > { %6768 = vmatmul.mubr.msk.f32.gmra.mrb[104].mxu0 %vm414_vm0, %v2852_v50  ;;  %v2885_v53 = vpop.trf.xlu1 }
 0x5c4   : > { %6770 = vmatprep.mubr.msk.f32.mxu0 %vm414_vm0, %v2853_v52 }
 0x5c6   : > { %v2854_v54 = vpop.trf.xlu0 }
 0x5c7   : > { %6771 = vmatmul.mubr.msk.f32.gmra.mrb[106].mxu0 %vm414_vm0, %v2854_v54  ;;  %v2886_v55 = vpop.trf.xlu1 }
 0x5c8   : > { %6773 = vmatprep.mubr.msk.f32.mxu0 %vm414_vm0, %v2871_v23 }
 0x5ca   : > { %v2903_v56 = vpop.trf.xlu0 }
 0x5cb   : > { %6797 = vmatprep.mubr.msk.f32.mxu1 %vm414_vm0, %v2903_v56  ;;  %6774 = vmatmul.mubr.msk.f32.gmra.mrb[108].mxu0 %vm414_vm0, %v2872_v25  ;;  %v2935_v57 = vpop.trf.xlu1 }
 0x5cc   : > { %6776 = vmatprep.mubr.msk.f32.mxu0 %vm414_vm0, %v2873_v27 }
 0x5ce   : > { %v2904_v60 = vpop.trf.xlu0 }
 0x5cf   : > { %6798 = vmatmul.mubr.msk.f32.vlgmr.msra.gmra.mrb[60].mxu1 %vm414_vm0, %v2904_v60  ;;  %6777 = vmatmul.mubr.msk.f32.gmra.mrb[110].mxu0 %vm414_vm0, %v2874_v28  ;;  %v2936_v61 = vpop.trf.xlu1 }
 0x5d0   : > { %6779 = vmatprep.mubr.msk.f32.mxu0 %vm414_vm0, %v2875_v30 }
 0x5d2   : > { %v2905_v47 = vpop.trf.xlu0 }
 0x5d3   : > { %6800 = vmatprep.mubr.msk.f32.mxu1 %vm414_vm0, %v2905_v47  ;;  %6780 = vmatmul.mubr.msk.f32.gmra.mrb[112].mxu0 %vm414_vm0, %v2876_v32  ;;  %v2937_v62 = vpop.trf.xlu1 }
 0x5d4   : > { %6782 = vmatprep.mubr.msk.f32.mxu0 %vm414_vm0, %v2877_v34 }
 0x5d6   : > { %v2906_v63 = vpop.trf.xlu0 }
 0x5d7   : > { %6801 = vmatmul.mubr.msk.f32.gmra.mrb[62].mxu1 %vm414_vm0, %v2906_v63  ;;  %6783 = vmatmul.mubr.msk.f32.gmra.mrb[114].mxu0 %vm414_vm0, %v2878_v36  ;;  %v2938_v2 = vpop.trf.xlu1 }
 0x5d8   : > { %6785 = vmatprep.mubr.msk.f32.mxu0 %vm414_vm0, %v2879_v38 }
 0x5da   : > { %v2907_v5 = vpop.trf.xlu0 }
 0x5db   : > { %6803 = vmatprep.mubr.msk.f32.mxu1 %vm414_vm0, %v2907_v5  ;;  %6786 = vmatmul.mubr.msk.f32.gmra.mrb[116].mxu0 %vm414_vm0, %v2880_v40  ;;  %v2939_v6 = vpop.trf.xlu1 }
 0x5dc   : > { %6788 = vmatprep.mubr.msk.f32.mxu0 %vm414_vm0, %v2881_v42 }
 0x5de   : > { %v2908_v7 = vpop.trf.xlu0 }
 0x5df   : > { %6804 = vmatmul.mubr.msk.f32.gmra.mrb[64].mxu1 %vm414_vm0, %v2908_v7  ;;  %6789 = vmatmul.mubr.msk.f32.gmra.mrb[118].mxu0 %vm414_vm0, %v2882_v44  ;;  %v2940_v58 = vpop.trf.xlu1 }
 0x5e0   : > { %6791 = vmatprep.mubr.msk.f32.mxu0 %vm414_vm0, %v2883_v48 }
 0x5e2   : > { %v2909_v8 = vpop.trf.xlu0 }
 0x5e3   : > { %6806 = vmatprep.mubr.msk.f32.mxu1 %vm414_vm0, %v2909_v8  ;;  %6792 = vmatmul.mubr.msk.f32.gmra.mrb[120].mxu0 %vm414_vm0, %v2884_v51  ;;  %v2941_v11 = vpop.trf.xlu1 }
 0x5e4   : > { %6794 = vmatprep.mubr.msk.f32.mxu0 %vm414_vm0, %v2885_v53 }
 0x5e6   : > { %v2910_v14 = vpop.trf.xlu0 }
 0x5e7   : > { %6807 = vmatmul.mubr.msk.f32.gmra.mrb[66].mxu1 %vm414_vm0, %v2910_v14  ;;  %6795 = vmatmul.mubr.msk.f32.gmra.mrb[122].mxu0 %vm414_vm0, %v2886_v55  ;;  %v2942_v4 = vpop.trf.xlu1 }
 0x5ea   : > { %v2911_v0 = vpop.trf.xlu0 }
 0x5eb   : > { %6809 = vmatprep.mubr.msk.f32.mxu1 %vm414_vm0, %v2911_v0  ;;  %v2943_v1 = vpop.trf.xlu1 }
 0x5ee   : > { %v2912_v15 = vpop.trf.xlu0 }
 0x5ef   : > { %6810 = vmatmul.mubr.msk.f32.gmra.mrb[68].mxu1 %vm414_vm0, %v2912_v15  ;;  %v2944_v16 = vpop.trf.xlu1 }
 0x5f2   : > { %v2913_v9 = vpop.trf.xlu0 }
 0x5f3   : > { %6812 = vmatprep.mubr.msk.f32.mxu1 %vm414_vm0, %v2913_v9  ;;  %v2945_v3 = vpop.trf.xlu1 }
 0x5f6   : > { %v2914_v17 = vpop.trf.xlu0 }
 0x5f7   : > { %6813 = vmatmul.mubr.msk.f32.gmra.mrb[70].mxu1 %vm414_vm0, %v2914_v17  ;;  %v2946_v13 = vpop.trf.xlu1 }
 0x5fa   : > { %v2915_v45 = vpop.trf.xlu0 }
 0x5fb   : > { %6815 = vmatprep.mubr.msk.f32.mxu1 %vm414_vm0, %v2915_v45  ;;  %v2947_v12 = vpop.trf.xlu1 }
 0x5fe   : > { %v2916_v18 = vpop.trf.xlu0 }
 0x5ff   : > { %6816 = vmatmul.mubr.msk.f32.gmra.mrb[72].mxu1 %vm414_vm0, %v2916_v18  ;;  %v2948_v19 = vpop.trf.xlu1 }
 0x602   : > { %v2917_v10 = vpop.trf.xlu0 }
 0x603   : > { %6818 = vmatprep.mubr.msk.f32.mxu1 %vm414_vm0, %v2917_v10  ;;  %v2949_v20 = vpop.trf.xlu1 }
 0x606   : > { %v2918_v21 = vpop.trf.xlu0 }
 0x607   : > { %6819 = vmatmul.mubr.msk.f32.gmra.mrb[74].mxu1 %vm414_vm0, %v2918_v21  ;;  %v2950_v22 = vpop.trf.xlu1 }
 0x608   : > { %6821 = vmatprep.mubr.msk.f32.mxu1 %vm414_vm0, %v2935_v57 }
 0x60a   : > { %v2967_v49 = vpop.trf.xlu0 }
 0x60b   : > { %6822 = vmatmul.mubr.msk.f32.gmra.mrb[76].mxu1 %vm414_vm0, %v2936_v61  ;;  %v8388_v23 = vpop.trf.xlu1 }
 0x60c   : > { %6824 = vmatprep.mubr.msk.f32.mxu1 %vm414_vm0, %v2937_v62 }
 0x60e   : > { %v2968_v24 = vpop.trf.xlu0 }
 0x60f   : > { %6825 = vmatmul.mubr.msk.f32.gmra.mrb[78].mxu1 %vm414_vm0, %v2938_v2  ;;  %v8393_v25 = vpop.trf.xlu1 }
 0x610   : > { %6827 = vmatprep.mubr.msk.f32.mxu1 %vm414_vm0, %v2939_v6 }
 0x612   : > { %v2969_v26 = vpop.trf.xlu0 }
 0x613   : > { %6828 = vmatmul.mubr.msk.f32.gmra.mrb[80].mxu1 %vm414_vm0, %v2940_v58  ;;  %v8398_v59 = vpop.trf.xlu1 }
 0x614   : > { %6830 = vmatprep.mubr.msk.f32.mxu1 %vm414_vm0, %v2941_v11 }
 0x616   : > { %v2970_v27 = vpop.trf.xlu0 }
 0x617   : > { %6831 = vmatmul.mubr.msk.f32.gmra.mrb[82].mxu1 %vm414_vm0, %v2942_v4  ;;  %v8403_v29 = vpop.trf.xlu1 }
 0x618   : > { %6833 = vmatprep.mubr.msk.f32.mxu1 %vm414_vm0, %v2943_v1 }
 0x61a   : > { %v2971_v28 = vpop.trf.xlu0 }
 0x61b   : > { %6834 = vmatmul.mubr.msk.f32.gmra.mrb[84].mxu1 %vm414_vm0, %v2944_v16  ;;  %v8414_v35 = vpop.trf.xlu1 }
 0x61c   : > { %6836 = vmatprep.mubr.msk.f32.mxu1 %vm414_vm0, %v2945_v3 }
 0x61e   : > { %v2972_v30 = vpop.trf.xlu0 }
 0x61f   : > { %6837 = vmatmul.mubr.msk.f32.gmra.mrb[86].mxu1 %vm414_vm0, %v2946_v13  ;;  %v8421_v38 = vpop.trf.xlu1 }
 0x620   : > { %6839 = vmatprep.mubr.msk.f32.mxu1 %vm414_vm0, %v2947_v12 }
 0x622   : > { %v8407_v31 = vpop.f32.mrb[60].mxu0  ;;  %v2973_v32 = vpop.trf.xlu0 }
 0x623   : > { %v8409_v33 = vpop.f32.mrb[61].mxu0  ;;  %v4107_v34 = vsel %vm414_vm0, %v8407_v31, -inf  ;;  %6840 = vmatmul.mubr.msk.f32.gmra.mrb[88].mxu1 %vm414_vm0, %v2948_v19  ;;  %v3005_v46 = vpop.trf.xlu1 }
 0x624   : > { %4108 = vmax.xlane.f32.xlu1 %v4107_v34  ;;  %v4104_v36 = vsel %vm414_vm0, %v8409_v33, -inf  ;;  %6842 = vmatprep.mubr.msk.f32.mxu1 %vm414_vm0, %v2949_v20 }
 0x625   : > { %4105 = vmax.xlane.f32.xlu0 %v4104_v36 }
 0x626   : > { %v2974_v37 = vpop.trf.xlu0 }
 0x627   : > { %6843 = vmatmul.mubr.msk.f32.gmra.mrb[90].mxu1 %vm414_vm0, %v2950_v22  ;;  %v3006_v54 = vpop.trf.xlu1 }
 0x628   : > { %6845 = vmatprep.mubr.msk.f32.mxu1 %vm414_vm0, %v2967_v49 }
 0x62a   : > { %v8423_v39 = vpop.f32.mrb[62].mxu0  ;;  %v2975_v40 = vpop.trf.xlu0 }
 0x62b   : > { %v4113_v41 = vsel %vm414_vm0, %v8423_v39, -inf  ;;  %v8427_v42 = vpop.f32.mrb[63].mxu0  ;;  %6846 = vmatmul.mubr.msk.f32.gmra.mrb[92].mxu1 %vm414_vm0, %v2968_v24  ;;  %v3007_v47 = vpop.trf.xlu1 }
 0x62c   : > { %4114 = vmax.xlane.f32.xlu1 %v4113_v41  ;;  %6848 = vmatprep.mubr.msk.f32.mxu1 %vm414_vm0, %v2969_v26  ;;  %v4110_v44 = vsel %vm414_vm0, %v8427_v42, -inf }
 0x62e   : > { %v2976_v43 = vpop.trf.xlu0 }
 0x62f   : > { %6849 = vmatmul.mubr.msk.f32.gmra.mrb[94].mxu1 %vm414_vm0, %v2970_v27  ;;  %v3008_v2 = vpop.trf.xlu1 }
 0x630   : > { %4111 = vmax.xlane.f32.xlu1 %v4110_v44  ;;  %6851 = vmatprep.mubr.msk.f32.mxu1 %vm414_vm0, %v2971_v28 }
 0x632   : > { %v8435_v48 = vpop.f32.mrb[64].mxu0  ;;  %v2977_v50 = vpop.trf.xlu0 }
 0x633   : > { %v8437_v51 = vpop.f32.mrb[65].mxu0  ;;  %v4119_v52 = vsel %vm414_vm0, %v8435_v48, -inf  ;;  %6852 = vmatmul.mubr.msk.f32.gmra.mrb[96].mxu1 %vm414_vm0, %v2972_v30  ;;  %v3009_v14 = vpop.trf.xlu1 }
 0x634   : > { %4120 = vmax.xlane.f32.xlu1 %v4119_v52  ;;  %v4116_v53 = vsel %vm414_vm0, %v8437_v51, -inf  ;;  %6854 = vmatprep.mubr.msk.f32.mxu1 %vm414_vm0, %v2973_v32 }
 0x635   : > { %4117 = vmax.xlane.f32.xlu0 %v4116_v53 }
 0x636   : > { %v2978_v55 = vpop.trf.xlu0 }
 0x637   : > { %6855 = vmatmul.mubr.msk.f32.gmra.mrb[98].mxu1 %vm414_vm0, %v2974_v37  ;;  %v3010_v16 = vpop.trf.xlu1 }
 0x638   : > { %6857 = vmatprep.mubr.msk.f32.mxu1 %vm414_vm0, %v2975_v40 }
 0x63a   : > { %v8447_v56 = vpop.f32.mrb[66].mxu0  ;;  %v2979_v57 = vpop.trf.xlu0 }
 0x63b   : > { %11208 = vst [vmem:[#allocation2_spill] sm:$0xff] %v8447_v56  ;;  %v8449_v60 = vpop.f32.mrb[67].mxu0  ;;  %v4125_v61 = vsel %vm414_vm0, %v8447_v56, -inf  ;;  %6858 = vmatmul.mubr.msk.f32.gmra.mrb[100].mxu1 %vm414_vm0, %v2976_v43  ;;  %v3011_v45 = vpop.trf.xlu1 }
 0x63c   : > { %11209 = vst [vmem:[#allocation3_spill] sm:$0xff] %v8449_v60  ;;  %4126 = vmax.xlane.f32.xlu1 %v4125_v61  ;;  %v4122_v62 = vsel %vm414_vm0, %v8449_v60, -inf  ;;  %6860 = vmatprep.mubr.msk.f32.mxu1 %vm414_vm0, %v2977_v50 }
 0x63d   : > { %4123 = vmax.xlane.f32.xlu0 %v4122_v62 }
 0x63e   : > { %v2980_v63 = vpop.trf.xlu0 }
 0x63f   : > { %6861 = vmatmul.mubr.msk.f32.gmra.mrb[102].mxu1 %vm414_vm0, %v2978_v55  ;;  %v3012_v18 = vpop.trf.xlu1 }
 0x640   : > { %6863 = vmatprep.mubr.msk.f32.mxu1 %vm414_vm0, %v2979_v57 }
 0x642   : > { %v8459_v5 = vpop.f32.mrb[68].mxu0  ;;  %v2981_v6 = vpop.trf.xlu0 }
 0x643   : > { %11210 = vst [vmem:[#allocation4_spill] sm:$0xff] %v8459_v5  ;;  %v8461_v7 = vpop.f32.mrb[69].mxu0  ;;  %v4131_v58 = vsel %vm414_vm0, %v8459_v5, -inf  ;;  %6864 = vmatmul.mubr.msk.f32.gmra.mrb[104].mxu1 %vm414_vm0, %v2980_v63  ;;  %v3013_v24 = vpop.trf.xlu1 }
 0x644   : > { %11211 = vst [vmem:[#allocation5_spill] sm:$0xff] %v8461_v7  ;;  %4132 = vmax.xlane.f32.xlu1 %v4131_v58  ;;  %v4128_v8 = vsel %vm414_vm0, %v8461_v7, -inf  ;;  %6866 = vmatprep.mubr.msk.f32.mxu1 %vm414_vm0, %v2981_v6 }
 0x645   : > { %4129 = vmax.xlane.f32.xlu0 %v4128_v8 }
 0x646   : > { %v2982_v11 = vpop.trf.xlu0 }
 0x647   : > { %6867 = vmatmul.mubr.msk.f32.gmra.mrb[106].mxu1 %vm414_vm0, %v2982_v11 }
 0x648   : > { %6869 = vmatprep.mubr.msk.f32.mxu1 %vm414_vm0, %v8388_v23 }
 0x64a   : > { %v8472_v4 = vpop.f32.mrb[70].mxu0 }
 0x64b   : > { %11212 = vst [vmem:[#allocation6_spill] sm:$0xff] %v8472_v4  ;;  %v8474_v0 = vpop.f32.mrb[71].mxu0  ;;  %v4137_v1 = vsel %vm414_vm0, %v8472_v4, -inf  ;;  %6870 = vmatmul.mubr.msk.f32.gmra.mrb[108].mxu1 %vm414_vm0, %v8393_v25 }
 0x64c   : > { %11213 = vst [vmem:[#allocation7_spill] sm:$0xff] %v8474_v0  ;;  %4138 = vmax.xlane.f32.xlu1 %v4137_v1  ;;  %v4134_v15 = vsel %vm414_vm0, %v8474_v0, -inf  ;;  %6872 = vmatprep.mubr.msk.f32.mxu1 %vm414_vm0, %v8398_v59 }
 0x64d   : > { %4135 = vmax.xlane.f32.xlu0 %v4134_v15 }
 0x64f   : > { %6873 = vmatmul.mubr.msk.f32.gmra.mrb[110].mxu1 %vm414_vm0, %v8403_v29  ;;  %v3014_v29 = vpop.trf.xlu1 }
 0x650   : > { %6875 = vmatprep.mubr.msk.f32.mxu1 %vm414_vm0, %v8414_v35 }
 0x652   : > { %v8488_v9 = vpop.f32.mrb[72].mxu0 }
 0x653   : > { %11214 = vst [vmem:[#allocation8_spill] sm:$0xff] %v8488_v9  ;;  %v8490_v3 = vpop.f32.mrb[73].mxu0  ;;  %v4143_v17 = vsel %vm414_vm0, %v8488_v9, -inf  ;;  %6876 = vmatmul.mubr.msk.f32.gmra.mrb[112].mxu1 %vm414_vm0, %v8421_v38 }
 0x654   : > { %11215 = vst [vmem:[#allocation9_spill] sm:$0xff] %v8490_v3  ;;  %4144 = vmax.xlane.f32.xlu1 %v4143_v17  ;;  %v4140_v13 = vsel %vm414_vm0, %v8490_v3, -inf  ;;  %6878 = vmatprep.mubr.msk.f32.mxu1 %vm414_vm0, %v3005_v46 }
 0x655   : > { %4141 = vmax.xlane.f32.xlu0 %v4140_v13 }
 0x657   : > { %6879 = vmatmul.mubr.msk.f32.gmra.mrb[114].mxu1 %vm414_vm0, %v3006_v54 }
 0x658   : > { %6881 = vmatprep.mubr.msk.f32.mxu1 %vm414_vm0, %v3007_v47 }
 0x65a   : > { %v8501_v12 = vpop.f32.mrb[74].mxu0 }
 0x65b   : > { %11216 = vst [vmem:[#allocation10_spill] sm:$0xff] %v8501_v12  ;;  %v8503_v19 = vpop.f32.mrb[75].mxu0  ;;  %v4149_v10 = vsel %vm414_vm0, %v8501_v12, -inf  ;;  %6882 = vmatmul.mubr.msk.f32.gmra.mrb[116].mxu1 %vm414_vm0, %v3008_v2 }
 0x65c   : > { %11217 = vst [vmem:[#allocation11_spill] sm:$0xff] %v8503_v19  ;;  %4150 = vmax.xlane.f32.xlu1 %v4149_v10  ;;  %v4146_v20 = vsel %vm414_vm0, %v8503_v19, -inf  ;;  %6884 = vmatprep.mubr.msk.f32.mxu1 %vm414_vm0, %v3009_v14 }
 0x65d   : > { %4147 = vmax.xlane.f32.xlu0 %v4146_v20 }
 0x65e   : > { %v8511_v21 = vpop.f32.mrb[76].mxu0 }
 0x65f   : > { %11218 = vst [vmem:[#allocation12_spill] sm:$0xff] %v8511_v21  ;;  %v8513_v22 = vpop.f32.mrb[77].mxu0  ;;  %v4155_v49 = vsel %vm414_vm0, %v8511_v21, -inf  ;;  %6885 = vmatmul.mubr.msk.f32.gmra.mrb[118].mxu1 %vm414_vm0, %v3010_v16 }
 0x660   : > { %11219 = vst [vmem:[#allocation13_spill] sm:$0xff] %v8513_v22  ;;  %4156 = vmax.xlane.f32.xlu1 %v4155_v49  ;;  %v4152_v23 = vsel %vm414_vm0, %v8513_v22, -inf  ;;  %6887 = vmatprep.mubr.msk.f32.mxu1 %vm414_vm0, %v3011_v45 }
 0x661   : > { %4153 = vmax.xlane.f32.xlu0 %v4152_v23 }
 0x662   : > { %v8521_v25 = vpop.f32.mrb[78].mxu0 }
 0x663   : > { %11220 = vst [vmem:[#allocation14_spill] sm:$0xff] %v8521_v25  ;;  %v8523_v26 = vpop.f32.mrb[79].mxu0  ;;  %v4161_v27 = vsel %vm414_vm0, %v8521_v25, -inf  ;;  %6888 = vmatmul.mubr.msk.f32.gmra.mrb[120].mxu1 %vm414_vm0, %v3012_v18 }
 0x664   : > { %11221 = vst [vmem:[#allocation15_spill] sm:$0xff] %v8523_v26  ;;  %4162 = vmax.xlane.f32.xlu1 %v4161_v27  ;;  %v4158_v59 = vsel %vm414_vm0, %v8523_v26, -inf  ;;  %6890 = vmatprep.mubr.msk.f32.mxu1 %vm414_vm0, %v3013_v24 }
 0x665   : > { %4159 = vmax.xlane.f32.xlu0 %v4158_v59 }
 0x666   : > { %v8531_v28 = vpop.f32.mrb[80].mxu0 }
 0x667   : > { %v8533_v30 = vpop.f32.mrb[81].mxu0  ;;  %6891 = vmatmul.mubr.msk.f32.gmra.mrb[122].mxu1 %vm414_vm0, %v3014_v29  ;;  %v4167_v20 = vsel %vm414_vm0, %v8531_v28, -inf }
 0x668   : > { %v4164_v23 = vsel %vm414_vm0, %v8533_v30, -inf }
 0x66a   : > { %v8536_v32 = vpop.f32.mrb[82].mxu0 }
 0x66b   : > { %v8538_v34 = vpop.f32.mrb[83].mxu0  ;;  %v4173_v59 = vsel %vm414_vm0, %v8536_v32, -inf }
 0x66e   : > { %v8540_v35 = vpop.f32.mrb[84].mxu0 }
 0x66f   : > { %v8542_v36 = vpop.f32.mrb[85].mxu0 }
 0x670   : > { %v4176_v19 = vsel %vm414_vm0, %v8542_v36, -inf }
 0x672   : > { %v8544_v37 = vpop.f32.mrb[86].mxu0 }
 0x673   : > { %v8546_v38 = vpop.f32.mrb[87].mxu0 }
 0x674   : > { %v4182_v9 = vsel %vm414_vm0, %v8546_v38, -inf }
 0x676   : > { %v8548_v40 = vpop.f32.mrb[88].mxu0 }
 0x677   : > { %11222 = vst [vmem:[#allocation16_spill] sm:$0xff] %v8548_v40  ;;  %v8550_v41 = vpop.f32.mrb[89].mxu0 }
 0x678   : > { %11223 = vst [vmem:[#allocation17_spill] sm:$0xff] %v8550_v41 }
 0x67a   : > { %v8552_v43 = vpop.f32.mrb[90].mxu0 }
 0x67b   : > { %11224 = vst [vmem:[#allocation18_spill] sm:$0xff] %v8552_v43  ;;  %v8554_v44 = vpop.f32.mrb[91].mxu0  ;;  %v4197_v56 = vsel %vm414_vm0, %v8552_v43, -inf }
 0x67c   : > { %11225 = vst [vmem:[#allocation19_spill] sm:$0xff] %v8554_v44 }
 0x67e   : > { %v8556_v46 = vpop.f32.mrb[92].mxu0 }
 0x67f   : > { %11226 = vst [vmem:[#allocation20_spill] sm:$0xff] %v8556_v46  ;;  %v8558_v50 = vpop.f32.mrb[93].mxu0  ;;  %v4203_v43 = vsel %vm414_vm0, %v8556_v46, -inf }
 0x680   : > { %11227 = vst [vmem:[#allocation21_spill] sm:$0xff] %v8558_v50 }
 0x682   : > { %v8560_v52 = vpop.f32.mrb[94].mxu0 }
 0x683   : > { %11228 = vst [vmem:[#allocation22_spill] sm:$0xff] %v8560_v52  ;;  %v8562_v53 = vpop.f32.mrb[95].mxu0 }
 0x684   : > { %11229 = vst [vmem:[#allocation23_spill] sm:$0xff] %v8562_v53 }
 0x686   : > { %v8564_v54 = vpop.f32.mrb[96].mxu0 }
 0x687   : > { %11230 = vst [vmem:[#allocation24_spill] sm:$0xff] %v8564_v54  ;;  %v8566_v55 = vpop.f32.mrb[97].mxu0 }
 0x688   : > { %11231 = vst [vmem:[#allocation25_spill] sm:$0xff] %v8566_v55 }
 0x68a   : > { %v8568_v57 = vpop.f32.mrb[98].mxu0 }
 0x68b   : > { %11232 = vst [vmem:[#allocation26_spill] sm:$0xff] %v8568_v57  ;;  %v8570_v61 = vpop.f32.mrb[99].mxu0 }
 0x68c   : > { %11233 = vst [vmem:[#allocation27_spill] sm:$0xff] %v8570_v61 }
 0x68e   : > { %v8572_v47 = vpop.f32.mrb[100].mxu0 }
 0x68f   : > { %11234 = vst [vmem:[#allocation28_spill] sm:$0xff] %v8572_v47  ;;  %v8574_v62 = vpop.f32.mrb[101].mxu0 }
 0x690   : > { %11235 = vst [vmem:[#allocation29_spill] sm:$0xff] %v8574_v62 }
 0x692   : > { %v8576_v63 = vpop.f32.mrb[102].mxu0 }
 0x693   : > { %11236 = vst [vmem:[#allocation30_spill] sm:$0xff] %v8576_v63  ;;  %v8578_v2 = vpop.f32.mrb[103].mxu0 }
 0x694   : > { %11237 = vst [vmem:[#allocation31_spill] sm:$0xff] %v8578_v2 }
 0x696   : > { %v8580_v6 = vpop.f32.mrb[104].mxu0 }
 0x697   : > { %11238 = vst [vmem:[#allocation32_spill] sm:$0xff] %v8580_v6  ;;  %v8582_v58 = vpop.f32.mrb[105].mxu0 }
 0x698   : > { %11239 = vst [vmem:[#allocation33_spill] sm:$0xff] %v8582_v58 }
 0x69a   : > { %v8584_v8 = vpop.f32.mrb[106].mxu0 }
 0x69b   : > { %11240 = vst [vmem:[#allocation34_spill] sm:$0xff] %v8584_v8  ;;  %v8586_v11 = vpop.f32.mrb[107].mxu0 }
 0x69c   : > { %11241 = vst [vmem:[#allocation35_spill] sm:$0xff] %v8586_v11 }
 0x69e   : > { %v8588_v14 = vpop.f32.mrb[108].mxu0 }
 0x69f   : > { %11242 = vst [vmem:[#allocation36_spill] sm:$0xff] %v8588_v14  ;;  %v8590_v1 = vpop.f32.mrb[109].mxu0 }
 0x6a0   : > { %11243 = vst [vmem:[#allocation37_spill] sm:$0xff] %v8590_v1 }
 0x6a2   : > { %v8592_v15 = vpop.f32.mrb[60].mxu1  ;;  %v8594_v16 = vpop.f32.mrb[110].mxu0 }
 0x6a3   : > { %11244 = vst [vmem:[#allocation38_spill] sm:$0xff] %v8594_v16  ;;  %v8596_v17 = vpop.f32.mrb[61].mxu1  ;;  %v4299_v13 = vsel %vm414_vm0, %v8592_v15, -inf  ;;  %v8600_v45 = vpop.f32.mrb[111].mxu0 }
 0x6a4   : > { %11245 = vst [vmem:[#allocation39_spill] sm:$0xff] %v8600_v45  ;;  %4300 = vmax.xlane.f32.xlu1 %v4299_v13  ;;  %v4296_v18 = vsel %vm414_vm0, %v8596_v17, -inf }
 0x6a5   : > { %4297 = vmax.xlane.f32.xlu0 %v4296_v18  ;;  %v4170_v18 = vsel %vm414_vm0, %v8538_v34, -inf }
 0x6a6   : > { %v8604_v10 = vpop.f32.mrb[112].mxu0 }
 0x6a7   : > { %11246 = vst [vmem:[#allocation40_spill] sm:$0xff] %v8604_v10  ;;  %v8608_v49 = vpop.f32.mrb[113].mxu0 }
 0x6a8   : > { %11247 = vst [vmem:[#allocation41_spill] sm:$0xff] %v8608_v49  ;;  %4168 = vmax.xlane.f32.xlu1 %v4167_v20 }
 0x6a9   : > { %4165 = vmax.xlane.f32.xlu0 %v4164_v23 }
 0x6aa   : > { %v8612_v24 = vpop.f32.mrb[62].mxu1  ;;  %v8614_v27 = vpop.f32.mrb[114].mxu0 }
 0x6ab   : > { %11248 = vst [vmem:[#allocation42_spill] sm:$0xff] %v8614_v27  ;;  %v8618_v29 = vpop.f32.mrb[63].mxu1  ;;  %v8620_v13 = vpop.f32.mrb[115].mxu0  ;;  %v4305_v20 = vsel %vm414_vm0, %v8612_v24, -inf }
 0x6ac   : > { %11249 = vst [vmem:[#allocation43_spill] sm:$0xff] %v8620_v13  ;;  %4174 = vmax.xlane.f32.xlu1 %v4173_v59  ;;  %v4302_v23 = vsel %vm414_vm0, %v8618_v29, -inf  ;;  %v4179_v59 = vsel %vm414_vm0, %v8540_v35, -inf }
 0x6ad   : > { %4171 = vmax.xlane.f32.xlu0 %v4170_v18 }
 0x6ae   : > { %v8628_v26 = vpop.f32.mrb[116].mxu0 }
 0x6af   : > { %11250 = vst [vmem:[#allocation44_spill] sm:$0xff] %v8628_v26  ;;  %v8630_v25 = vpop.f32.mrb[117].mxu0 }
 0x6b0   : > { %11251 = vst [vmem:[#allocation45_spill] sm:$0xff] %v8630_v25  ;;  %4306 = vmax.xlane.f32.xlu1 %v4305_v20  ;;  %v4185_v20 = vsel %vm414_vm0, %v8544_v37, -inf }
 0x6b1   : > { %4303 = vmax.xlane.f32.xlu0 %v4302_v23 }
 0x6b2   : > { %v8632_v22 = vpop.f32.mrb[64].mxu1  ;;  %v8638_v18 = vpop.f32.mrb[118].mxu0 }
 0x6b3   : > { %v8636_v21 = vpop.f32.mrb[65].mxu1  ;;  %11253 = vst [vmem:[#allocation47_spill] sm:$0xff] %v8638_v18  ;;  %v8642_v12 = vpop.f32.mrb[119].mxu0 }
 0x6b4   : > { %11252 = vst [vmem:[#allocation46_spill] sm:$0xff] %v8636_v21  ;;  %4180 = vmax.xlane.f32.xlu1 %v4179_v59  ;;  %11254 = vst [vmem:[#allocation48_spill] sm:$0xff] %v8642_v12  ;;  %v4311_v59 = vsel %vm414_vm0, %v8632_v22, -inf  ;;  %v4308_v0 = vsel %vm414_vm0, %v8636_v21, -inf }
 0x6b5   : > { %4177 = vmax.xlane.f32.xlu0 %v4176_v19 }
 0x6b6   : > { %v8644_v3 = vpop.f32.mrb[120].mxu0 }
 0x6b7   : > { %11255 = vst [vmem:[#allocation49_spill] sm:$0xff] %v8644_v3  ;;  %v8648_v23 = vpop.f32.mrb[121].mxu0 }
 0x6b8   : > { %11256 = vst [vmem:[#allocation50_spill] sm:$0xff] %v8648_v23  ;;  %4186 = vmax.xlane.f32.xlu1 %v4185_v20  ;;  %v4191_v20 = vsel %vm414_vm0, %v8548_v40, -inf }
 0x6b9   : > { %4183 = vmax.xlane.f32.xlu0 %v4182_v9  ;;  %v4188_v9 = vsel %vm414_vm0, %v8550_v41, -inf }
 0x6ba   : > { %v8656_v4 = vpop.f32.mrb[66].mxu1  ;;  %v8658_v19 = vpop.f32.mrb[122].mxu0 }
 0x6bb   : > { %11257 = vst [vmem:[#allocation51_spill] sm:$0xff] %v8656_v4  ;;  %11258 = vst [vmem:[#allocation52_spill] sm:$0xff] %v8658_v19  ;;  %v8660_v7 = vpop.f32.mrb[67].mxu1  ;;  %v8662_v5 = vpop.f32.mrb[123].mxu0 }
 0x6bc   : > { %11259 = vst [vmem:[#allocation53_spill] sm:$0xff] %v8660_v7  ;;  %11260 = vst [vmem:[#allocation54_spill] sm:$0xff] %v8662_v5  ;;  %4312 = vmax.xlane.f32.xlu1 %v4311_v59  ;;  %v4194_v59 = vsel %vm414_vm0, %v8554_v44, -inf }
 0x6bd   : > { %4309 = vmax.xlane.f32.xlu0 %v4308_v0  ;;  %v4317_v0 = vsel %vm414_vm0, %v8656_v4, -inf }
 0x6c0   : > { %4192 = vmax.xlane.f32.xlu1 %v4191_v20  ;;  %v4314_v20 = vsel %vm414_vm0, %v8660_v7, -inf }
 0x6c1   : > { %4189 = vmax.xlane.f32.xlu0 %v4188_v9 }
 0x6c2   : > { %v8668_v60 = vpop.f32.mrb[68].mxu1 }
 0x6c3   : > { %11261 = vst [vmem:[#allocation55_spill] sm:$0xff] %v8668_v60  ;;  %v8672_v21 = vpop.f32.mrb[69].mxu1 }
 0x6c4   : > { %11262 = vst [vmem:[#allocation56_spill] sm:$0xff] %v8672_v21  ;;  %4198 = vmax.xlane.f32.xlu1 %v4197_v56  ;;  %v4200_v56 = vsel %vm414_vm0, %v8558_v50, -inf  ;;  %v4320_v46 = vsel %vm414_vm0, %v8672_v21, -inf }
 0x6c5   : > { %4195 = vmax.xlane.f32.xlu0 %v4194_v59  ;;  %v4209_v59 = vsel %vm414_vm0, %v8560_v52, -inf }
 0x6c8   : > { %4318 = vmax.xlane.f32.xlu1 %v4317_v0  ;;  %v4206_v0 = vsel %vm414_vm0, %v8562_v53, -inf }
 0x6c9   : > { %4315 = vmax.xlane.f32.xlu0 %v4314_v20  ;;  %v4323_v20 = vsel %vm414_vm0, %v8668_v60, -inf  ;;  %v4221_v60 = vsel %vm414_vm0, %v8568_v57, -inf }
 0x6ca   : > { %v8680_v9 = vpop.f32.mrb[70].mxu1 }
 0x6cb   : > { %11263 = vst [vmem:[#allocation57_spill] sm:$0xff] %v8680_v9  ;;  %v8684_v41 = vpop.f32.mrb[71].mxu1 }
 0x6cc   : > { %11264 = vst [vmem:[#allocation58_spill] sm:$0xff] %v8684_v41  ;;  %4204 = vmax.xlane.f32.xlu1 %v4203_v43 }
 0x6cd   : > { %4201 = vmax.xlane.f32.xlu0 %v4200_v56  ;;  %v4215_v56 = vsel %vm414_vm0, %v8564_v54, -inf }
 0x6d0   : > { %4210 = vmax.xlane.f32.xlu1 %v4209_v59  ;;  %v4212_v59 = vsel %vm414_vm0, %v8566_v55, -inf }
 0x6d1   : > { %4207 = vmax.xlane.f32.xlu0 %v4206_v0 }
 0x6d2   : > { %v8696_v7 = vpop.f32.mrb[72].mxu1 }
 0x6d3   : > { %11265 = vst [vmem:[#allocation59_spill] sm:$0xff] %v8696_v7  ;;  %v8698_v43 = vpop.f32.mrb[73].mxu1 }
 0x6d4   : > { %11266 = vst [vmem:[#allocation60_spill] sm:$0xff] %v8698_v43  ;;  %4324 = vmax.xlane.f32.xlu1 %v4323_v20  ;;  %v4218_v20 = vsel %vm414_vm0, %v8570_v61, -inf }
 0x6d5   : > { %4321 = vmax.xlane.f32.xlu0 %v4320_v46  ;;  %v4329_v46 = vsel %vm414_vm0, %v8680_v9, -inf }
 0x6d8   : > { %4216 = vmax.xlane.f32.xlu1 %v4215_v56  ;;  %v4326_v56 = vsel %vm414_vm0, %v8684_v41, -inf  ;;  %v4233_v41 = vsel %vm414_vm0, %v8576_v63, -inf }
 0x6d9   : > { %4213 = vmax.xlane.f32.xlu0 %v4212_v59 }
 0x6da   : > { %v8704_v0 = vpop.f32.mrb[74].mxu1 }
 0x6db   : > { %11267 = vst [vmem:[#allocation61_spill] sm:$0xff] %v8704_v0  ;;  %v8708_v21 = vpop.f32.mrb[75].mxu1 }
 0x6dc   : > { %11268 = vst [vmem:[#allocation62_spill] sm:$0xff] %v8708_v21  ;;  %4222 = vmax.xlane.f32.xlu1 %v4221_v60  ;;  %v4227_v60 = vsel %vm414_vm0, %v8572_v47, -inf }
 0x6dd   : > { %4219 = vmax.xlane.f32.xlu0 %v4218_v20  ;;  %v4224_v20 = vsel %vm414_vm0, %v8574_v62, -inf }
 0x6de   : > { %v8716_v55 = vpop.f32.mrb[76].mxu1 }
 0x6df   : > { %11269 = vst [vmem:[#allocation63_spill] sm:$0xff] %v8716_v55  ;;  %v8718_v59 = vpop.f32.mrb[77].mxu1 }
 0x6e0   : > { %11270 = vst [vmem:[#allocation64_spill] sm:$0xff] %v8718_v59  ;;  %4330 = vmax.xlane.f32.xlu1 %v4329_v46  ;;  %v4230_v46 = vsel %vm414_vm0, %v8578_v2, -inf }
 0x6e1   : > { %4327 = vmax.xlane.f32.xlu0 %v4326_v56  ;;  %v4335_v56 = vsel %vm414_vm0, %v8696_v7, -inf }
 0x6e2   : > { %v8720_v57 = vpop.f32.mrb[78].mxu1 }
 0x6e3   : > { %11271 = vst [vmem:[#allocation65_spill] sm:$0xff] %v8720_v57  ;;  %v8724_v54 = vpop.f32.mrb[79].mxu1 }
 0x6e4   : > { %11272 = vst [vmem:[#allocation66_spill] sm:$0xff] %v8724_v54  ;;  %4228 = vmax.xlane.f32.xlu1 %v4227_v60  ;;  %v4332_v60 = vsel %vm414_vm0, %v8698_v43, -inf  ;;  %v4245_v43 = vsel %vm414_vm0, %v8584_v8, -inf }
 0x6e5   : > { %4225 = vmax.xlane.f32.xlu0 %v4224_v20 }
 0x6e6   : > { %v8728_v9 = vpop.f32.mrb[80].mxu1 }
 0x6e7   : > { %11273 = vst [vmem:[#allocation67_spill] sm:$0xff] %v8728_v9  ;;  %v8732_v61 = vpop.f32.mrb[81].mxu1 }
 0x6e8   : > { %11274 = vst [vmem:[#allocation68_spill] sm:$0xff] %v8732_v61  ;;  %4234 = vmax.xlane.f32.xlu1 %v4233_v41  ;;  %v4239_v41 = vsel %vm414_vm0, %v8580_v6, -inf  ;;  %v4356_v50 = vsel %vm414_vm0, %v8732_v61, -inf  ;;  %v4266_v61 = vsel %vm414_vm0, %v8620_v13, -inf }
 0x6e9   : > { %4231 = vmax.xlane.f32.xlu0 %v4230_v46  ;;  %v4236_v46 = vsel %vm414_vm0, %v8582_v58, -inf }
 0x6ea   : > { %v8740_v62 = vpop.f32.mrb[82].mxu1 }
 0x6eb   : > { %11275 = vst [vmem:[#allocation69_spill] sm:$0xff] %v8740_v62  ;;  %v8742_v20 = vpop.f32.mrb[83].mxu1 }
 0x6ec   : > { %11276 = vst [vmem:[#allocation70_spill] sm:$0xff] %v8742_v20  ;;  %4336 = vmax.xlane.f32.xlu1 %v4335_v56  ;;  %v4242_v56 = vsel %vm414_vm0, %v8586_v11, -inf }
 0x6ed   : > { %4333 = vmax.xlane.f32.xlu0 %v4332_v60  ;;  %v4341_v60 = vsel %vm414_vm0, %v8704_v0, -inf  ;;  %v8776_v0 = vpop.xlane.xlu1 %4108 }
 0x6ee   : > { %v8744_v63 = vpop.f32.mrb[84].mxu1 }
 0x6ef   : > { %11277 = vst [vmem:[#allocation71_spill] sm:$0xff] %v8744_v63  ;;  %v8748_v47 = vpop.f32.mrb[85].mxu1 }
 0x6f0   : > { %11278 = vst [vmem:[#allocation72_spill] sm:$0xff] %v8748_v47  ;;  %4240 = vmax.xlane.f32.xlu1 %v4239_v41  ;;  %v4338_v41 = vsel %vm414_vm0, %v8708_v21, -inf  ;;  %v4347_v21 = vsel %vm414_vm0, %v8716_v55, -inf  ;;  %v4254_v55 = vsel %vm414_vm0, %v8600_v45, -inf }
 0x6f1   : > { %4237 = vmax.xlane.f32.xlu0 %v4236_v46 }
 0x6f2   : > { %v8752_v7 = vpop.f32.mrb[86].mxu1 }
 0x6f3   : > { %11279 = vst [vmem:[#allocation73_spill] sm:$0xff] %v8752_v7  ;;  %v8756_v2 = vpop.f32.mrb[87].mxu1 }
 0x6f4   : > { %11280 = vst [vmem:[#allocation74_spill] sm:$0xff] %v8756_v2  ;;  %4246 = vmax.xlane.f32.xlu1 %v4245_v43  ;;  %v4251_v43 = vsel %vm414_vm0, %v8588_v14, -inf  ;;  %v8786_v14 = vpop.xlane.xlu1 %4114 }
 0x6f5   : > { %4243 = vmax.xlane.f32.xlu0 %v4242_v56  ;;  %v4248_v56 = vsel %vm414_vm0, %v8590_v1, -inf  ;;  %v4257_v1 = vsel %vm414_vm0, %v8594_v16, -inf  ;;  %v8806_v16 = vpop.xlane.xlu0 %4105 }
 0x6f6   : > { %v8764_v58 = vpop.f32.mrb[88].mxu1 }
 0x6f7   : > { %11281 = vst [vmem:[#allocation75_spill] sm:$0xff] %v8764_v58  ;;  %v8766_v46 = vpop.f32.mrb[89].mxu1 }
 0x6f8   : > { %11282 = vst [vmem:[#allocation76_spill] sm:$0xff] %v8766_v46  ;;  %4342 = vmax.xlane.f32.xlu1 %v4341_v60  ;;  %v4344_v60 = vsel %vm414_vm0, %v8718_v59, -inf  ;;  %v4353_v59 = vsel %vm414_vm0, %v8720_v57, -inf }
 0x6f9   : > { %4339 = vmax.xlane.f32.xlu0 %v4338_v41 }
 0x6fa   : > { %v8768_v8 = vpop.f32.mrb[90].mxu1 }
 0x6fb   : > { %11283 = vst [vmem:[#allocation77_spill] sm:$0xff] %v8768_v8  ;;  %v8772_v6 = vpop.f32.mrb[91].mxu1 }
 0x6fc   : > { %11284 = vst [vmem:[#allocation78_spill] sm:$0xff] %v8772_v6  ;;  %4252 = vmax.xlane.f32.xlu1 %v4251_v43 }
 0x6fd   : > { %4249 = vmax.xlane.f32.xlu0 %v4248_v56 }
 0x6fe   : > { %v8782_v41 = vpop.f32.mrb[92].mxu1 }
 0x6ff   : > { %11285 = vst [vmem:[#allocation79_spill] sm:$0xff] %v8782_v41  ;;  %v8784_v11 = vpop.f32.mrb[93].mxu1 }
 0x700   : > { %11286 = vst [vmem:[#allocation80_spill] sm:$0xff] %v8784_v11  ;;  %4348 = vmax.xlane.f32.xlu1 %v4347_v21  ;;  %v4350_v21 = vsel %vm414_vm0, %v8724_v54, -inf  ;;  %v4260_v54 = vsel %vm414_vm0, %v8608_v49, -inf }
 0x701   : > { %4345 = vmax.xlane.f32.xlu0 %v4344_v60  ;;  %v8802_v60 = vpop.xlane.xlu1 %4111 }
 0x702   : > { %v8788_v43 = vpop.f32.mrb[94].mxu1 }
 0x703   : > { %11287 = vst [vmem:[#allocation81_spill] sm:$0xff] %v8788_v43  ;;  %v8792_v56 = vpop.f32.mrb[95].mxu1 }
 0x704   : > { %11288 = vst [vmem:[#allocation82_spill] sm:$0xff] %v8792_v56  ;;  %4258 = vmax.xlane.f32.xlu1 %v4257_v1 }
 0x705   : > { %4255 = vmax.xlane.f32.xlu0 %v4254_v55  ;;  %v4263_v55 = vsel %vm414_vm0, %v8604_v10, -inf  ;;  %v8816_v57 = vpop.xlane.xlu1 %4120 }
 0x706   : > { %v8800_v53 = vpop.f32.mrb[96].mxu1 }
 0x707   : > { %11289 = vst [vmem:[#allocation83_spill] sm:$0xff] %v8800_v53  ;;  %v8804_v52 = vpop.f32.mrb[97].mxu1 }
 0x708   : > { %11290 = vst [vmem:[#allocation84_spill] sm:$0xff] %v8804_v52  ;;  %4354 = vmax.xlane.f32.xlu1 %v4353_v59  ;;  %v4359_v59 = vsel %vm414_vm0, %v8728_v9, -inf }
 0x709   : > { %4351 = vmax.xlane.f32.xlu0 %v4350_v21  ;;  %v8820_v21 = vpop.xlane.xlu0 %4117 }
 0x70a   : > { %v8808_v1 = vpop.f32.mrb[98].mxu1 }
 0x70b   : > { %11291 = vst [vmem:[#allocation85_spill] sm:$0xff] %v8808_v1  ;;  %v8812_v45 = vpop.f32.mrb[99].mxu1 }
 0x70c   : > { %11292 = vst [vmem:[#allocation86_spill] sm:$0xff] %v8812_v45  ;;  %4264 = vmax.xlane.f32.xlu1 %v4263_v55  ;;  %v8828_v55 = vpop.xlane.xlu1 %4126 }
 0x70d   : > { %4261 = vmax.xlane.f32.xlu0 %v4260_v54  ;;  %v8830_v49 = vpop.xlane.xlu0 %4123  ;;  %v4269_v54 = vsel %vm414_vm0, %v8614_v27, -inf }
 0x70e   : > { %v8824_v4 = vpop.f32.mrb[100].mxu1 }
 0x70f   : > { %11293 = vst [vmem:[#allocation87_spill] sm:$0xff] %v8824_v4  ;;  %v8826_v10 = vpop.f32.mrb[101].mxu1 }
 0x710   : > { %11294 = vst [vmem:[#allocation88_spill] sm:$0xff] %v8826_v10  ;;  %4360 = vmax.xlane.f32.xlu1 %v4359_v59  ;;  %v8840_v4 = vpop.xlane.xlu1 %4132  ;;  %v4365_v59 = vsel %vm414_vm0, %v8740_v62, -inf }
 0x711   : > { %4357 = vmax.xlane.f32.xlu0 %v4356_v50  ;;  %v8844_v50 = vpop.xlane.xlu0 %4129 }
 0x712   : > { %v8832_v44 = vpop.f32.mrb[102].mxu1 }
 0x713   : > { %11295 = vst [vmem:[#allocation89_spill] sm:$0xff] %v8832_v44  ;;  %v8836_v9 = vpop.f32.mrb[103].mxu1  ;;  %v4362_v44 = vsel %vm414_vm0, %v8742_v20, -inf  ;;  %v4272_v20 = vsel %vm414_vm0, %v8630_v25, -inf }
 0x714   : > { %11296 = vst [vmem:[#allocation90_spill] sm:$0xff] %v8836_v9  ;;  %4270 = vmax.xlane.f32.xlu1 %v4269_v54  ;;  %v8852_v54 = vpop.xlane.xlu1 %4138 }
 0x715   : > { %4267 = vmax.xlane.f32.xlu0 %v4266_v61  ;;  %11299 = vst [vmem:[#allocation93_spill] sm:$0xff] %v8852_v54  ;;  %v8854_v13 = vpop.xlane.xlu0 %4135  ;;  %v4275_v61 = vsel %vm414_vm0, %v8628_v26, -inf }
 0x716   : > { %v8848_v10 = vpop.f32.mrb[104].mxu1  ;;  %11300 = vst [vmem:[#allocation94_spill] sm:$0xff] %v8854_v13  ;;  %v4368_v13 = vsel %vm414_vm0, %v8748_v47, -inf  ;;  %v4278_v47 = vsel %vm414_vm0, %v8642_v12, -inf }
 0x717   : > { %11297 = vst [vmem:[#allocation91_spill] sm:$0xff] %v8848_v10  ;;  %v8850_v27 = vpop.f32.mrb[105].mxu1 }
 0x718   : > { %11298 = vst [vmem:[#allocation92_spill] sm:$0xff] %v8850_v27  ;;  %4366 = vmax.xlane.f32.xlu1 %v4365_v59  ;;  %v8864_v10 = vpop.xlane.xlu1 %4144  ;;  %v4371_v59 = vsel %vm414_vm0, %v8744_v63, -inf }
 0x719   : > { %4363 = vmax.xlane.f32.xlu0 %v4362_v44  ;;  %11303 = vst [vmem:[#allocation97_spill] sm:$0xff] %v8864_v10  ;;  %v8868_v44 = vpop.xlane.xlu0 %4141 }
 0x71a   : > { %v8856_v9 = vpop.f32.mrb[106].mxu1 }
 0x71b   : > { %11301 = vst [vmem:[#allocation95_spill] sm:$0xff] %v8856_v9  ;;  %v8860_v62 = vpop.f32.mrb[107].mxu1 }
 0x71c   : > { %11302 = vst [vmem:[#allocation96_spill] sm:$0xff] %v8860_v62  ;;  %4276 = vmax.xlane.f32.xlu1 %v4275_v61  ;;  %v8876_v61 = vpop.xlane.xlu1 %4150 }
 0x71d   : > { %4273 = vmax.xlane.f32.xlu0 %v4272_v20  ;;  %11306 = vst [vmem:[#allocation100_spill] sm:$0xff] %v8876_v61  ;;  %v8878_v25 = vpop.xlane.xlu0 %4147  ;;  %v4281_v20 = vsel %vm414_vm0, %v8638_v18, -inf }
 0x71e   : > { %v8872_v54 = vpop.f32.mrb[108].mxu1  ;;  %11307 = vst [vmem:[#allocation101_spill] sm:$0xff] %v8878_v25 }
 0x71f   : > { %11304 = vst [vmem:[#allocation98_spill] sm:$0xff] %v8872_v54  ;;  %v8874_v26 = vpop.f32.mrb[109].mxu1 }
 0x720   : > { %11305 = vst [vmem:[#allocation99_spill] sm:$0xff] %v8874_v26  ;;  %4372 = vmax.xlane.f32.xlu1 %v4371_v59  ;;  %v4377_v59 = vsel %vm414_vm0, %v8752_v7, -inf  ;;  %v8894_v25 = vpop.xlane.xlu1 %4156  ;;  %v4488_v7 = vsub.f32 %v8409_v33, %v8806_v16  ;;  %v4380_v33 = vsel %vm414_vm0, %v8766_v46, -inf }
 0x721   : > { %4369 = vmax.xlane.f32.xlu0 %v4368_v13  ;;  %v4374_v13 = vsel %vm414_vm0, %v8756_v2, -inf  ;;  %11311 = vst [vmem:[#allocation105_spill] sm:$0xff] %v8894_v25  ;;  %v8898_v18 = vpop.xlane.xlu0 %4153  ;;  %v4287_v2 = vsel %vm414_vm0, %v8644_v3, -inf  ;;  %v4284_v25 = vsel %vm414_vm0, %v8648_v23, -inf }
 0x722   : > { %v8880_v10 = vpop.f32.mrb[110].mxu1  ;;  %11313 = vst [vmem:[#allocation107_spill] sm:$0xff] %v8898_v18 }
 0x723   : > { %11308 = vst [vmem:[#allocation102_spill] sm:$0xff] %v8880_v10  ;;  %v8884_v63 = vpop.f32.mrb[111].mxu1 }
 0x724   : > { %11309 = vst [vmem:[#allocation103_spill] sm:$0xff] %v8884_v63  ;;  %4282 = vmax.xlane.f32.xlu1 %v4281_v20  ;;  %v4489_v20 = vsub.f32 %v8407_v31, %v8776_v0  ;;  %v8912_v18 = vpop.xlane.xlu1 %4162  ;;  %v4383_v31 = vsel %vm414_vm0, %v8764_v58, -inf }
 0x725   : > { %4279 = vmax.xlane.f32.xlu0 %v4278_v47 }
 0x726   : > { %v8892_v61 = vpop.f32.mrb[112].mxu1  ;;  %v4618_v0 = vmul.f32 1.442695, %v4489_v20 }
 0x727   : > { %11310 = vst [vmem:[#allocation104_spill] sm:$0xff] %v8892_v61  ;;  %v8896_v10 = vpop.f32.mrb[113].mxu1 }
 0x728   : > { %11312 = vst [vmem:[#allocation106_spill] sm:$0xff] %v8896_v10  ;;  %4378 = vmax.xlane.f32.xlu1 %v4377_v59  ;;  %v8916_v59 = vpop.xlane.xlu0 %4159  ;;  %7196 = vpow2.f32 %v4618_v0 }
 0x729   : > { %4375 = vmax.xlane.f32.xlu0 %v4374_v13  ;;  %v4616_v13 = vmul.f32 1.442695, %v4488_v7  ;;  %v4293_v7 = vsel %vm414_vm0, %v8658_v19, -inf  ;;  %v4386_v19 = vsel %vm414_vm0, %v8772_v6, -inf }
 0x72a   : > { %v8902_v47 = vpop.f32.mrb[114].mxu1 }
 0x72b   : > { %11314 = vst [vmem:[#allocation108_spill] sm:$0xff] %v8902_v47  ;;  %v8908_v12 = vpop.f32.mrb[115].mxu1  ;;  %7198 = vpow2.f32 %v4616_v13  ;;  %v4491_v13 = vsub.f32 %v8423_v39, %v8786_v14 }
 0x72c   : > { %11315 = vst [vmem:[#allocation109_spill] sm:$0xff] %v8908_v12  ;;  %4288 = vmax.xlane.f32.xlu1 %v4287_v2 }
 0x72d   : > { %4285 = vmax.xlane.f32.xlu0 %v4284_v25  ;;  %v4622_v14 = vmul.f32 1.442695, %v4491_v13 }
 0x72e   : > { %v8920_v16 = vpop.f32.mrb[116].mxu1 }
 0x72f   : > { %11316 = vst [vmem:[#allocation110_spill] sm:$0xff] %v8920_v16  ;;  %v8922_v3 = vpop.f32.mrb[117].mxu1  ;;  %7200 = vpow2.f32 %v4622_v14  ;;  %v4493_v14 = vsub.f32 %v8435_v48, %v8816_v57 }
 0x730   : > { %11317 = vst [vmem:[#allocation111_spill] sm:$0xff] %v8922_v3  ;;  %4384 = vmax.xlane.f32.xlu1 %v4383_v31  ;;  %v4290_v31 = vsel %vm414_vm0, %v8662_v5, -inf }
 0x731   : > { %4381 = vmax.xlane.f32.xlu0 %v4380_v33  ;;  %v8924_v2 = vpop.xlane.xlu1 %4300  ;;  %v4389_v33 = vsel %vm414_vm0, %v8768_v8, -inf  ;;  %v4626_v57 = vmul.f32 1.442695, %v4493_v14 }
 0x732   : > { %v8928_v58 = vpop.xlane.xlu0 %4297  ;;  %v8930_v20 = vpop.f32.mrb[118].mxu1 }
 0x733   : > { %11318 = vst [vmem:[#allocation112_spill] sm:$0xff] %v8928_v58  ;;  %11319 = vst [vmem:[#allocation113_spill] sm:$0xff] %v8930_v20  ;;  %v8936_v23 = vpop.f32.mrb[119].mxu1 }
 0x734   : > { %11320 = vst [vmem:[#allocation114_spill] sm:$0xff] %v8936_v23  ;;  %4294 = vmax.xlane.f32.xlu1 %v4293_v7  ;;  %v4490_v7 = vsub.f32 %v8427_v42, %v8802_v60  ;;  %v4395_v60 = vsel %vm414_vm0, %v8782_v41, -inf  ;;  %v4492_v41 = vsub.f32 %v8437_v51, %v8820_v21  ;;  %v11331_v21 = vld [vmem:[#allocation46_spill] sm:$0xff] }
 0x735   : > { %4291 = vmax.xlane.f32.xlu0 %v4290_v31  ;;  %v8940_v0 = vpop.xlane.xlu1 %4168 }
 0x736   : > { %11321 = vst [vmem:[#allocation115_spill] sm:$0xff] %v8940_v0  ;;  %v8948_v25 = vpop.xlane.xlu0 %4165  ;;  %v8952_v58 = vpop.f32.mrb[120].mxu1  ;;  %v4620_v0 = vmul.f32 1.442695, %v4490_v7  ;;  %v4624_v51 = vmul.f32 1.442695, %v4492_v41 }
 0x737   : > { %11322 = vst [vmem:[#allocation116_spill] sm:$0xff] %v8952_v58  ;;  %v8958_v8 = vpop.f32.mrb[121].mxu1  ;;  %v11338_v41 = vld [vmem:[#allocation18_spill] sm:$0xff] }
 0x738   : > { %11323 = vst [vmem:[#allocation117_spill] sm:$0xff] %v8958_v8  ;;  %4390 = vmax.xlane.f32.xlu1 %v4389_v33  ;;  %v4392_v33 = vsel %vm414_vm0, %v8784_v11, -inf  ;;  %7202 = vpow2.f32 %v4620_v0 }
 0x739   : > { %4387 = vmax.xlane.f32.xlu0 %v4386_v19  ;;  %v8960_v39 = vpop.xlane.xlu1 %4174  ;;  %v8974_v19 = vpop.eup %7196  ;;  %7204 = vpow2.f32 %v4626_v57  ;;  %v11333_v57 = vld [vmem:[#allocation2_spill] sm:$0xff] }
 0x73a   : > { %v8964_v5 = vpop.xlane.xlu0 %4171  ;;  %v8966_v6 = vpop.f32.mrb[122].mxu1  ;;  %11326 = vst [vmem:[#allocation120_spill] sm:$0xff] %v8974_v19  ;;  %7206 = vpow2.f32 %v4624_v51 }
 0x73b   : > { %11324 = vst [vmem:[#allocation118_spill] sm:$0xff] %v8966_v6  ;;  %v8972_v31 = vpop.f32.mrb[123].mxu1  ;;  %v8978_v13 = vpop.eup %7198 }
 0x73c   : > { %11325 = vst [vmem:[#allocation119_spill] sm:$0xff] %v8972_v31  ;;  %4396 = vmax.xlane.f32.xlu1 %v4395_v60  ;;  %11327 = vst [vmem:[#allocation121_spill] sm:$0xff] %v8978_v13  ;;  %v4875_v60 = vsel %vm414_vm0, %v8974_v19, 0.0  ;;  %v4872_v11 = vsel %vm414_vm0, %v8978_v13, 0.0  ;;  %v4401_v13 = vsel %vm414_vm0, %v8788_v43, -inf  ;;  %v4495_v43 = vsub.f32 %v11333_v57, %v8828_v55 }
 0x73d   : > { %4393 = vmax.xlane.f32.xlu0 %v4392_v33  ;;  %v8980_v46 = vpop.xlane.xlu1 %4306 }
 0x73e   : > { %v8984_v42 = vpop.xlane.xlu0 %4303  ;;  %v4630_v57 = vmul.f32 1.442695, %v4495_v43 }
 0x740   : > { %4876 = vadd.xlane.f32.xlu1 %v4875_v60  ;;  %v4407_v60 = vsel %vm414_vm0, %v8800_v53, -inf  ;;  %v11335_v53 = vld [vmem:[#allocation3_spill] sm:$0xff]  ;;  %7208 = vpow2.f32 %v4630_v57  ;;  %v11350_v57 = vld [vmem:[#allocation4_spill] sm:$0xff] }
 0x741   : > { %4873 = vadd.xlane.f32.xlu0 %v4872_v11  ;;  %v8992_v33 = vpop.xlane.xlu1 %4180  ;;  %v4398_v11 = vsel %vm414_vm0, %v8792_v56, -inf }
 0x742   : > { %v8998_v0 = vpop.xlane.xlu0 %4177 }
 0x744   : > { %4402 = vmax.xlane.f32.xlu1 %v4401_v13  ;;  %v9018_v13 = vpop.eup %7200 }
 0x745   : > { %4399 = vmax.xlane.f32.xlu0 %v4398_v11  ;;  %v9008_v48 = vpop.xlane.xlu1 %4186  ;;  %11328 = vst [vmem:[#allocation122_spill] sm:$0xff] %v9018_v13  ;;  %v4404_v11 = vsel %vm414_vm0, %v8804_v52, -inf  ;;  %v9022_v56 = vpop.eup %7202 }
 0x746   : > { %v9012_v19 = vpop.xlane.xlu0 %4183  ;;  %11329 = vst [vmem:[#allocation123_spill] sm:$0xff] %v9022_v56  ;;  %v4878_v52 = vsel %vm414_vm0, %v9022_v56, 0.0  ;;  %v4413_v56 = vsel %vm414_vm0, %v8808_v1, -inf }
 0x748   : > { %4408 = vmax.xlane.f32.xlu1 %v4407_v60  ;;  %v4881_v60 = vsel %vm414_vm0, %v9018_v13, 0.0 }
 0x749   : > { %4405 = vmax.xlane.f32.xlu0 %v4404_v11  ;;  %v9024_v14 = vpop.xlane.xlu1 %4312 }
 0x74a   : > { %v9028_v7 = vpop.xlane.xlu0 %4309 }
 0x74b   : > { %11330 = vst [vmem:[#allocation124_spill] sm:$0xff] %v9028_v7  ;;  %v4494_v7 = vsub.f32 %v11335_v53, %v8830_v49  ;;  %v11340_v49 = vld [vmem:[#allocation19_spill] sm:$0xff] }
 0x74c   : > { %4882 = vadd.xlane.f32.xlu1 %v4881_v60  ;;  %v11355_v60 = vld [vmem:[#allocation89_spill] sm:$0xff] }
 0x74d   : > { %4879 = vadd.xlane.f32.xlu0 %v4878_v52  ;;  %v9036_v11 = vpop.xlane.xlu1 %4192  ;;  %v4410_v52 = vsel %vm414_vm0, %v8812_v45, -inf  ;;  %v4628_v53 = vmul.f32 1.442695, %v4494_v7  ;;  %v11343_v45 = vld [vmem:[#allocation88_spill] sm:$0xff] }
 0x74e   : > { %11332 = vst [vmem:[#allocation46_spill] sm:$0xff] %v9036_v11  ;;  %v9042_v51 = vpop.xlane.xlu0 %4189  ;;  %v11359_v11 = vld [vmem:[#allocation22_spill] sm:$0xff] }
 0x74f   : > { %11334 = vst [vmem:[#allocation2_spill] sm:$0xff] %v9042_v51  ;;  %v11341_v51 = vld [vmem:[#allocation87_spill] sm:$0xff]  ;;  %7210 = vpow2.f32 %v4628_v53 }
 0x750   : > { %4414 = vmax.xlane.f32.xlu1 %v4413_v56  ;;  %v4419_v1 = vsel %vm414_vm0, %v11341_v51, -inf  ;;  %v9062_v56 = vpop.eup %7204  ;;  %v11353_v51 = vld [vmem:[#allocation5_spill] sm:$0xff] }
 0x751   : > { %4411 = vmax.xlane.f32.xlu0 %v4410_v52  ;;  %v9052_v55 = vpop.xlane.xlu1 %4198  ;;  %11342 = vst [vmem:[#allocation19_spill] sm:$0xff] %v9062_v56  ;;  %v4416_v52 = vsel %vm414_vm0, %v11343_v45, -inf  ;;  %v9066_v13 = vpop.eup %7206 }
 0x752   : > { %11337 = vst [vmem:[#allocation3_spill] sm:$0xff] %v9052_v55  ;;  %v9056_v40 = vpop.xlane.xlu0 %4195  ;;  %11344 = vst [vmem:[#allocation125_spill] sm:$0xff] %v9066_v13  ;;  %v4884_v45 = vsel %vm414_vm0, %v9066_v13, 0.0  ;;  %v4425_v13 = vsel %vm414_vm0, %v11355_v60, -inf }
 0x753   : > { %11339 = vst [vmem:[#allocation18_spill] sm:$0xff] %v9056_v40  ;;  %v4497_v40 = vsub.f32 %v11350_v57, %v8840_v4  ;;  %v11358_v57 = vld [vmem:[#allocation91_spill] sm:$0xff] }
 0x754   : > { %4420 = vmax.xlane.f32.xlu1 %v4419_v1  ;;  %v4887_v1 = vsel %vm414_vm0, %v9062_v56, 0.0  ;;  %v11354_v56 = vld [vmem:[#allocation21_spill] sm:$0xff] }
 0x755   : > { %4417 = vmax.xlane.f32.xlu0 %v4416_v52  ;;  %v9068_v43 = vpop.xlane.xlu1 %4318 }
 0x756   : > { %11345 = vst [vmem:[#allocation126_spill] sm:$0xff] %v9068_v43  ;;  %v9072_v55 = vpop.xlane.xlu0 %4315  ;;  %v4431_v43 = vsel %vm414_vm0, %v11358_v57, -inf }
 0x757   : > { %11347 = vst [vmem:[#allocation127_spill] sm:$0xff] %v9072_v55  ;;  %v4496_v55 = vsub.f32 %v11353_v51, %v8844_v50  ;;  %v11369_v50 = vld [vmem:[#allocation93_spill] sm:$0xff] }
 0x758   : > { %4888 = vadd.xlane.f32.xlu1 %v4887_v1  ;;  %v4428_v1 = vsel %vm414_vm0, %v8850_v27, -inf }
 0x759   : > { %4885 = vadd.xlane.f32.xlu0 %v4884_v45  ;;  %v9080_v52 = vpop.xlane.xlu1 %4204  ;;  %v11356_v45 = vld [vmem:[#allocation90_spill] sm:$0xff]  ;;  %v4632_v60 = vmul.f32 1.442695, %v4496_v55 }
 0x75a   : > { %11349 = vst [vmem:[#allocation128_spill] sm:$0xff] %v9080_v52  ;;  %v9086_v53 = vpop.xlane.xlu0 %4201  ;;  %v4422_v7 = vsel %vm414_vm0, %v11356_v45, -inf  ;;  %v4634_v52 = vmul.f32 1.442695, %v4497_v40  ;;  %v9108_v45 = vpop.eup %7208 }
 0x75b   : > { %11352 = vst [vmem:[#allocation4_spill] sm:$0xff] %v9086_v53  ;;  %11362 = vst [vmem:[#allocation22_spill] sm:$0xff] %v9108_v45  ;;  %v4893_v53 = vsel %vm414_vm0, %v9108_v45, 0.0  ;;  %v11372_v45 = vld [vmem:[#allocation94_spill] sm:$0xff] }
 0x75c   : > { %4426 = vmax.xlane.f32.xlu1 %v4425_v13  ;;  %7212 = vpow2.f32 %v4634_v52  ;;  %v4437_v52 = vsel %vm414_vm0, %v8856_v9, -inf }
 0x75d   : > { %4423 = vmax.xlane.f32.xlu0 %v4422_v7  ;;  %v9096_v4 = vpop.xlane.xlu1 %4210  ;;  %v9110_v7 = vpop.eup %7210  ;;  %7214 = vpow2.f32 %v4632_v60 }
 0x75e   : > { %11357 = vst [vmem:[#allocation5_spill] sm:$0xff] %v9096_v4  ;;  %v9102_v51 = vpop.xlane.xlu0 %4207  ;;  %11363 = vst [vmem:[#allocation129_spill] sm:$0xff] %v9110_v7 }
 0x75f   : > { %11360 = vst [vmem:[#allocation21_spill] sm:$0xff] %v9102_v51 }
 0x760   : > { %4432 = vmax.xlane.f32.xlu1 %v4431_v43  ;;  %v4890_v43 = vsel %vm414_vm0, %v9110_v7, 0.0 }
 0x761   : > { %4429 = vmax.xlane.f32.xlu0 %v4428_v1  ;;  %v9112_v57 = vpop.xlane.xlu1 %4324 }
 0x762   : > { %11364 = vst [vmem:[#allocation130_spill] sm:$0xff] %v9112_v57  ;;  %v9116_v4 = vpop.xlane.xlu0 %4321  ;;  %v11370_v57 = vld [vmem:[#allocation6_spill] sm:$0xff] }
 0x763   : > { %11366 = vst [vmem:[#allocation131_spill] sm:$0xff] %v9116_v4  ;;  %v4499_v40 = vsub.f32 %v11370_v57, %v11369_v50  ;;  %v11373_v4 = vld [vmem:[#allocation7_spill] sm:$0xff]  ;;  %v11375_v57 = vld [vmem:[#allocation26_spill] sm:$0xff] }
 0x764   : > { %4894 = vadd.xlane.f32.xlu1 %v4893_v53  ;;  %v4434_v53 = vsel %vm414_vm0, %v8860_v62, -inf  ;;  %v4498_v7 = vsub.f32 %v11373_v4, %v11372_v45  ;;  %v4443_v45 = vsel %vm414_vm0, %v8872_v54, -inf  ;;  %v11388_v54 = vld [vmem:[#allocation9_spill] sm:$0xff]  ;;  %v11390_v62 = vld [vmem:[#allocation102_spill] sm:$0xff] }
 0x765   : > { %4891 = vadd.xlane.f32.xlu0 %v4890_v43  ;;  %v9124_v1 = vpop.xlane.xlu1 %4216  ;;  %v11374_v43 = vld [vmem:[#allocation25_spill] sm:$0xff]  ;;  %v4638_v13 = vmul.f32 1.442695, %v4499_v40 }
 0x766   : > { %11368 = vst [vmem:[#allocation132_spill] sm:$0xff] %v9124_v1  ;;  %v9132_v27 = vpop.xlane.xlu0 %4213  ;;  %v4636_v1 = vmul.f32 1.442695, %v4498_v7  ;;  %v9150_v4 = vpop.eup %7212  ;;  %v11381_v7 = vld [vmem:[#allocation57_spill] sm:$0xff] }
 0x767   : > { %11378 = vst [vmem:[#allocation6_spill] sm:$0xff] %v9150_v4  ;;  %7216 = vpow2.f32 %v4638_v13  ;;  %v11385_v13 = vld [vmem:[#allocation97_spill] sm:$0xff] }
 0x768   : > { %4438 = vmax.xlane.f32.xlu1 %v4437_v52  ;;  %v4440_v52 = vsel %vm414_vm0, %v8874_v26, -inf  ;;  %7218 = vpow2.f32 %v4636_v1 }
 0x769   : > { %4435 = vmax.xlane.f32.xlu0 %v4434_v53  ;;  %v9140_v9 = vpop.xlane.xlu1 %4222  ;;  %v9154_v53 = vpop.eup %7214 }
 0x76a   : > { %v9144_v51 = vpop.xlane.xlu0 %4219  ;;  %11379 = vst [vmem:[#allocation94_spill] sm:$0xff] %v9154_v53  ;;  %v4896_v26 = vsel %vm414_vm0, %v9154_v53, 0.0  ;;  %v4449_v53 = vsel %vm414_vm0, %v11390_v62, -inf  ;;  %v4455_v62 = vsel %vm414_vm0, %v8892_v61, -inf  ;;  %v11407_v61 = vld [vmem:[#allocation11_spill] sm:$0xff] }
 0x76b   : > { %11376 = vst [vmem:[#allocation93_spill] sm:$0xff] %v9144_v51  ;;  %v11386_v51 = vld [vmem:[#allocation8_spill] sm:$0xff] }
 0x76c   : > { %4444 = vmax.xlane.f32.xlu1 %v4443_v45  ;;  %v4899_v45 = vsel %vm414_vm0, %v9150_v4, 0.0  ;;  %v4501_v60 = vsub.f32 %v11386_v51, %v11385_v13  ;;  %v11389_v4 = vld [vmem:[#allocation29_spill] sm:$0xff] }
 0x76d   : > { %4441 = vmax.xlane.f32.xlu0 %v4440_v52  ;;  %v9156_v40 = vpop.xlane.xlu1 %4330 }
 0x76e   : > { %11380 = vst [vmem:[#allocation7_spill] sm:$0xff] %v9156_v40  ;;  %v9160_v55 = vpop.xlane.xlu0 %4327  ;;  %v4642_v13 = vmul.f32 1.442695, %v4501_v60  ;;  %v11392_v40 = vld [vmem:[#allocation30_spill] sm:$0xff] }
 0x76f   : > { %11382 = vst [vmem:[#allocation25_spill] sm:$0xff] %v9160_v55  ;;  %v4500_v55 = vsub.f32 %v11388_v54, %v8868_v44 }
 0x770   : > { %4900 = vadd.xlane.f32.xlu1 %v4899_v45  ;;  %7220 = vpow2.f32 %v4642_v13  ;;  %v11400_v45 = vld [vmem:[#allocation60_spill] sm:$0xff] }
 0x771   : > { %4897 = vadd.xlane.f32.xlu0 %v4896_v26  ;;  %v9168_v52 = vpop.xlane.xlu1 %4228  ;;  %v4446_v26 = vsel %vm414_vm0, %v8884_v63, -inf  ;;  %v4640_v54 = vmul.f32 1.442695, %v4500_v55  ;;  %v11402_v13 = vld [vmem:[#allocation100_spill] sm:$0xff]  ;;  %v11406_v55 = vld [vmem:[#allocation101_spill] sm:$0xff] }
 0x772   : > { %11384 = vst [vmem:[#allocation26_spill] sm:$0xff] %v9168_v52  ;;  %v9174_v1 = vpop.xlane.xlu0 %4225 }
 0x773   : > { %7222 = vpow2.f32 %v4640_v54 }
 0x774   : > { %4450 = vmax.xlane.f32.xlu1 %v4449_v53  ;;  %v9194_v53 = vpop.eup %7216 }
 0x775   : > { %4447 = vmax.xlane.f32.xlu0 %v4446_v26  ;;  %v9184_v51 = vpop.xlane.xlu1 %4234  ;;  %11395 = vst [vmem:[#allocation8_spill] sm:$0xff] %v9194_v53  ;;  %v4452_v26 = vsel %vm414_vm0, %v8896_v10, -inf  ;;  %v9198_v63 = vpop.eup %7218 }
 0x776   : > { %11391 = vst [vmem:[#allocation57_spill] sm:$0xff] %v9184_v51  ;;  %v9188_v50 = vpop.xlane.xlu0 %4231  ;;  %11396 = vst [vmem:[#allocation9_spill] sm:$0xff] %v9198_v63  ;;  %v4902_v10 = vsel %vm414_vm0, %v9198_v63, 0.0  ;;  %v4461_v63 = vsel %vm414_vm0, %v8902_v47, -inf  ;;  %v4467_v47 = vsel %vm414_vm0, %v8920_v16, -inf  ;;  %v11420_v16 = vld [vmem:[#allocation107_spill] sm:$0xff] }
 0x777   : > { %11393 = vst [vmem:[#allocation97_spill] sm:$0xff] %v9188_v50  ;;  %v11403_v50 = vld [vmem:[#allocation10_spill] sm:$0xff] }
 0x778   : > { %4456 = vmax.xlane.f32.xlu1 %v4455_v62  ;;  %v4905_v62 = vsel %vm414_vm0, %v9194_v53, 0.0  ;;  %v4503_v44 = vsub.f32 %v11403_v50, %v11402_v13  ;;  %v11408_v53 = vld [vmem:[#allocation33_spill] sm:$0xff] }
 0x779   : > { %4453 = vmax.xlane.f32.xlu0 %v4452_v26  ;;  %v9200_v60 = vpop.xlane.xlu1 %4336 }
 0x77a   : > { %11397 = vst [vmem:[#allocation29_spill] sm:$0xff] %v9200_v60  ;;  %v9204_v51 = vpop.xlane.xlu0 %4333  ;;  %v4646_v13 = vmul.f32 1.442695, %v4503_v44 }
 0x77b   : > { %11399 = vst [vmem:[#allocation30_spill] sm:$0xff] %v9204_v51  ;;  %v4502_v51 = vsub.f32 %v11407_v61, %v11406_v55 }
 0x77c   : > { %4906 = vadd.xlane.f32.xlu1 %v4905_v62  ;;  %7224 = vpow2.f32 %v4646_v13  ;;  %v11418_v62 = vld [vmem:[#allocation61_spill] sm:$0xff] }
 0x77d   : > { %4903 = vadd.xlane.f32.xlu0 %v4902_v10  ;;  %v9212_v26 = vpop.xlane.xlu1 %4240  ;;  %v4458_v10 = vsel %vm414_vm0, %v8908_v12, -inf  ;;  %v4644_v61 = vmul.f32 1.442695, %v4502_v51  ;;  %v11417_v51 = vld [vmem:[#allocation12_spill] sm:$0xff] }
 0x77e   : > { %11401 = vst [vmem:[#allocation60_spill] sm:$0xff] %v9212_v26  ;;  %v9218_v54 = vpop.xlane.xlu0 %4237  ;;  %v11416_v26 = vld [vmem:[#allocation105_spill] sm:$0xff] }
 0x77f   : > { %11405 = vst [vmem:[#allocation100_spill] sm:$0xff] %v9218_v54  ;;  %7226 = vpow2.f32 %v4644_v61 }
 0x780   : > { %4462 = vmax.xlane.f32.xlu1 %v4461_v63  ;;  %v9238_v63 = vpop.eup %7220 }
 0x781   : > { %4459 = vmax.xlane.f32.xlu0 %v4458_v10  ;;  %v9228_v50 = vpop.xlane.xlu1 %4246  ;;  %11413 = vst [vmem:[#allocation11_spill] sm:$0xff] %v9238_v63  ;;  %v4464_v10 = vsel %vm414_vm0, %v8922_v3, -inf  ;;  %v9242_v12 = vpop.eup %7222  ;;  %v4476_v3 = vsel %vm414_vm0, %v8958_v8, -inf  ;;  %v11433_v8 = vld [vmem:[#allocation38_spill] sm:$0xff] }
 0x782   : > { %11409 = vst [vmem:[#allocation10_spill] sm:$0xff] %v9228_v50  ;;  %v9232_v52 = vpop.xlane.xlu0 %4243  ;;  %11414 = vst [vmem:[#allocation33_spill] sm:$0xff] %v9242_v12  ;;  %v4505_v50 = vsub.f32 %v11417_v51, %v11416_v26  ;;  %v4908_v13 = vsel %vm414_vm0, %v9242_v12, 0.0  ;;  %v11429_v12 = vld [vmem:[#allocation64_spill] sm:$0xff] }
 0x783   : > { %11411 = vst [vmem:[#allocation101_spill] sm:$0xff] %v9232_v52  ;;  %v11423_v52 = vld [vmem:[#allocation14_spill] sm:$0xff] }
 0x784   : > { %4468 = vmax.xlane.f32.xlu1 %v4467_v47  ;;  %v11421_v47 = vld [vmem:[#allocation13_spill] sm:$0xff]  ;;  %v4650_v51 = vmul.f32 1.442695, %v4505_v50  ;;  %v4507_v61 = vsub.f32 %v11423_v52, %v8912_v18  ;;  %v4470_v50 = vsel %vm414_vm0, %v8936_v23, -inf  ;;  %v4479_v52 = vsel %vm414_vm0, %v8952_v58, -inf }
 0x785   : > { %4465 = vmax.xlane.f32.xlu0 %v4464_v10  ;;  %v9244_v44 = vpop.xlane.xlu1 %4342  ;;  %v4504_v60 = vsub.f32 %v11421_v47, %v11420_v16  ;;  %v4911_v10 = vsel %vm414_vm0, %v9238_v63, 0.0 }
 0x786   : > { %11415 = vst [vmem:[#allocation133_spill] sm:$0xff] %v9244_v44  ;;  %v9250_v55 = vpop.xlane.xlu0 %4339  ;;  %v11424_v44 = vld [vmem:[#allocation36_spill] sm:$0xff]  ;;  %7228 = vpow2.f32 %v4650_v51  ;;  %v9288_v23 = vpop.eup %7224 }
 0x787   : > { %11419 = vst [vmem:[#allocation105_spill] sm:$0xff] %v9250_v55  ;;  %v4648_v54 = vmul.f32 1.442695, %v4504_v60  ;;  %v11425_v55 = vld [vmem:[#allocation15_spill] sm:$0xff]  ;;  %v4654_v60 = vmul.f32 1.442695, %v4507_v61  ;;  %v11432_v61 = vsub.f32 %v8592_v15, %v8924_v2 }
 0x788   : > { %4912 = vadd.xlane.f32.xlu1 %v4911_v10  ;;  %v4506_v63 = vsub.f32 %v11425_v55, %v8916_v59  ;;  %v11426_v10 = vld [vmem:[#allocation37_spill] sm:$0xff]  ;;  %v11427_v59 = vld [vmem:[#allocation63_spill] sm:$0xff]  ;;  %11430 = vst [vmem:[#allocation61_spill] sm:$0xff] %v9288_v23 }
 0x789   : > { %4909 = vadd.xlane.f32.xlu0 %v4908_v13  ;;  %v9260_v26 = vpop.xlane.xlu1 %4252  ;;  %v4473_v13 = vsel %vm414_vm0, %v8930_v20, -inf  ;;  %7230 = vpow2.f32 %v4648_v54  ;;  %v9290_v20 = vpop.eup %7226  ;;  %v4746_v55 = vmul.f32 1.442695, %v11432_v61  ;;  %v11439_v61 = vld [vmem:[#allocation65_spill] sm:$0xff] }
 0x78a   : > { %v9266_v47 = vpop.xlane.xlu0 %4249  ;;  %11431 = vst [vmem:[#allocation107_spill] sm:$0xff] %v9290_v20  ;;  %7232 = vpow2.f32 %v4654_v60  ;;  %v4917_v60 = vsel %vm414_vm0, %v9288_v23, 0.0  ;;  %v4914_v15 = vsel %vm414_vm0, %v9290_v20, 0.0  ;;  %v11441_v23 = vld [vmem:[#allocation66_spill] sm:$0xff] }
 0x78c   : > { %4474 = vmax.xlane.f32.xlu1 %v4473_v13  ;;  %v4652_v13 = vmul.f32 1.442695, %v4506_v63 }
 0x78d   : > { %4471 = vmax.xlane.f32.xlu0 %v4470_v50  ;;  %v9276_v18 = vpop.xlane.xlu1 %4348  ;;  %v11434_v50 = vld [vmem:[#allocation112_spill] sm:$0xff] }
 0x78e   : > { %v9282_v16 = vpop.xlane.xlu0 %4345  ;;  %7234 = vpow2.f32 %v4652_v13  ;;  %v11435_v58 = vsub.f32 %v8596_v17, %v11434_v50  ;;  %v4485_v13 = vsel %vm414_vm0, %v8966_v6, -inf  ;;  %v11437_v17 = vld [vmem:[#allocation115_spill] sm:$0xff] }
 0x78f   : > { %11428 = vst [vmem:[#allocation12_spill] sm:$0xff] %v9282_v16  ;;  %v11436_v16 = vld [vmem:[#allocation39_spill] sm:$0xff]  ;;  %7236 = vpow2.f32 %v4746_v55  ;;  %v11447_v55 = vld [vmem:[#allocation41_spill] sm:$0xff] }
 0x790   : > { %4480 = vmax.xlane.f32.xlu1 %v4479_v52  ;;  %v4744_v52 = vmul.f32 1.442695, %v11435_v58  ;;  %v11438_v58 = vsub.f32 %v8531_v28, %v11437_v17  ;;  %v9328_v6 = vpop.eup %7228 }
 0x791   : > { %4477 = vmax.xlane.f32.xlu0 %v4476_v3  ;;  %v9292_v51 = vpop.xlane.xlu1 %4258  ;;  %11442 = vst [vmem:[#allocation13_spill] sm:$0xff] %v9328_v6  ;;  %v11445_v3 = vld [vmem:[#allocation40_spill] sm:$0xff] }
 0x792   : > { %v9299_v63 = vpop.xlane.xlu0 %4255  ;;  %v4658_v50 = vmul.f32 1.442695, %v11438_v58  ;;  %7238 = vpow2.f32 %v4744_v52  ;;  %v11444_v58 = vsub.f32 %v8536_v32, %v8960_v39 }
 0x793   : > { %v9330_v28 = vpop.eup %7230 }
 0x794   : > { %4918 = vadd.xlane.f32.xlu1 %v4917_v60  ;;  %v4482_v60 = vsel %vm414_vm0, %v8972_v31, -inf  ;;  %11443 = vst [vmem:[#allocation14_spill] sm:$0xff] %v9330_v28  ;;  %7240 = vpow2.f32 %v4658_v50  ;;  %v4662_v52 = vmul.f32 1.442695, %v11444_v58  ;;  %v4923_v50 = vsel %vm414_vm0, %v9328_v6, 0.0  ;;  %v9348_v31 = vpop.eup %7232  ;;  %v11451_v58 = vld [vmem:[#allocation67_spill] sm:$0xff] }
 0x795   : > { %4915 = vadd.xlane.f32.xlu0 %v4914_v15  ;;  %v9310_v2 = vpop.xlane.xlu1 %4354  ;;  %v11440_v15 = vsub.f32 %v8533_v30, %v8948_v25  ;;  %11448 = vst [vmem:[#allocation36_spill] sm:$0xff] %v9348_v31  ;;  %v4920_v32 = vsel %vm414_vm0, %v9330_v28, 0.0  ;;  %v11453_v28 = vld [vmem:[#allocation68_spill] sm:$0xff] }
 0x796   : > { %v9319_v54 = vpop.xlane.xlu0 %4351 }
 0x797   : > { %v4656_v20 = vmul.f32 1.442695, %v11440_v15  ;;  %v11446_v15 = vsub.f32 %v8538_v34, %v8964_v5  ;;  %v11450_v5 = vsub.f32 %v8612_v24, %v8980_v46 }
 0x798   : > { %4486 = vmax.xlane.f32.xlu1 %v4485_v13  ;;  %v9352_v39 = vpop.eup %7234 }
 0x799   : > { %4483 = vmax.xlane.f32.xlu0 %v4482_v60  ;;  %v9332_v17 = vpop.xlane.xlu1 %4264  ;;  %7242 = vpow2.f32 %v4656_v20  ;;  %v4660_v13 = vmul.f32 1.442695, %v11446_v15  ;;  %11449 = vst [vmem:[#allocation15_spill] sm:$0xff] %v9352_v39  ;;  %v4750_v34 = vmul.f32 1.442695, %v11450_v5  ;;  %v9370_v6 = vpop.eup %7236  ;;  %v4926_v24 = vsel %vm414_vm0, %v9352_v39, 0.0 }
 0x79a   : > { %v9339_v25 = vpop.xlane.xlu0 %4261  ;;  %7244 = vpow2.f32 %v4662_v52  ;;  %v4929_v52 = vsel %vm414_vm0, %v9348_v31, 0.0  ;;  %11454 = vst [vmem:[#allocation37_spill] sm:$0xff] %v9370_v6  ;;  %v11457_v5 = vld [vmem:[#allocation42_spill] sm:$0xff]  ;;  %v11459_v39 = vld [vmem:[#allocation43_spill] sm:$0xff] }
 0x79b   : > { %7246 = vpow2.f32 %v4660_v13 }
 0x79c   : > { %4924 = vadd.xlane.f32.xlu1 %v4923_v50  ;;  %v11452_v50 = vsub.f32 %v8618_v29, %v8984_v42  ;;  %v9374_v46 = vpop.eup %7238  ;;  %7248 = vpow2.f32 %v4750_v34  ;;  %v11456_v29 = vsub.f32 %v8540_v35, %v8992_v33  ;;  %v5067_v34 = vsel %vm414_vm0, %v9370_v6, 0.0 }
 0x79d   : > { %4921 = vadd.xlane.f32.xlu0 %v4920_v32  ;;  %v9354_v20 = vpop.xlane.xlu1 %4360  ;;  %11455 = vst [vmem:[#allocation63_spill] sm:$0xff] %v9374_v46  ;;  %v5064_v35 = vsel %vm414_vm0, %v9374_v46, 0.0  ;;  %v11466_v46 = vld [vmem:[#allocation70_spill] sm:$0xff] }
 0x79e   : > { %v9361_v60 = vpop.xlane.xlu0 %4357  ;;  %v4748_v30 = vmul.f32 1.442695, %v11452_v50  ;;  %v4666_v42 = vmul.f32 1.442695, %v11456_v29  ;;  %v9392_v31 = vpop.eup %7240  ;;  %v11463_v29 = vld [vmem:[#allocation69_spill] sm:$0xff] }
 0x79f   : > { %11460 = vst [vmem:[#allocation64_spill] sm:$0xff] %v9392_v31 }
 0x7a0   : > { %4930 = vadd.xlane.f32.xlu1 %v4929_v52  ;;  %7250 = vpow2.f32 %v4748_v30  ;;  %v11458_v52 = vsub.f32 %v8542_v36, %v8998_v0  ;;  %v11462_v36 = vsub.f32 %v8544_v37, %v9008_v48 }
 0x7a1   : > { %4927 = vadd.xlane.f32.xlu0 %v4926_v24  ;;  %v9376_v13 = vpop.xlane.xlu1 %4270  ;;  %7252 = vpow2.f32 %v4666_v42  ;;  %v4935_v42 = vsel %vm414_vm0, %v9392_v31, 0.0 }
 0x7a2   : > { %v9383_v32 = vpop.xlane.xlu0 %4267  ;;  %v4664_v15 = vmul.f32 1.442695, %v11458_v52  ;;  %v4670_v0 = vmul.f32 1.442695, %v11462_v36 }
 0x7a3   : > { %v9396_v33 = vpop.eup %7242 }
 0x7a4   : > { %5068 = vadd.xlane.f32.xlu1 %v5067_v34  ;;  %11461 = vst [vmem:[#allocation38_spill] sm:$0xff] %v9396_v33  ;;  %7254 = vpow2.f32 %v4664_v15  ;;  %v11465_v34 = vsub.f32 %v8546_v38, %v9012_v19  ;;  %v9414_v6 = vpop.eup %7244  ;;  %v4932_v37 = vsel %vm414_vm0, %v9396_v33, 0.0  ;;  %v11470_v38 = vsub.f32 %v8632_v22, %v9024_v14 }
 0x7a5   : > { %5065 = vadd.xlane.f32.xlu0 %v5064_v35  ;;  %v9398_v30 = vpop.xlane.xlu1 %4366  ;;  %11467 = vst [vmem:[#allocation39_spill] sm:$0xff] %v9414_v6  ;;  %v9418_v48 = vpop.eup %7246  ;;  %7256 = vpow2.f32 %v4670_v0  ;;  %v4941_v0 = vsel %vm414_vm0, %v9414_v6, 0.0 }
 0x7a6   : > { %v9405_v24 = vpop.xlane.xlu0 %4363  ;;  %v4668_v50 = vmul.f32 1.442695, %v11465_v34  ;;  %11468 = vst [vmem:[#allocation115_spill] sm:$0xff] %v9418_v48  ;;  %v4754_v19 = vmul.f32 1.442695, %v11470_v38  ;;  %v4938_v22 = vsel %vm414_vm0, %v9418_v48, 0.0 }
 0x7a7   : > { %11464 = vst [vmem:[#allocation112_spill] sm:$0xff] %v9405_v24  ;;  %v9436_v24 = vpop.eup %7248 }
 0x7a8   : > { %4936 = vadd.xlane.f32.xlu1 %v4935_v42  ;;  %7258 = vpow2.f32 %v4668_v50  ;;  %v11473_v42 = vld [vmem:[#allocation124_spill] sm:$0xff]  ;;  %11476 = vst [vmem:[#allocation40_spill] sm:$0xff] %v9436_v24 }
 0x7a9   : > { %4933 = vadd.xlane.f32.xlu0 %v4932_v37  ;;  %v9420_v15 = vpop.xlane.xlu1 %4276  ;;  %v11474_v52 = vsub.f32 %v11331_v21, %v11473_v42  ;;  %7260 = vpow2.f32 %v4754_v19  ;;  %v11478_v21 = vld [vmem:[#allocation16_spill] sm:$0xff]  ;;  %v11481_v37 = vld [vmem:[#allocation71_spill] sm:$0xff]  ;;  %v5073_v19 = vsel %vm414_vm0, %v9436_v24, 0.0 }
 0x7aa   : > { %11469 = vst [vmem:[#allocation65_spill] sm:$0xff] %v9420_v15  ;;  %v9427_v35 = vpop.xlane.xlu0 %4273  ;;  %v9440_v14 = vpop.eup %7250 }
 0x7ab   : > { %11472 = vst [vmem:[#allocation66_spill] sm:$0xff] %v9427_v35  ;;  %v4752_v33 = vmul.f32 1.442695, %v11474_v52  ;;  %11477 = vst [vmem:[#allocation41_spill] sm:$0xff] %v9440_v14  ;;  %v11479_v52 = vld [vmem:[#allocation46_spill] sm:$0xff]  ;;  %v9458_v36 = vpop.eup %7252 }
 0x7ac   : > { %4942 = vadd.xlane.f32.xlu1 %v4941_v0  ;;  %v11480_v38 = vsub.f32 %v11478_v21, %v11479_v52  ;;  %v11483_v0 = vld [vmem:[#allocation17_spill] sm:$0xff]  ;;  %v11484_v35 = vld [vmem:[#allocation2_spill] sm:$0xff]  ;;  %11487 = vst [vmem:[#allocation68_spill] sm:$0xff] %v9458_v36  ;;  %v5070_v21 = vsel %vm414_vm0, %v9440_v14, 0.0 }
 0x7ad   : > { %4939 = vadd.xlane.f32.xlu0 %v4938_v22  ;;  %v9442_v50 = vpop.xlane.xlu1 %4372  ;;  %7262 = vpow2.f32 %v4752_v33  ;;  %v11485_v31 = vsub.f32 %v11483_v0, %v11484_v35 }
 0x7ae   : > { %v4674_v42 = vmul.f32 1.442695, %v11480_v38  ;;  %v9449_v6 = vpop.xlane.xlu0 %4369  ;;  %v9462_v52 = vpop.eup %7254 }
 0x7af   : > { %11482 = vst [vmem:[#allocation67_spill] sm:$0xff] %v9449_v6  ;;  %v4672_v48 = vmul.f32 1.442695, %v11485_v31  ;;  %11488 = vst [vmem:[#allocation42_spill] sm:$0xff] %v9462_v52  ;;  %v11490_v31 = vld [vmem:[#allocation3_spill] sm:$0xff]  ;;  %v9480_v15 = vpop.eup %7256 }
 0x7b0   : > { %5074 = vadd.xlane.f32.xlu1 %v5073_v19  ;;  %7264 = vpow2.f32 %v4674_v42  ;;  %v11491_v35 = vsub.f32 %v11338_v41, %v11490_v31  ;;  %v11494_v19 = vld [vmem:[#allocation18_spill] sm:$0xff]  ;;  %v4947_v42 = vsel %vm414_vm0, %v9458_v36, 0.0  ;;  %11497 = vst [vmem:[#allocation70_spill] sm:$0xff] %v9480_v15  ;;  %v4944_v41 = vsel %vm414_vm0, %v9462_v52, 0.0 }
 0x7b1   : > { %5071 = vadd.xlane.f32.xlu0 %v5070_v21  ;;  %v9464_v33 = vpop.xlane.xlu1 %4282  ;;  %7266 = vpow2.f32 %v4672_v48  ;;  %v11495_v24 = vsub.f32 %v11340_v49, %v11494_v19  ;;  %v11500_v49 = vld [vmem:[#allocation51_spill] sm:$0xff]  ;;  %v11503_v21 = vld [vmem:[#allocation73_spill] sm:$0xff] }
 0x7b2   : > { %11489 = vst [vmem:[#allocation43_spill] sm:$0xff] %v9464_v33  ;;  %v4678_v38 = vmul.f32 1.442695, %v11491_v35  ;;  %v9471_v34 = vpop.xlane.xlu0 %4279  ;;  %v9484_v31 = vpop.eup %7258 }
 0x7b3   : > { %11493 = vst [vmem:[#allocation69_spill] sm:$0xff] %v9471_v34  ;;  %v4676_v14 = vmul.f32 1.442695, %v11495_v24  ;;  %11498 = vst [vmem:[#allocation124_spill] sm:$0xff] %v9484_v31  ;;  %v11501_v24 = vld [vmem:[#allocation126_spill] sm:$0xff]  ;;  %v11506_v34 = vld [vmem:[#allocation127_spill] sm:$0xff]  ;;  %v9502_v0 = vpop.eup %7260 }
 0x7b4   : > { %4948 = vadd.xlane.f32.xlu1 %v4947_v42  ;;  %7268 = vpow2.f32 %v4678_v38  ;;  %v11502_v35 = vsub.f32 %v11500_v49, %v11501_v24  ;;  %v11505_v42 = vld [vmem:[#allocation53_spill] sm:$0xff]  ;;  %v4953_v38 = vsel %vm414_vm0, %v9480_v15, 0.0  ;;  %11509 = vst [vmem:[#allocation71_spill] sm:$0xff] %v9502_v0  ;;  %v4950_v49 = vsel %vm414_vm0, %v9484_v31, 0.0 }
 0x7b5   : > { %4945 = vadd.xlane.f32.xlu0 %v4944_v41  ;;  %v9486_v48 = vpop.xlane.xlu1 %4378  ;;  %7270 = vpow2.f32 %v4676_v14  ;;  %v11507_v6 = vsub.f32 %v11505_v42, %v11506_v34  ;;  %v11512_v34 = vld [vmem:[#allocation20_spill] sm:$0xff]  ;;  %v11515_v41 = vld [vmem:[#allocation49_spill] sm:$0xff] }
 0x7b6   : > { %11499 = vst [vmem:[#allocation16_spill] sm:$0xff] %v9486_v48  ;;  %v4758_v19 = vmul.f32 1.442695, %v11502_v35  ;;  %v9493_v36 = vpop.xlane.xlu0 %4375 }
 0x7b7   : > { %11504 = vst [vmem:[#allocation46_spill] sm:$0xff] %v9493_v36  ;;  %v4756_v52 = vmul.f32 1.442695, %v11507_v6  ;;  %v9506_v24 = vpop.eup %7262  ;;  %v11513_v6 = vld [vmem:[#allocation128_spill] sm:$0xff] }
 0x7b8   : > { %4954 = vadd.xlane.f32.xlu1 %v4953_v38  ;;  %11510 = vst [vmem:[#allocation17_spill] sm:$0xff] %v9506_v24  ;;  %7272 = vpow2.f32 %v4758_v19  ;;  %v11514_v35 = vsub.f32 %v11512_v34, %v11513_v6  ;;  %v11517_v38 = vld [vmem:[#allocation4_spill] sm:$0xff]  ;;  %v5079_v19 = vsel %vm414_vm0, %v9502_v0, 0.0  ;;  %v5076_v34 = vsel %vm414_vm0, %v9506_v24, 0.0  ;;  %v11528_v0 = vld [vmem:[#allocation21_spill] sm:$0xff] }
 0x7b9   : > { %4951 = vadd.xlane.f32.xlu0 %v4950_v49  ;;  %v9508_v14 = vpop.xlane.xlu1 %4288  ;;  %7274 = vpow2.f32 %v4756_v52  ;;  %v11518_v36 = vsub.f32 %v11354_v56, %v11517_v38  ;;  %v11523_v56 = vld [vmem:[#allocation5_spill] sm:$0xff] }
 0x7ba   : > { %11511 = vst [vmem:[#allocation2_spill] sm:$0xff] %v9508_v14  ;;  %v4682_v42 = vmul.f32 1.442695, %v11514_v35  ;;  %v9515_v15 = vpop.xlane.xlu0 %4285  ;;  %v9524_v48 = vpop.eup %7264 }
 0x7bb   : > { %11516 = vst [vmem:[#allocation3_spill] sm:$0xff] %v9515_v15  ;;  %v4680_v31 = vmul.f32 1.442695, %v11518_v36  ;;  %11520 = vst [vmem:[#allocation18_spill] sm:$0xff] %v9524_v48  ;;  %v9528_v6 = vpop.eup %7266  ;;  %v11524_v36 = vsub.f32 %v11359_v11, %v11523_v56 }
 0x7bc   : > { %5080 = vadd.xlane.f32.xlu1 %v5079_v19  ;;  %11521 = vst [vmem:[#allocation51_spill] sm:$0xff] %v9528_v6  ;;  %7276 = vpow2.f32 %v4682_v42  ;;  %v11527_v19 = vld [vmem:[#allocation23_spill] sm:$0xff]  ;;  %v4959_v42 = vsel %vm414_vm0, %v9524_v48, 0.0  ;;  %v4956_v11 = vsel %vm414_vm0, %v9528_v6, 0.0 }
 0x7bd   : > { %5077 = vadd.xlane.f32.xlu0 %v5076_v34  ;;  %v9530_v52 = vpop.xlane.xlu1 %4384  ;;  %v4686_v35 = vmul.f32 1.442695, %v11524_v36  ;;  %7278 = vpow2.f32 %v4680_v31  ;;  %v11529_v15 = vsub.f32 %v11527_v19, %v11528_v0  ;;  %v11533_v0 = vld [vmem:[#allocation55_spill] sm:$0xff]  ;;  %v11536_v34 = vld [vmem:[#allocation52_spill] sm:$0xff] }
 0x7be   : > { %11522 = vst [vmem:[#allocation126_spill] sm:$0xff] %v9530_v52  ;;  %v9537_v22 = vpop.xlane.xlu0 %4381  ;;  %v9546_v14 = vpop.eup %7268 }
 0x7bf   : > { %11526 = vst [vmem:[#allocation73_spill] sm:$0xff] %v9537_v22  ;;  %v4684_v24 = vmul.f32 1.442695, %v11529_v15  ;;  %11531 = vst [vmem:[#allocation53_spill] sm:$0xff] %v9546_v14  ;;  %v9550_v56 = vpop.eup %7270  ;;  %7280 = vpow2.f32 %v4686_v35  ;;  %v11534_v15 = vld [vmem:[#allocation130_spill] sm:$0xff]  ;;  %v11539_v22 = vld [vmem:[#allocation131_spill] sm:$0xff] }
 0x7c0   : > { %4960 = vadd.xlane.f32.xlu1 %v4959_v42  ;;  %11532 = vst [vmem:[#allocation127_spill] sm:$0xff] %v9550_v56  ;;  %v11535_v36 = vsub.f32 %v11533_v0, %v11534_v15  ;;  %v11538_v42 = vld [vmem:[#allocation56_spill] sm:$0xff]  ;;  %v4965_v35 = vsel %vm414_vm0, %v9546_v14, 0.0  ;;  %v4962_v0 = vsel %vm414_vm0, %v9550_v56, 0.0 }
 0x7c1   : > { %4957 = vadd.xlane.f32.xlu0 %v4956_v11  ;;  %v9552_v31 = vpop.xlane.xlu1 %4294  ;;  %7282 = vpow2.f32 %v4684_v24  ;;  %v11540_v33 = vsub.f32 %v11538_v42, %v11539_v22  ;;  %v11545_v22 = vld [vmem:[#allocation24_spill] sm:$0xff]  ;;  %v11548_v11 = vld [vmem:[#allocation77_spill] sm:$0xff] }
 0x7c2   : > { %v4762_v19 = vmul.f32 1.442695, %v11535_v36  ;;  %v9559_v48 = vpop.xlane.xlu0 %4291  ;;  %v9568_v38 = vpop.eup %7272 }
 0x7c3   : > { %11537 = vst [vmem:[#allocation20_spill] sm:$0xff] %v9559_v48  ;;  %v4760_v6 = vmul.f32 1.442695, %v11540_v33  ;;  %11542 = vst [vmem:[#allocation128_spill] sm:$0xff] %v9568_v38  ;;  %v9572_v15 = vpop.eup %7274  ;;  %v11546_v33 = vld [vmem:[#allocation132_spill] sm:$0xff] }
 0x7c4   : > { %4966 = vadd.xlane.f32.xlu1 %v4965_v35  ;;  %11543 = vst [vmem:[#allocation49_spill] sm:$0xff] %v9572_v15  ;;  %7284 = vpow2.f32 %v4762_v19  ;;  %v11547_v36 = vsub.f32 %v11545_v22, %v11546_v33  ;;  %v11550_v35 = vsub.f32 %v11374_v43, %v9132_v27  ;;  %v5085_v19 = vsel %vm414_vm0, %v9568_v38, 0.0  ;;  %v11556_v43 = vld [vmem:[#allocation27_spill] sm:$0xff] }
 0x7c5   : > { %4963 = vadd.xlane.f32.xlu0 %v4962_v0  ;;  %v9574_v24 = vpop.xlane.xlu1 %4390  ;;  %7286 = vpow2.f32 %v4760_v6  ;;  %v5082_v22 = vsel %vm414_vm0, %v9572_v15, 0.0  ;;  %v11554_v6 = vsub.f32 %v11375_v57, %v9140_v9  ;;  %v11561_v15 = vld [vmem:[#allocation7_spill] sm:$0xff] }
 0x7c6   : > { %11544 = vst [vmem:[#allocation4_spill] sm:$0xff] %v9574_v24  ;;  %v4690_v42 = vmul.f32 1.442695, %v11547_v36  ;;  %v9581_v14 = vpop.xlane.xlu0 %4387  ;;  %v4688_v56 = vmul.f32 1.442695, %v11550_v35  ;;  %v9590_v52 = vpop.eup %7276  ;;  %v11557_v35 = vld [vmem:[#allocation93_spill] sm:$0xff]  ;;  %v11562_v48 = vsub.f32 %v11381_v7, %v11561_v15 }
 0x7c7   : > { %11549 = vst [vmem:[#allocation5_spill] sm:$0xff] %v9581_v14  ;;  %11552 = vst [vmem:[#allocation23_spill] sm:$0xff] %v9590_v52  ;;  %v9594_v33 = vpop.eup %7278  ;;  %v4694_v36 = vmul.f32 1.442695, %v11554_v6  ;;  %v11558_v0 = vsub.f32 %v11556_v43, %v11557_v35  ;;  %v11567_v15 = vld [vmem:[#allocation25_spill] sm:$0xff] }
 0x7c8   : > { %5086 = vadd.xlane.f32.xlu1 %v5085_v19  ;;  %11553 = vst [vmem:[#allocation21_spill] sm:$0xff] %v9594_v33  ;;  %7288 = vpow2.f32 %v4690_v42  ;;  %v4766_v24 = vmul.f32 1.442695, %v11562_v48  ;;  %v4971_v42 = vsel %vm414_vm0, %v9590_v52, 0.0  ;;  %v11566_v48 = vld [vmem:[#allocation58_spill] sm:$0xff] }
 0x7c9   : > { %5083 = vadd.xlane.f32.xlu0 %v5082_v22  ;;  %v9599_v27 = vpop.xlane.xlu1 %4396  ;;  %v4692_v49 = vmul.f32 1.442695, %v11558_v0  ;;  %7290 = vpow2.f32 %v4688_v56  ;;  %v9615_v22 = vpop.eup %7280  ;;  %v4968_v0 = vsel %vm414_vm0, %v9594_v33, 0.0  ;;  %v11568_v43 = vsub.f32 %v11566_v48, %v11567_v15 }
 0x7ca   : > { %11555 = vst [vmem:[#allocation55_spill] sm:$0xff] %v9599_v27  ;;  %v9606_v14 = vpop.xlane.xlu0 %4393  ;;  %11564 = vst [vmem:[#allocation52_spill] sm:$0xff] %v9615_v22  ;;  %7292 = vpow2.f32 %v4694_v36  ;;  %v4977_v57 = vsel %vm414_vm0, %v9615_v22, 0.0 }
 0x7cb   : > { %11560 = vst [vmem:[#allocation130_spill] sm:$0xff] %v9606_v14  ;;  %v9619_v6 = vpop.eup %7282  ;;  %7294 = vpow2.f32 %v4692_v49  ;;  %v4764_v35 = vmul.f32 1.442695, %v11568_v43  ;;  %v11591_v43 = vld [vmem:[#allocation29_spill] sm:$0xff] }
 0x7cc   : > { %4972 = vadd.xlane.f32.xlu1 %v4971_v42  ;;  %11565 = vst [vmem:[#allocation56_spill] sm:$0xff] %v9619_v6  ;;  %7296 = vpow2.f32 %v4766_v24  ;;  %v4974_v42 = vsel %vm414_vm0, %v9619_v6, 0.0  ;;  %v11572_v24 = vld [vmem:[#allocation28_spill] sm:$0xff] }
 0x7cd   : > { %4969 = vadd.xlane.f32.xlu0 %v4968_v0  ;;  %v4877_v56 = vpop.xlane.xlu1 %4876  ;;  %v11573_v0 = vld [vmem:[#allocation26_spill] sm:$0xff] }
 0x7ce   : > { %v4874_v7 = vpop.xlane.xlu0 %4873  ;;  %v9626_v19 = vpop.eup %7284  ;;  %7298 = vrcp.f32 %v4877_v56  ;;  %v11574_v48 = vsub.f32 %v11572_v24, %v11573_v0 }
 0x7cf   : > { %11569 = vst [vmem:[#allocation131_spill] sm:$0xff] %v9626_v19  ;;  %v9630_v36 = vpop.eup %7286  ;;  %7300 = vrcp.f32 %v4874_v7 }
 0x7d0   : > { %4978 = vadd.xlane.f32.xlu1 %v4977_v57  ;;  %11570 = vst [vmem:[#allocation24_spill] sm:$0xff] %v9630_v36  ;;  %v4698_v15 = vmul.f32 1.442695, %v11574_v48  ;;  %7302 = vpow2.f32 %v4764_v35  ;;  %v11577_v57 = vsub.f32 %v11389_v4, %v9174_v1  ;;  %v5088_v24 = vsel %vm414_vm0, %v9630_v36, 0.0  ;;  %v11581_v35 = vld [vmem:[#allocation57_spill] sm:$0xff]  ;;  %v11584_v1 = vld [vmem:[#allocation31_spill] sm:$0xff] }
 0x7d1   : > { %4975 = vadd.xlane.f32.xlu0 %v4974_v42  ;;  %v9632_v49 = vpop.xlane.xlu1 %4402  ;;  %v5091_v42 = vsel %vm414_vm0, %v9626_v19, 0.0  ;;  %v11582_v48 = vsub.f32 %v11392_v40, %v11581_v35 }
 0x7d2   : > { %11571 = vst [vmem:[#allocation132_spill] sm:$0xff] %v9632_v49  ;;  %v9639_v33 = vpop.xlane.xlu0 %4399  ;;  %v4696_v6 = vmul.f32 1.442695, %v11577_v57  ;;  %v9648_v9 = vpop.eup %7288  ;;  %7304 = vpow2.f32 %v4698_v15  ;;  %v11585_v57 = vld [vmem:[#allocation97_spill] sm:$0xff]  ;;  %v11590_v49 = vld [vmem:[#allocation59_spill] sm:$0xff] }
 0x7d3   : > { %11576 = vst [vmem:[#allocation77_spill] sm:$0xff] %v9639_v33  ;;  %11579 = vst [vmem:[#allocation27_spill] sm:$0xff] %v9648_v9  ;;  %v9652_v0 = vpop.eup %7290  ;;  %v4702_v22 = vmul.f32 1.442695, %v11582_v48  ;;  %v11586_v14 = vsub.f32 %v11584_v1, %v11585_v57  ;;  %v11592_v40 = vsub.f32 %v11590_v49, %v11591_v43  ;;  %v4983_v15 = vsel %vm414_vm0, %v9648_v9, 0.0 }
 0x7d4   : > { %5092 = vadd.xlane.f32.xlu1 %v5091_v42  ;;  %11580 = vst [vmem:[#allocation93_spill] sm:$0xff] %v9652_v0  ;;  %v9666_v36 = vpop.eup %7292  ;;  %7306 = vpow2.f32 %v4696_v6 }
 0x7d5   : > { %5089 = vadd.xlane.f32.xlu0 %v5088_v24  ;;  %v9657_v4 = vpop.xlane.xlu1 %4408  ;;  %v4700_v19 = vmul.f32 1.442695, %v11586_v14  ;;  %11589 = vst [vmem:[#allocation25_spill] sm:$0xff] %v9666_v36  ;;  %v4770_v35 = vmul.f32 1.442695, %v11592_v40  ;;  %v9675_v1 = vpop.eup %7294  ;;  %v4980_v14 = vsel %vm414_vm0, %v9652_v0, 0.0  ;;  %7308 = vpow2.f32 %v4702_v22 }
 0x7d6   : > { %11583 = vst [vmem:[#allocation7_spill] sm:$0xff] %v9657_v4  ;;  %v9664_v52 = vpop.xlane.xlu0 %4405  ;;  %11594 = vst [vmem:[#allocation28_spill] sm:$0xff] %v9675_v1  ;;  %v9679_v57 = vpop.eup %7296  ;;  %v11596_v40 = vld [vmem:[#allocation30_spill] sm:$0xff]  ;;  %v4986_v22 = vsel %vm414_vm0, %v9675_v1, 0.0 }
 0x7d7   : > { %11588 = vst [vmem:[#allocation58_spill] sm:$0xff] %v9664_v52  ;;  %11595 = vst [vmem:[#allocation26_spill] sm:$0xff] %v9679_v57  ;;  %7310 = vpow2.f32 %v4700_v19  ;;  %v11597_v48 = vsub.f32 %v11400_v45, %v11596_v40  ;;  %v11600_v45 = vld [vmem:[#allocation32_spill] sm:$0xff]  ;;  %v5097_v1 = vsel %vm414_vm0, %v9679_v57, 0.0  ;;  %v11617_v57 = vld [vmem:[#allocation121_spill] sm:$0xff] }
 0x7d8   : > { %4984 = vadd.xlane.f32.xlu1 %v4983_v15  ;;  %v7299_v42 = vpop.eup %7298  ;;  %7312 = vpow2.f32 %v4770_v35  ;;  %v4989_v15 = vsel %vm414_vm0, %v9666_v36, 0.0  ;;  %v11614_v36 = vld [vmem:[#allocation35_spill] sm:$0xff] }
 0x7d9   : > { %4981 = vadd.xlane.f32.xlu0 %v4980_v14  ;;  %v4883_v6 = vpop.xlane.xlu1 %4882  ;;  %v7301_v43 = vpop.eup %7300  ;;  %v4768_v9 = vmul.f32 1.442695, %v11597_v48  ;;  %v5385_v52 = vmul.f32 %v7299_v42, %v4877_v56  ;;  %v11601_v48 = vld [vmem:[#allocation60_spill] sm:$0xff] }
 0x7da   : > { %v4880_v49 = vpop.xlane.xlu0 %4879  ;;  %v5384_v24 = vmul.f32 %v7301_v43, %v4874_v7  ;;  %7314 = vrcp.f32 %v4883_v6  ;;  %v9688_v14 = vpop.eup %7302  ;;  %v11602_v56 = vsub.f32 %v11600_v45, %v11601_v48  ;;  %v11603_v7 = vld [vmem:[#allocation85_spill] sm:$0xff] }
 0x7db   : > { %11598 = vst [vmem:[#allocation57_spill] sm:$0xff] %v9688_v14  ;;  %v5513_v19 = vsub.f32 2.0, %v5385_v52  ;;  %7316 = vrcp.f32 %v4880_v49  ;;  %v11605_v52 = vld [vmem:[#allocation100_spill] sm:$0xff] }
 0x7dc   : > { %4990 = vadd.xlane.f32.xlu1 %v4989_v15  ;;  %v4706_v40 = vmul.f32 1.442695, %v11602_v56  ;;  %v5512_v0 = vsub.f32 2.0, %v5384_v24  ;;  %7318 = vpow2.f32 %v4768_v9  ;;  %v11606_v4 = vsub.f32 %v11408_v53, %v11605_v52  ;;  %v9706_v45 = vpop.eup %7304  ;;  %v11613_v56 = vld [vmem:[#allocation120_spill] sm:$0xff] }
 0x7dd   : > { %4987 = vadd.xlane.f32.xlu0 %v4986_v22  ;;  %v9690_v35 = vpop.xlane.xlu1 %4414  ;;  %v5641_v33 = vmul.f32 %v7299_v42, %v5513_v19  ;;  %11608 = vst [vmem:[#allocation59_spill] sm:$0xff] %v9706_v45  ;;  %v5094_v9 = vsel %vm414_vm0, %v9688_v14, 0.0  ;;  %v11611_v42 = vld [vmem:[#allocation10_spill] sm:$0xff]  ;;  %v11618_v14 = vld [vmem:[#allocation87_spill] sm:$0xff] }
 0x7de   : > { %11599 = vst [vmem:[#allocation31_spill] sm:$0xff] %v9690_v35  ;;  %v9697_v15 = vpop.xlane.xlu0 %4411  ;;  %v4704_v22 = vmul.f32 1.442695, %v11606_v4  ;;  %v5640_v24 = vmul.f32 %v7301_v43, %v5512_v0  ;;  %v9717_v53 = vpop.eup %7306  ;;  %v11610_v4 = vld [vmem:[#allocation34_spill] sm:$0xff]  ;;  %7320 = vpow2.f32 %v4706_v40  ;;  %v11615_v0 = vld [vmem:[#allocation101_spill] sm:$0xff]  ;;  %v11622_v40 = vld [vmem:[#allocation88_spill] sm:$0xff] }
 0x7df   : > { %11604 = vst [vmem:[#allocation97_spill] sm:$0xff] %v9697_v15  ;;  %11609 = vst [vmem:[#allocation29_spill] sm:$0xff] %v9717_v53  ;;  %v11612_v19 = vsub.f32 %v11610_v4, %v11611_v42  ;;  %v5769_v52 = vmul.f32 %v11613_v56, %v5641_v33  ;;  %v11616_v43 = vsub.f32 %v11614_v36, %v11615_v0  ;;  %v9733_v4 = vpop.eup %7308  ;;  %v11620_v33 = vld [vmem:[#allocation133_spill] sm:$0xff] }
 0x7e0   : > { %5098 = vadd.xlane.f32.xlu1 %v5097_v1  ;;  %v5768_v15 = vmul.f32 %v11617_v57, %v5640_v24  ;;  %11619 = vst [vmem:[#allocation30_spill] sm:$0xff] %v9733_v4  ;;  %7322 = vpow2.f32 %v4704_v22  ;;  %v4995_v57 = vsel %vm414_vm0, %v9706_v45, 0.0  ;;  %v4992_v22 = vsel %vm414_vm0, %v9717_v53, 0.0  ;;  %v11632_v53 = vld [vmem:[#allocation90_spill] sm:$0xff]  ;;  %v11640_v45 = vld [vmem:[#allocation91_spill] sm:$0xff] }
 0x7e1   : > { %v4710_v48 = vmul.f32 1.442695, %v11612_v19  ;;  %5095 = vadd.xlane.f32.xlu0 %v5094_v9  ;;  %v9723_v38 = vpop.xlane.xlu1 %4420  ;;  %v4708_v1 = vmul.f32 1.442695, %v11616_v43  ;;  %v11621_v9 = vsub.f32 %v11418_v62, %v11620_v33  ;;  %5897 = vst.msk [vmem:[%s9713_s25 + $0x8] sm:$0xff] %vm414_vm0, %v5769_v52  ;;  %v9744_v24 = vpop.eup %7310  ;;  %v11625_v43 = vld [vmem:[#allocation62_spill] sm:$0xff] }
 0x7e2   : > { %v9731_v35 = vpop.xlane.xlu0 %4417  ;;  %11623 = vst [vmem:[#allocation32_spill] sm:$0xff] %v9744_v24  ;;  %5896 = vst.msk [vmem:[%s9713_s25] sm:$0xff] %vm414_vm0, %v5768_v15  ;;  %v9750_v19 = vpop.eup %7312  ;;  %v11626_v33 = vld [vmem:[#allocation105_spill] sm:$0xff]  ;;  %v5001_v15 = vsel %vm414_vm0, %v9733_v4, 0.0 }
 0x7e3   : > { %v4774_v42 = vmul.f32 1.442695, %v11621_v9  ;;  %11624 = vst [vmem:[#allocation60_spill] sm:$0xff] %v9750_v19  ;;  %7324 = vpow2.f32 %v4710_v48  ;;  %v11627_v9 = vsub.f32 %v11625_v43, %v11626_v33  ;;  %v4998_v48 = vsel %vm414_vm0, %v9744_v24, 0.0 }
 0x7e4   : > { %4996 = vadd.xlane.f32.xlu1 %v4995_v57  ;;  %v7315_v56 = vpop.eup %7314  ;;  %7326 = vpow2.f32 %v4708_v1  ;;  %v11629_v43 = vsub.f32 %v11424_v44, %v9260_v26 }
 0x7e5   : > { %4993 = vadd.xlane.f32.xlu0 %v4992_v22  ;;  %v4889_v62 = vpop.xlane.xlu1 %4888  ;;  %v7317_v0 = vpop.eup %7316  ;;  %7328 = vpow2.f32 %v4774_v42  ;;  %v4772_v36 = vmul.f32 1.442695, %v11627_v9  ;;  %v5387_v27 = vmul.f32 %v7315_v56, %v4883_v6  ;;  %v11630_v9 = vld [vmem:[#allocation89_spill] sm:$0xff] }
 0x7e6   : > { %v4886_v52 = vpop.xlane.xlu0 %4885  ;;  %v5386_v57 = vmul.f32 %v7317_v0, %v4880_v49  ;;  %7330 = vrcp.f32 %v4889_v62  ;;  %v9759_v22 = vpop.eup %7318  ;;  %v4714_v6 = vmul.f32 1.442695, %v11629_v43 }
 0x7e7   : > { %11628 = vst [vmem:[#allocation85_spill] sm:$0xff] %v9759_v22  ;;  %v5515_v1 = vsub.f32 2.0, %v5387_v27  ;;  %7332 = vrcp.f32 %v4886_v52  ;;  %v11631_v27 = vsub.f32 %v11426_v10, %v9266_v47  ;;  %v11636_v47 = vld [vmem:[#allocation122_spill] sm:$0xff] }
 0x7e8   : > { %5002 = vadd.xlane.f32.xlu1 %v5001_v15  ;;  %v5514_v33 = vsub.f32 2.0, %v5386_v57  ;;  %v5103_v15 = vsel %vm414_vm0, %v9750_v19, 0.0  ;;  %7334 = vpow2.f32 %v4772_v36  ;;  %v9777_v44 = vpop.eup %7320  ;;  %v5100_v57 = vsel %vm414_vm0, %v9759_v22, 0.0  ;;  %v11651_v22 = vld [vmem:[#allocation96_spill] sm:$0xff] }
 0x7e9   : > { %4999 = vadd.xlane.f32.xlu0 %v4998_v48  ;;  %v9761_v42 = vpop.xlane.xlu1 %4426  ;;  %v4712_v48 = vmul.f32 1.442695, %v11631_v27  ;;  %v5643_v24 = vmul.f32 %v7315_v56, %v5515_v1  ;;  %11633 = vst [vmem:[#allocation100_spill] sm:$0xff] %v9777_v44  ;;  %v11635_v36 = vsub.f32 %v11427_v59, %v9276_v18  ;;  %7336 = vpow2.f32 %v4714_v6  ;;  %v11643_v6 = vld [vmem:[#allocation92_spill] sm:$0xff] }
 0x7ea   : > { %v9768_v4 = vpop.xlane.xlu0 %4423  ;;  %v5642_v26 = vmul.f32 %v7317_v0, %v5514_v33  ;;  %v9781_v43 = vpop.eup %7322  ;;  %v11637_v0 = vld [vmem:[#allocation12_spill] sm:$0xff]  ;;  %v11642_v59 = vsub.f32 %v11433_v8, %v9292_v51 }
 0x7eb   : > { %11634 = vst [vmem:[#allocation34_spill] sm:$0xff] %v9781_v43  ;;  %v4778_v49 = vmul.f32 1.442695, %v11635_v36  ;;  %v5771_v10 = vmul.f32 %v11636_v47, %v5643_v24  ;;  %v11638_v1 = vsub.f32 %v11429_v12, %v11637_v0  ;;  %7338 = vpow2.f32 %v4712_v48 }
 0x7ec   : > { %5104 = vadd.xlane.f32.xlu1 %v5103_v15  ;;  %v11639_v15 = vld [vmem:[#allocation123_spill] sm:$0xff]  ;;  %v4718_v24 = vmul.f32 1.442695, %v11642_v59  ;;  %v5004_v48 = vsel %vm414_vm0, %v9781_v43, 0.0  ;;  %v11646_v0 = vsub.f32 %v11436_v16, %v9299_v63  ;;  %v11648_v16 = vsub.f32 %v11439_v61, %v9310_v2 }
 0x7ed   : > { %5101 = vadd.xlane.f32.xlu0 %v5100_v57  ;;  %v9787_v56 = vpop.xlane.xlu1 %4432  ;;  %v4776_v33 = vmul.f32 1.442695, %v11638_v1  ;;  %v5770_v27 = vmul.f32 %v11639_v15, %v5642_v26  ;;  %v9797_v18 = vpop.eup %7324  ;;  %5899 = vst.msk [vmem:[%s9713_s25 + $0x18] sm:$0xff] %vm414_vm0, %v5771_v10  ;;  %v5007_v26 = vsel %vm414_vm0, %v9777_v44, 0.0  ;;  %7340 = vpow2.f32 %v4778_v49 }
 0x7ee   : > { %v9795_v19 = vpop.xlane.xlu0 %4429  ;;  %11641 = vst [vmem:[#allocation10_spill] sm:$0xff] %v9797_v18  ;;  %v9808_v57 = vpop.eup %7326  ;;  %v4716_v1 = vmul.f32 1.442695, %v11646_v0  ;;  %v4782_v63 = vmul.f32 1.442695, %v11648_v16 }
 0x7ef   : > { %11644 = vst [vmem:[#allocation120_spill] sm:$0xff] %v9808_v57  ;;  %5898 = vst.msk [vmem:[%s9713_s25 + $0x10] sm:$0xff] %vm414_vm0, %v5770_v27  ;;  %v9814_v36 = vpop.eup %7328  ;;  %7342 = vpow2.f32 %v4776_v33  ;;  %v5013_v27 = vsel %vm414_vm0, %v9797_v18, 0.0  ;;  %v5010_v49 = vsel %vm414_vm0, %v9808_v57, 0.0  ;;  %v11669_v57 = vld [vmem:[#allocation103_spill] sm:$0xff] }
 0x7f0   : > { %5008 = vadd.xlane.f32.xlu1 %v5007_v26  ;;  %11645 = vst [vmem:[#allocation35_spill] sm:$0xff] %v9814_v36  ;;  %v7331_v51 = vpop.eup %7330  ;;  %7344 = vpow2.f32 %v4718_v24 }
 0x7f1   : > { %5005 = vadd.xlane.f32.xlu0 %v5004_v48  ;;  %v4895_v8 = vpop.xlane.xlu1 %4894  ;;  %v7333_v10 = vpop.eup %7332  ;;  %v5389_v15 = vmul.f32 %v7331_v51, %v4889_v62  ;;  %v11649_v48 = vld [vmem:[#allocation95_spill] sm:$0xff] }
 0x7f2   : > { %v4892_v47 = vpop.xlane.xlu0 %4891  ;;  %v5388_v59 = vmul.f32 %v7333_v10, %v4886_v52  ;;  %7346 = vrcp.f32 %v4895_v8  ;;  %v9823_v26 = vpop.eup %7334 }
 0x7f3   : > { %11647 = vst [vmem:[#allocation101_spill] sm:$0xff] %v9823_v26  ;;  %v5517_v33 = vsub.f32 2.0, %v5389_v15  ;;  %7348 = vrcp.f32 %v4892_v47  ;;  %v11650_v15 = vsub.f32 %v11441_v23, %v9319_v54  ;;  %v9841_v2 = vpop.eup %7336  ;;  %v11655_v23 = vld [vmem:[#allocation19_spill] sm:$0xff] }
 0x7f4   : > { %5014 = vadd.xlane.f32.xlu1 %v5013_v27  ;;  %v5516_v62 = vsub.f32 2.0, %v5388_v59  ;;  %v5109_v27 = vsel %vm414_vm0, %v9814_v36, 0.0  ;;  %7350 = vpow2.f32 %v4716_v1  ;;  %11652 = vst [vmem:[#allocation121_spill] sm:$0xff] %v9841_v2  ;;  %v5106_v59 = vsel %vm414_vm0, %v9823_v26, 0.0 }
 0x7f5   : > { %5011 = vadd.xlane.f32.xlu0 %v5010_v49  ;;  %v9825_v24 = vpop.xlane.xlu1 %4438  ;;  %v4780_v49 = vmul.f32 1.442695, %v11650_v15  ;;  %v5645_v12 = vmul.f32 %v7331_v51, %v5517_v33  ;;  %v9845_v16 = vpop.eup %7338  ;;  %v11654_v1 = vsub.f32 %v11445_v3, %v9332_v17  ;;  %7352 = vpow2.f32 %v4782_v63  ;;  %v11658_v15 = vld [vmem:[#allocation98_spill] sm:$0xff]  ;;  %v11661_v63 = vld [vmem:[#allocation99_spill] sm:$0xff] }
 0x7f6   : > { %v9832_v0 = vpop.xlane.xlu0 %4435  ;;  %v5644_v61 = vmul.f32 %v7333_v10, %v5516_v62  ;;  %11653 = vst [vmem:[#allocation87_spill] sm:$0xff] %v9845_v16  ;;  %v11656_v10 = vsub.f32 %v11447_v55, %v9339_v25  ;;  %v11657_v62 = vld [vmem:[#allocation125_spill] sm:$0xff]  ;;  %v11660_v17 = vsub.f32 %v11451_v58, %v9354_v20  ;;  %v5019_v25 = vsel %vm414_vm0, %v9841_v2, 0.0 }
 0x7f7   : > { %v4722_v52 = vmul.f32 1.442695, %v11654_v1  ;;  %v5773_v54 = vmul.f32 %v11655_v23, %v5645_v12  ;;  %v9861_v3 = vpop.eup %7340  ;;  %7354 = vpow2.f32 %v4780_v49  ;;  %v5016_v49 = vsel %vm414_vm0, %v9845_v16, 0.0  ;;  %v11694_v16 = vld [vmem:[#allocation109_spill] sm:$0xff] }
 0x7f8   : > { %5110 = vadd.xlane.f32.xlu1 %v5109_v27  ;;  %v4720_v33 = vmul.f32 1.442695, %v11656_v10  ;;  %v5772_v27 = vmul.f32 %v11657_v62, %v5644_v61  ;;  %11659 = vst [vmem:[#allocation133_spill] sm:$0xff] %v9861_v3  ;;  %v4786_v12 = vmul.f32 1.442695, %v11660_v17 }
 0x7f9   : > { %5107 = vadd.xlane.f32.xlu0 %v5106_v59  ;;  %v9851_v51 = vpop.xlane.xlu1 %4444  ;;  %5901 = vst.msk [vmem:[%s9713_s25 + $0x28] sm:$0xff] %vm414_vm0, %v5773_v54  ;;  %v9872_v61 = vpop.eup %7342  ;;  %7356 = vpow2.f32 %v4722_v52  ;;  %v11664_v54 = vsub.f32 %v11453_v28, %v9361_v60  ;;  %v11666_v28 = vsub.f32 %v11457_v5, %v9376_v13 }
 0x7fa   : > { %v9859_v26 = vpop.xlane.xlu0 %4441  ;;  %11662 = vst [vmem:[#allocation88_spill] sm:$0xff] %v9872_v61  ;;  %5900 = vst.msk [vmem:[%s9713_s25 + $0x20] sm:$0xff] %vm414_vm0, %v5772_v27  ;;  %v9878_v59 = vpop.eup %7344  ;;  %7358 = vpow2.f32 %v4720_v33  ;;  %v5115_v27 = vsel %vm414_vm0, %v9861_v3, 0.0  ;;  %v5112_v52 = vsel %vm414_vm0, %v9872_v61, 0.0  ;;  %v11677_v61 = vld [vmem:[#allocation104_spill] sm:$0xff] }
 0x7fb   : > { %11663 = vst [vmem:[#allocation62_spill] sm:$0xff] %v9878_v59  ;;  %7360 = vpow2.f32 %v4786_v12  ;;  %v4784_v10 = vmul.f32 1.442695, %v11664_v54  ;;  %v4726_v60 = vmul.f32 1.442695, %v11666_v28 }
 0x7fc   : > { %5020 = vadd.xlane.f32.xlu1 %v5019_v25  ;;  %v7347_v58 = vpop.eup %7346 }
 0x7fd   : > { %5017 = vadd.xlane.f32.xlu0 %v5016_v49  ;;  %v4901_v20 = vpop.xlane.xlu1 %4900  ;;  %v7349_v23 = vpop.eup %7348  ;;  %v5391_v62 = vmul.f32 %v7347_v58, %v4895_v8  ;;  %v11667_v49 = vld [vmem:[#allocation102_spill] sm:$0xff] }
 0x7fe   : > { %v4898_v1 = vpop.xlane.xlu0 %4897  ;;  %v5390_v17 = vmul.f32 %v7349_v23, %v4892_v47  ;;  %7362 = vrcp.f32 %v4901_v20  ;;  %v9887_v25 = vpop.eup %7350 }
 0x7ff   : > { %11665 = vst [vmem:[#allocation105_spill] sm:$0xff] %v9887_v25  ;;  %v5519_v33 = vsub.f32 2.0, %v5391_v62  ;;  %7364 = vrcp.f32 %v4898_v1  ;;  %v11668_v62 = vsub.f32 %v11459_v39, %v9383_v32  ;;  %v9905_v13 = vpop.eup %7352  ;;  %v11673_v39 = vld [vmem:[#allocation22_spill] sm:$0xff] }
 0x800   : > { %5116 = vadd.xlane.f32.xlu1 %v5115_v27  ;;  %v5518_v8 = vsub.f32 2.0, %v5390_v17  ;;  %v5025_v27 = vsel %vm414_vm0, %v9878_v59, 0.0  ;;  %7366 = vpow2.f32 %v4784_v10  ;;  %11670 = vst [vmem:[#allocation89_spill] sm:$0xff] %v9905_v13  ;;  %v5022_v17 = vsel %vm414_vm0, %v9887_v25, 0.0 }
 0x801   : > { %5113 = vadd.xlane.f32.xlu0 %v5112_v52  ;;  %v9889_v12 = vpop.xlane.xlu1 %4450  ;;  %v4724_v52 = vmul.f32 1.442695, %v11668_v62  ;;  %v5647_v55 = vmul.f32 %v7347_v58, %v5519_v33  ;;  %v9909_v28 = vpop.eup %7354  ;;  %v11672_v10 = vsub.f32 %v11463_v29, %v9398_v30  ;;  %7368 = vpow2.f32 %v4726_v60  ;;  %v11679_v29 = vld [vmem:[#allocation44_spill] sm:$0xff]  ;;  %v11682_v60 = vld [vmem:[#allocation106_spill] sm:$0xff] }
 0x802   : > { %v9896_v54 = vpop.xlane.xlu0 %4447  ;;  %v5646_v5 = vmul.f32 %v7349_v23, %v5518_v8  ;;  %11671 = vst [vmem:[#allocation90_spill] sm:$0xff] %v9909_v28  ;;  %v11674_v23 = vld [vmem:[#allocation112_spill] sm:$0xff] }
 0x803   : > { %v4790_v47 = vmul.f32 1.442695, %v11672_v10  ;;  %v5775_v32 = vmul.f32 %v11673_v39, %v5647_v55  ;;  %v11675_v33 = vsub.f32 %v11466_v46, %v11674_v23  ;;  %v9925_v30 = vpop.eup %7356  ;;  %7370 = vpow2.f32 %v4724_v52  ;;  %v11680_v55 = vld [vmem:[#allocation65_spill] sm:$0xff] }
 0x804   : > { %5026 = vadd.xlane.f32.xlu1 %v5025_v27  ;;  %v11676_v27 = vld [vmem:[#allocation129_spill] sm:$0xff]  ;;  %11678 = vst [vmem:[#allocation122_spill] sm:$0xff] %v9925_v30  ;;  %v9936_v39 = vpop.eup %7358  ;;  %v5118_v52 = vsel %vm414_vm0, %v9909_v28, 0.0 }
 0x805   : > { %5023 = vadd.xlane.f32.xlu0 %v5022_v17  ;;  %v9915_v58 = vpop.xlane.xlu1 %4456  ;;  %v4788_v8 = vmul.f32 1.442695, %v11675_v33  ;;  %v5774_v62 = vmul.f32 %v11676_v27, %v5646_v5  ;;  %v11681_v17 = vsub.f32 %v11679_v29, %v11680_v55  ;;  %5903 = vst.msk [vmem:[%s9713_s25 + $0x38] sm:$0xff] %vm414_vm0, %v5775_v32  ;;  %v5121_v5 = vsel %vm414_vm0, %v9905_v13, 0.0  ;;  %11683 = vst [vmem:[#allocation12_spill] sm:$0xff] %v9936_v39  ;;  %v9942_v23 = vpop.eup %7360  ;;  %v11685_v55 = vld [vmem:[#allocation45_spill] sm:$0xff] }
 0x806   : > { %v9923_v59 = vpop.xlane.xlu0 %4453  ;;  %11684 = vst [vmem:[#allocation123_spill] sm:$0xff] %v9942_v23  ;;  %7372 = vpow2.f32 %v4790_v47  ;;  %v5028_v47 = vsel %vm414_vm0, %v9936_v39, 0.0  ;;  %v11691_v39 = vld [vmem:[#allocation72_spill] sm:$0xff] }
 0x807   : > { %v4730_v10 = vmul.f32 1.442695, %v11681_v17  ;;  %5902 = vst.msk [vmem:[%s9713_s25 + $0x30] sm:$0xff] %vm414_vm0, %v5774_v62  ;;  %7374 = vpow2.f32 %v4788_v8  ;;  %v11686_v17 = vld [vmem:[#allocation66_spill] sm:$0xff]  ;;  %v5031_v62 = vsel %vm414_vm0, %v9925_v30, 0.0 }
 0x808   : > { %5122 = vadd.xlane.f32.xlu1 %v5121_v5  ;;  %v7363_v32 = vpop.eup %7362  ;;  %v11687_v46 = vsub.f32 %v11685_v55, %v11686_v17  ;;  %v11690_v17 = vld [vmem:[#allocation108_spill] sm:$0xff] }
 0x809   : > { %5119 = vadd.xlane.f32.xlu0 %v5118_v52  ;;  %v4907_v33 = vpop.xlane.xlu1 %4906  ;;  %v7365_v29 = vpop.eup %7364  ;;  %7376 = vpow2.f32 %v4730_v10  ;;  %v5393_v13 = vmul.f32 %v7363_v32, %v4901_v20 }
 0x80a   : > { %v4904_v27 = vpop.xlane.xlu0 %4903  ;;  %v4728_v25 = vmul.f32 1.442695, %v11687_v46  ;;  %v5392_v5 = vmul.f32 %v7365_v29, %v4898_v1  ;;  %7378 = vrcp.f32 %v4907_v33  ;;  %v9951_v52 = vpop.eup %7366  ;;  %v11689_v46 = vsub.f32 %v11481_v37, %v9442_v50  ;;  %v11697_v1 = vld [vmem:[#allocation47_spill] sm:$0xff] }
 0x80b   : > { %11688 = vst [vmem:[#allocation91_spill] sm:$0xff] %v9951_v52  ;;  %v5521_v8 = vsub.f32 2.0, %v5393_v13  ;;  %7380 = vrcp.f32 %v4904_v27  ;;  %v11692_v13 = vld [vmem:[#allocation67_spill] sm:$0xff]  ;;  %v9969_v37 = vpop.eup %7368 }
 0x80c   : > { %5032 = vadd.xlane.f32.xlu1 %v5031_v62  ;;  %v4794_v20 = vmul.f32 1.442695, %v11689_v46  ;;  %v5520_v55 = vsub.f32 2.0, %v5392_v5  ;;  %v5127_v62 = vsel %vm414_vm0, %v9942_v23, 0.0  ;;  %7382 = vpow2.f32 %v4728_v25  ;;  %11695 = vst [vmem:[#allocation92_spill] sm:$0xff] %v9969_v37  ;;  %v11698_v25 = vld [vmem:[#allocation43_spill] sm:$0xff] }
 0x80d   : > { %5029 = vadd.xlane.f32.xlu0 %v5028_v47  ;;  %v9953_v10 = vpop.xlane.xlu1 %4462  ;;  %v11693_v28 = vsub.f32 %v11691_v39, %v11692_v13  ;;  %v5649_v3 = vmul.f32 %v7363_v32, %v5521_v8  ;;  %v5124_v5 = vsel %vm414_vm0, %v9951_v52, 0.0  ;;  %v9973_v46 = vpop.eup %7370  ;;  %v11699_v23 = vsub.f32 %v11697_v1, %v11698_v25  ;;  %v11700_v39 = vld [vmem:[#allocation6_spill] sm:$0xff]  ;;  %v11701_v8 = vld [vmem:[#allocation48_spill] sm:$0xff] }
 0x80e   : > { %v9960_v30 = vpop.xlane.xlu0 %4459  ;;  %v5648_v50 = vmul.f32 %v7365_v29, %v5520_v55  ;;  %11696 = vst [vmem:[#allocation95_spill] sm:$0xff] %v9973_v46  ;;  %7384 = vpow2.f32 %v4794_v20  ;;  %v11702_v29 = vld [vmem:[#allocation69_spill] sm:$0xff]  ;;  %v11704_v13 = vld [vmem:[#allocation94_spill] sm:$0xff] }
 0x80f   : > { %v4792_v47 = vmul.f32 1.442695, %v11693_v28  ;;  %v4734_v36 = vmul.f32 1.442695, %v11699_v23  ;;  %v5777_v28 = vmul.f32 %v11700_v39, %v5649_v3  ;;  %v11703_v55 = vsub.f32 %v11701_v8, %v11702_v29  ;;  %v11705_v52 = vld [vmem:[#allocation110_spill] sm:$0xff]  ;;  %v11708_v3 = vld [vmem:[#allocation16_spill] sm:$0xff] }
 0x810   : > { %5128 = vadd.xlane.f32.xlu1 %v5127_v62  ;;  %v5776_v2 = vmul.f32 %v11704_v13, %v5648_v50  ;;  %v9989_v1 = vpop.eup %7372  ;;  %v11709_v23 = vsub.f32 %v11503_v21, %v11708_v3  ;;  %v5037_v50 = vsel %vm414_vm0, %v9969_v37, 0.0  ;;  %v11713_v13 = vld [vmem:[#allocation74_spill] sm:$0xff] }
 0x811   : > { %5125 = vadd.xlane.f32.xlu0 %v5124_v5  ;;  %v9979_v32 = vpop.xlane.xlu1 %4468  ;;  %v4732_v62 = vmul.f32 1.442695, %v11703_v55  ;;  %11707 = vst [vmem:[#allocation19_spill] sm:$0xff] %v9989_v1  ;;  %7386 = vpow2.f32 %v4792_v47  ;;  %5905 = vst.msk [vmem:[%s9713_s25 + $0x48] sm:$0xff] %vm414_vm0, %v5777_v28  ;;  %v10000_v39 = vpop.eup %7374  ;;  %v5034_v47 = vsel %vm414_vm0, %v9973_v46, 0.0  ;;  %v11714_v3 = vld [vmem:[#allocation46_spill] sm:$0xff] }
 0x812   : > { %v9987_v43 = vpop.xlane.xlu0 %4465  ;;  %v4798_v5 = vmul.f32 1.442695, %v11709_v23  ;;  %11711 = vst [vmem:[#allocation125_spill] sm:$0xff] %v10000_v39  ;;  %5904 = vst.msk [vmem:[%s9713_s25 + $0x40] sm:$0xff] %vm414_vm0, %v5776_v2  ;;  %7388 = vpow2.f32 %v4734_v36  ;;  %v11715_v23 = vsub.f32 %v11713_v13, %v11714_v3  ;;  %v5133_v2 = vsel %vm414_vm0, %v9989_v1, 0.0  ;;  %v11718_v13 = vld [vmem:[#allocation2_spill] sm:$0xff] }
 0x813   : > { %11706 = vst [vmem:[#allocation96_spill] sm:$0xff] %v9987_v43  ;;  %v10006_v8 = vpop.eup %7376  ;;  %7390 = vpow2.f32 %v4732_v62  ;;  %v5130_v36 = vsel %vm414_vm0, %v10000_v39, 0.0  ;;  %v11719_v3 = vsub.f32 %v11515_v41, %v11718_v13  ;;  %v11720_v1 = vld [vmem:[#allocation113_spill] sm:$0xff]  ;;  %v11722_v39 = vld [vmem:[#allocation50_spill] sm:$0xff] }
 0x814   : > { %5038 = vadd.xlane.f32.xlu1 %v5037_v50  ;;  %11712 = vst [vmem:[#allocation98_spill] sm:$0xff] %v10006_v8  ;;  %v7379_v28 = vpop.eup %7378  ;;  %7392 = vpow2.f32 %v4798_v5  ;;  %v4796_v25 = vmul.f32 1.442695, %v11715_v23 }
 0x815   : > { %5035 = vadd.xlane.f32.xlu0 %v5034_v47  ;;  %v4913_v21 = vpop.xlane.xlu1 %4912  ;;  %v7381_v55 = vpop.eup %7380  ;;  %v5395_v18 = vmul.f32 %v7379_v28, %v4907_v33  ;;  %v4738_v33 = vmul.f32 1.442695, %v11719_v3 }
 0x816   : > { %v4910_v29 = vpop.xlane.xlu0 %4909  ;;  %v5394_v50 = vmul.f32 %v7381_v55, %v4904_v27  ;;  %7394 = vrcp.f32 %v4913_v21  ;;  %v10015_v47 = vpop.eup %7382  ;;  %v11728_v27 = vld [vmem:[#allocation75_spill] sm:$0xff] }
 0x817   : > { %11716 = vst [vmem:[#allocation99_spill] sm:$0xff] %v10015_v47  ;;  %v5523_v62 = vsub.f32 2.0, %v5395_v18  ;;  %7396 = vrcp.f32 %v4910_v29  ;;  %v11723_v18 = vld [vmem:[#allocation3_spill] sm:$0xff]  ;;  %v5040_v13 = vsel %vm414_vm0, %v10015_v47, 0.0 }
 0x818   : > { %5134 = vadd.xlane.f32.xlu1 %v5133_v2  ;;  %v5522_v23 = vsub.f32 2.0, %v5394_v50  ;;  %v5043_v2 = vsel %vm414_vm0, %v10006_v8, 0.0  ;;  %7398 = vpow2.f32 %v4796_v25  ;;  %v11724_v37 = vsub.f32 %v11722_v39, %v11723_v18  ;;  %v10033_v41 = vpop.eup %7384  ;;  %v11729_v25 = vld [vmem:[#allocation126_spill] sm:$0xff]  ;;  %v11731_v39 = vld [vmem:[#allocation8_spill] sm:$0xff]  ;;  %v11736_v18 = vld [vmem:[#allocation9_spill] sm:$0xff] }
 0x819   : > { %5131 = vadd.xlane.f32.xlu0 %v5130_v36  ;;  %v10017_v5 = vpop.xlane.xlu1 %4474  ;;  %v5651_v44 = vmul.f32 %v7379_v28, %v5523_v62  ;;  %11726 = vst [vmem:[#allocation22_spill] sm:$0xff] %v10033_v41  ;;  %v11730_v8 = vsub.f32 %v11728_v27, %v11729_v25  ;;  %7400 = vpow2.f32 %v4738_v33  ;;  %v11733_v62 = vld [vmem:[#allocation76_spill] sm:$0xff] }
 0x81a   : > { %11717 = vst [vmem:[#allocation102_spill] sm:$0xff] %v10017_v5  ;;  %v10024_v46 = vpop.xlane.xlu0 %4471  ;;  %v4736_v36 = vmul.f32 1.442695, %v11724_v37  ;;  %v5650_v50 = vmul.f32 %v7381_v55, %v5522_v23  ;;  %v11734_v55 = vld [vmem:[#allocation73_spill] sm:$0xff]  ;;  %v11779_v33 = vld [vmem:[#allocation84_spill] sm:$0xff] }
 0x81b   : > { %11721 = vst [vmem:[#allocation103_spill] sm:$0xff] %v10024_v46  ;;  %v10037_v3 = vpop.eup %7386  ;;  %v4802_v5 = vmul.f32 1.442695, %v11730_v8  ;;  %v5779_v37 = vmul.f32 %v11731_v39, %v5651_v44  ;;  %v11735_v23 = vsub.f32 %v11733_v62, %v11734_v55  ;;  %v11740_v44 = vsub.f32 %v11536_v34, %v9552_v31  ;;  %v11745_v62 = vld [vmem:[#allocation20_spill] sm:$0xff] }
 0x81c   : > { %5044 = vadd.xlane.f32.xlu1 %v5043_v2  ;;  %11727 = vst [vmem:[#allocation112_spill] sm:$0xff] %v10037_v3  ;;  %v5778_v20 = vmul.f32 %v11736_v18, %v5650_v50  ;;  %v10053_v27 = vpop.eup %7388  ;;  %7402 = vpow2.f32 %v4736_v36  ;;  %v5139_v50 = vsel %vm414_vm0, %v10033_v41, 0.0  ;;  %v5136_v36 = vsel %vm414_vm0, %v10037_v3, 0.0  ;;  %v11750_v3 = vld [vmem:[#allocation5_spill] sm:$0xff] }
 0x81d   : > { %5041 = vadd.xlane.f32.xlu0 %v5040_v13  ;;  %v10043_v28 = vpop.xlane.xlu1 %4480  ;;  %v4800_v2 = vmul.f32 1.442695, %v11735_v23  ;;  %11739 = vst [vmem:[#allocation44_spill] sm:$0xff] %v10053_v27  ;;  %v4742_v8 = vmul.f32 1.442695, %v11740_v44  ;;  %5907 = vst.msk [vmem:[%s9713_s25 + $0x58] sm:$0xff] %vm414_vm0, %v5779_v37  ;;  %v10064_v25 = vpop.eup %7390  ;;  %7404 = vpow2.f32 %v4802_v5 }
 0x81e   : > { %11732 = vst [vmem:[#allocation129_spill] sm:$0xff] %v10043_v28  ;;  %v10051_v43 = vpop.xlane.xlu0 %4477  ;;  %11742 = vst [vmem:[#allocation65_spill] sm:$0xff] %v10064_v25  ;;  %v10070_v39 = vpop.eup %7392  ;;  %v11744_v37 = vld [vmem:[#allocation54_spill] sm:$0xff]  ;;  %v5049_v5 = vsel %vm414_vm0, %v10053_v27, 0.0 }
 0x81f   : > { %11738 = vst [vmem:[#allocation104_spill] sm:$0xff] %v10051_v43  ;;  %5906 = vst.msk [vmem:[%s9713_s25 + $0x50] sm:$0xff] %vm414_vm0, %v5778_v20  ;;  %7406 = vpow2.f32 %v4800_v2  ;;  %v11746_v55 = vsub.f32 %v11744_v37, %v11745_v62  ;;  %v11747_v20 = vld [vmem:[#allocation4_spill] sm:$0xff]  ;;  %v5046_v37 = vsel %vm414_vm0, %v10064_v25, 0.0  ;;  %v11753_v62 = vld [vmem:[#allocation79_spill] sm:$0xff] }
 0x820   : > { %5140 = vadd.xlane.f32.xlu1 %v5139_v50  ;;  %11743 = vst [vmem:[#allocation106_spill] sm:$0xff] %v10070_v39  ;;  %v7395_v31 = vpop.eup %7394  ;;  %7408 = vpow2.f32 %v4742_v8  ;;  %v11748_v50 = vsub.f32 %v11548_v11, %v11747_v20  ;;  %v11754_v11 = vld [vmem:[#allocation55_spill] sm:$0xff]  ;;  %v11760_v27 = vld [vmem:[#allocation118_spill] sm:$0xff] }
 0x821   : > { %5137 = vadd.xlane.f32.xlu0 %v5136_v36  ;;  %v10072_v34 = vpop.xlane.xlu1 %4918  ;;  %v4740_v23 = vmul.f32 1.442695, %v11746_v55  ;;  %v7397_v44 = vpop.eup %7396  ;;  %v5397_v46 = vmul.f32 %v7395_v31, %v4913_v21  ;;  %v11749_v36 = vld [vmem:[#allocation78_spill] sm:$0xff]  ;;  %v11755_v55 = vsub.f32 %v11753_v62, %v11754_v11  ;;  %v11763_v11 = vld [vmem:[#allocation132_spill] sm:$0xff] }
 0x822   : > { %v10077_v18 = vpop.xlane.xlu0 %4915  ;;  %v4806_v13 = vmul.f32 1.442695, %v11748_v50  ;;  %v11751_v41 = vsub.f32 %v11749_v36, %v11750_v3  ;;  %v5396_v43 = vmul.f32 %v7397_v44, %v4910_v29  ;;  %7410 = vrcp.f32 %v10072_v34  ;;  %v10090_v8 = vpop.eup %7398  ;;  %v11758_v3 = vld [vmem:[#allocation130_spill] sm:$0xff] }
 0x823   : > { %11752 = vst [vmem:[#allocation45_spill] sm:$0xff] %v10090_v8  ;;  %v4810_v21 = vmul.f32 1.442695, %v11755_v55  ;;  %v5525_v20 = vsub.f32 2.0, %v5397_v46  ;;  %7412 = vrcp.f32 %v10077_v18  ;;  %v5145_v29 = vsel %vm414_vm0, %v10070_v39, 0.0  ;;  %v11762_v46 = vld [vmem:[#allocation81_spill] sm:$0xff] }
 0x824   : > { %v4804_v2 = vmul.f32 1.442695, %v11751_v41  ;;  %5050 = vadd.xlane.f32.xlu1 %v5049_v5  ;;  %7414 = vpow2.f32 %v4740_v23  ;;  %v11757_v41 = vld [vmem:[#allocation80_spill] sm:$0xff]  ;;  %v5524_v25 = vsub.f32 2.0, %v5396_v43  ;;  %v10112_v23 = vpop.eup %7400  ;;  %v5142_v43 = vsel %vm414_vm0, %v10090_v8, 0.0 }
 0x825   : > { %5047 = vadd.xlane.f32.xlu0 %v5046_v37  ;;  %v10096_v50 = vpop.xlane.xlu1 %4486  ;;  %v11759_v5 = vsub.f32 %v11757_v41, %v11758_v3  ;;  %7416 = vpow2.f32 %v4806_v13  ;;  %v11764_v37 = vsub.f32 %v11762_v46, %v11763_v11  ;;  %v5653_v28 = vmul.f32 %v7395_v31, %v5525_v20  ;;  %11766 = vst [vmem:[#allocation72_spill] sm:$0xff] %v10112_v23  ;;  %v11768_v13 = vld [vmem:[#allocation11_spill] sm:$0xff]  ;;  %v11769_v20 = vld [vmem:[#allocation33_spill] sm:$0xff] }
 0x826   : > { %11756 = vst [vmem:[#allocation66_spill] sm:$0xff] %v10096_v50  ;;  %v10105_v62 = vpop.xlane.xlu0 %4483  ;;  %7418 = vpow2.f32 %v4804_v2  ;;  %v5652_v41 = vmul.f32 %v7397_v44, %v5524_v25  ;;  %v10116_v3 = vpop.eup %7402  ;;  %v5055_v25 = vsel %vm414_vm0, %v10112_v23, 0.0 }
 0x827   : > { %v4808_v36 = vmul.f32 1.442695, %v11759_v5  ;;  %11761 = vst [vmem:[#allocation108_spill] sm:$0xff] %v10105_v62  ;;  %v4814_v55 = vmul.f32 1.442695, %v11764_v37  ;;  %11767 = vst [vmem:[#allocation67_spill] sm:$0xff] %v10116_v3  ;;  %7420 = vpow2.f32 %v4810_v21  ;;  %v5781_v5 = vmul.f32 %v11768_v13, %v5653_v28  ;;  %v10124_v2 = vpop.eup %7404 }
 0x828   : > { %5146 = vadd.xlane.f32.xlu1 %v5145_v29  ;;  %v5780_v46 = vmul.f32 %v11769_v20, %v5652_v41  ;;  %11770 = vst [vmem:[#allocation109_spill] sm:$0xff] %v10124_v2  ;;  %v11772_v21 = vld [vmem:[#allocation82_spill] sm:$0xff]  ;;  %v11773_v28 = vld [vmem:[#allocation77_spill] sm:$0xff]  ;;  %v11776_v41 = vld [vmem:[#allocation83_spill] sm:$0xff] }
 0x829   : > { %5143 = vadd.xlane.f32.xlu0 %v5142_v43  ;;  %v10119_v31 = vpop.xlane.xlu1 %4924  ;;  %7422 = vpow2.f32 %v4808_v36  ;;  %5909 = vst.msk [vmem:[%s9713_s25 + $0x68] sm:$0xff] %vm414_vm0, %v5781_v5  ;;  %v10130_v44 = vpop.eup %7406  ;;  %v11774_v29 = vsub.f32 %v11772_v21, %v11773_v28  ;;  %v5052_v36 = vsel %vm414_vm0, %v10116_v3, 0.0  ;;  %v11777_v43 = vld [vmem:[#allocation7_spill] sm:$0xff] }
 0x82a   : > { %v10122_v11 = vpop.xlane.xlu0 %4921  ;;  %7424 = vpow2.f32 %v4814_v55  ;;  %11771 = vst [vmem:[#allocation47_spill] sm:$0xff] %v10130_v44  ;;  %5908 = vst.msk [vmem:[%s9713_s25 + $0x60] sm:$0xff] %vm414_vm0, %v5780_v46  ;;  %v10140_v55 = vpop.eup %7408  ;;  %v11778_v13 = vsub.f32 %v11776_v41, %v11777_v43  ;;  %v11780_v41 = vld [vmem:[#allocation58_spill] sm:$0xff]  ;;  %v5148_v3 = vsel %vm414_vm0, %v10130_v44, 0.0 }
 0x82b   : > { %v4812_v37 = vmul.f32 1.442695, %v11774_v29  ;;  %7426 = vrcp.f32 %v10119_v31  ;;  %11775 = vst [vmem:[#allocation43_spill] sm:$0xff] %v10140_v55  ;;  %v11781_v43 = vsub.f32 %v11779_v33, %v11780_v41 }
 0x82c   : > { %5056 = vadd.xlane.f32.xlu1 %v5055_v25  ;;  %v4818_v5 = vmul.f32 1.442695, %v11778_v13  ;;  %7428 = vrcp.f32 %v10122_v11  ;;  %v7411_v21 = vpop.eup %7410  ;;  %v5151_v25 = vsel %vm414_vm0, %v10124_v2, 0.0 }
 0x82d   : > { %5053 = vadd.xlane.f32.xlu0 %v5052_v36  ;;  %v4931_v20 = vpop.xlane.xlu1 %4930  ;;  %v7413_v46 = vpop.eup %7412  ;;  %v5399_v29 = vmul.f32 %v7411_v21, %v10072_v34  ;;  %v4816_v13 = vmul.f32 1.442695, %v11781_v43  ;;  %v11783_v34 = vld [vmem:[#allocation31_spill] sm:$0xff] }
 0x82e   : > { %7430 = vrcp.f32 %v4931_v20  ;;  %v4928_v28 = vpop.xlane.xlu0 %4927  ;;  %v10149_v39 = vpop.eup %7414  ;;  %v5398_v36 = vmul.f32 %v7413_v46, %v10077_v18  ;;  %v11784_v8 = vsub.f32 %v11603_v7, %v11783_v34  ;;  %v5061_v7 = vsel %vm414_vm0, %v10140_v55, 0.0  ;;  %v11793_v55 = vld [vmem:[#allocation61_spill] sm:$0xff] }
 0x82f   : > { %7432 = vrcp.f32 %v4928_v28  ;;  %v10157_v23 = vpop.eup %7416  ;;  %v5527_v62 = vsub.f32 2.0, %v5399_v29  ;;  %v5058_v34 = vsel %vm414_vm0, %v10149_v39, 0.0 }
 0x830   : > { %7434 = vpow2.f32 %v4812_v37  ;;  %5152 = vadd.xlane.f32.xlu1 %v5151_v25  ;;  %11782 = vst [vmem:[#allocation6_spill] sm:$0xff] %v10157_v23  ;;  %v4822_v2 = vmul.f32 1.442695, %v11784_v8  ;;  %v10164_v47 = vpop.eup %7418  ;;  %v5526_v33 = vsub.f32 2.0, %v5398_v36 }
 0x831   : > { %7436 = vpow2.f32 %v4818_v5  ;;  %5149 = vadd.xlane.f32.xlu0 %v5148_v3  ;;  %v10162_v37 = vpop.xlane.xlu1 %5068  ;;  %11785 = vst [vmem:[#allocation48_spill] sm:$0xff] %v10164_v47  ;;  %v10169_v25 = vpop.eup %7420  ;;  %v5655_v41 = vmul.f32 %v7411_v21, %v5527_v62  ;;  %v11788_v3 = vld [vmem:[#allocation86_spill] sm:$0xff]  ;;  %v11789_v5 = vld [vmem:[#allocation97_spill] sm:$0xff]  ;;  %v11792_v62 = vsub.f32 %v11618_v14, %v9723_v38  ;;  %v5157_v38 = vsel %vm414_vm0, %v10157_v23, 0.0 }
 0x832   : > { %7438 = vrcp.f32 %v10162_v37  ;;  %v10167_v18 = vpop.xlane.xlu0 %5065  ;;  %11786 = vst [vmem:[#allocation69_spill] sm:$0xff] %v10169_v25  ;;  %v11790_v29 = vsub.f32 %v11788_v3, %v11789_v5  ;;  %v5654_v36 = vmul.f32 %v7413_v46, %v5526_v33  ;;  %v11794_v5 = vld [vmem:[#allocation107_spill] sm:$0xff] }
 0x833   : > { %7440 = vrcp.f32 %v10167_v18  ;;  %v10174_v8 = vpop.eup %7422  ;;  %v4826_v21 = vmul.f32 1.442695, %v11792_v62 }
 0x834   : > { %11787 = vst [vmem:[#allocation94_spill] sm:$0xff] %v10174_v8  ;;  %7442 = vpow2.f32 %v4816_v13  ;;  %v4820_v43 = vmul.f32 1.442695, %v11790_v29  ;;  %5062 = vadd.xlane.f32.xlu1 %v5061_v7  ;;  %v10181_v44 = vpop.eup %7424  ;;  %v5783_v13 = vmul.f32 %v11793_v55, %v5655_v41  ;;  %v5782_v46 = vmul.f32 %v11794_v5, %v5654_v36 }
 0x835   : > { %11791 = vst [vmem:[#allocation110_spill] sm:$0xff] %v10181_v44  ;;  %7444 = vpow2.f32 %v4822_v2  ;;  %5059 = vadd.xlane.f32.xlu0 %v5058_v34  ;;  %v10187_v50 = vpop.xlane.xlu1 %4936  ;;  %v7427_v3 = vpop.eup %7426  ;;  %v11795_v55 = vsub.f32 %v11622_v40, %v9731_v35  ;;  %v5154_v36 = vsel %vm414_vm0, %v10164_v47, 0.0 }
 0x836   : > { %7446 = vrcp.f32 %v10187_v50  ;;  %v10191_v33 = vpop.xlane.xlu0 %4933  ;;  %v7429_v7 = vpop.eup %7428  ;;  %5911 = vst.msk [vmem:[%s9713_s25 + $0x78] sm:$0xff] %vm414_vm0, %v5783_v13  ;;  %v5401_v2 = vmul.f32 %v7427_v3, %v10119_v31  ;;  %5910 = vst.msk [vmem:[%s9713_s25 + $0x70] sm:$0xff] %vm414_vm0, %v5782_v46  ;;  %v5160_v46 = vsel %vm414_vm0, %v10174_v8, 0.0 }
 0x837   : > { %7448 = vrcp.f32 %v10191_v33  ;;  %v4824_v41 = vmul.f32 1.442695, %v11795_v55  ;;  %v5400_v29 = vmul.f32 %v7429_v7, %v10122_v11 }
 0x838   : > { %v7431_v14 = vpop.eup %7430  ;;  %7450 = vpow2.f32 %v4820_v43  ;;  %5158 = vadd.xlane.f32.xlu1 %v5157_v38  ;;  %v5529_v34 = vsub.f32 2.0, %v5401_v2  ;;  %v5163_v43 = vsel %vm414_vm0, %v10169_v25, 0.0  ;;  %v5169_v38 = vsel %vm414_vm0, %v10181_v44, 0.0 }
 0x839   : > { %v7433_v31 = vpop.eup %7432  ;;  %7452 = vpow2.f32 %v4826_v21  ;;  %v5403_v62 = vmul.f32 %v7431_v14, %v4931_v20  ;;  %5155 = vadd.xlane.f32.xlu0 %v5154_v36  ;;  %v10207_v13 = vpop.xlane.xlu1 %4942  ;;  %v5528_v40 = vsub.f32 2.0, %v5400_v29 }
 0x83a   : > { %v10211_v35 = vpop.eup %7434  ;;  %v5402_v5 = vmul.f32 %v7433_v31, %v4928_v28  ;;  %7454 = vrcp.f32 %v10207_v13  ;;  %v10214_v11 = vpop.xlane.xlu0 %4939  ;;  %v5657_v20 = vmul.f32 %v7427_v3, %v5529_v34  ;;  %v11796_v28 = vsub.f32 %v11630_v9, %v9761_v42  ;;  %v11799_v9 = vld [vmem:[#allocation14_spill] sm:$0xff] }
 0x83b   : > { %v10218_v21 = vpop.eup %7436  ;;  %v5531_v2 = vsub.f32 2.0, %v5403_v62  ;;  %7456 = vrcp.f32 %v10214_v11  ;;  %v5656_v36 = vmul.f32 %v7429_v7, %v5528_v40  ;;  %v11797_v3 = vsub.f32 %v11632_v53, %v9768_v4  ;;  %v11798_v62 = vld [vmem:[#allocation13_spill] sm:$0xff] }
 0x83c   : > { %v7439_v55 = vpop.eup %7438  ;;  %7458 = vpow2.f32 %v4824_v41  ;;  %v4830_v29 = vmul.f32 1.442695, %v11796_v28  ;;  %v5530_v25 = vsub.f32 2.0, %v5402_v5  ;;  %5164 = vadd.xlane.f32.xlu1 %v5163_v43  ;;  %v5785_v47 = vmul.f32 %v11798_v62, %v5657_v20  ;;  %v11802_v20 = vld [vmem:[#allocation15_spill] sm:$0xff] }
 0x83d   : > { %v7441_v8 = vpop.eup %7440  ;;  %v4828_v34 = vmul.f32 1.442695, %v11797_v3  ;;  %v5659_v23 = vmul.f32 %v7431_v14, %v5531_v2  ;;  %v5449_v44 = vmul.f32 %v7439_v55, %v10162_v37  ;;  %5161 = vadd.xlane.f32.xlu0 %v5160_v46  ;;  %v10231_v41 = vpop.xlane.xlu1 %5074  ;;  %v5784_v7 = vmul.f32 %v11799_v9, %v5656_v36  ;;  %v11800_v37 = vld [vmem:[#allocation36_spill] sm:$0xff] }
 0x83e   : > { %v10233_v42 = vpop.eup %7442  ;;  %v5658_v40 = vmul.f32 %v7433_v31, %v5530_v25  ;;  %v5448_v43 = vmul.f32 %v7441_v8, %v10167_v18  ;;  %7460 = vrcp.f32 %v10231_v41  ;;  %v10238_v53 = vpop.xlane.xlu0 %5071  ;;  %5913 = vst.msk [vmem:[%s9713_s25 + $0x88] sm:$0xff] %vm414_vm0, %v5785_v47  ;;  %v5166_v46 = vsel %vm414_vm0, %v10211_v35, 0.0 }
 0x83f   : > { %v10240_v4 = vpop.eup %7444  ;;  %v5787_v14 = vmul.f32 %v11800_v37, %v5659_v23  ;;  %v5577_v5 = vsub.f32 2.0, %v5449_v44  ;;  %7462 = vrcp.f32 %v10238_v53  ;;  %v11801_v18 = vsub.f32 %v11640_v45, %v9787_v56  ;;  %5912 = vst.msk [vmem:[%s9713_s25 + $0x80] sm:$0xff] %vm414_vm0, %v5784_v7 }
 0x840   : > { %v7447_v25 = vpop.eup %7446  ;;  %7464 = vpow2.f32 %v4830_v29  ;;  %v5786_v2 = vmul.f32 %v11802_v20, %v5658_v40  ;;  %v5576_v47 = vsub.f32 2.0, %v5448_v43  ;;  %5170 = vadd.xlane.f32.xlu1 %v5169_v38  ;;  %v11803_v44 = vsub.f32 %v11643_v6, %v9795_v19  ;;  %v11806_v40 = vld [vmem:[#allocation63_spill] sm:$0xff] }
 0x841   : > { %v4834_v31 = vmul.f32 1.442695, %v11801_v18  ;;  %v7449_v23 = vpop.eup %7448  ;;  %7466 = vpow2.f32 %v4828_v34  ;;  %5915 = vst.msk [vmem:[%s9713_s25 + $0x98] sm:$0xff] %vm414_vm0, %v5787_v14  ;;  %v5705_v36 = vmul.f32 %v7439_v55, %v5577_v5  ;;  %v5405_v29 = vmul.f32 %v7447_v25, %v10187_v50  ;;  %5167 = vadd.xlane.f32.xlu0 %v5166_v46  ;;  %v10260_v45 = vpop.xlane.xlu1 %4948  ;;  %v11804_v50 = vld [vmem:[#allocation37_spill] sm:$0xff] }
 0x842   : > { %v4832_v28 = vmul.f32 1.442695, %v11803_v44  ;;  %v10262_v56 = vpop.eup %7450  ;;  %5914 = vst.msk [vmem:[%s9713_s25 + $0x90] sm:$0xff] %vm414_vm0, %v5786_v2  ;;  %v5704_v3 = vmul.f32 %v7441_v8, %v5576_v47  ;;  %v5404_v38 = vmul.f32 %v7449_v23, %v10191_v33  ;;  %7468 = vrcp.f32 %v10260_v45  ;;  %v10268_v34 = vpop.xlane.xlu0 %4945 }
 0x843   : > { %v5175_v19 = vsel %vm414_vm0, %v10218_v21, 0.0  ;;  %v10272_v6 = vpop.eup %7452  ;;  %v5833_v55 = vmul.f32 %v11804_v50, %v5705_v36  ;;  %v5533_v62 = vsub.f32 2.0, %v5405_v29  ;;  %7470 = vrcp.f32 %v10268_v34  ;;  %v11810_v36 = vld [vmem:[#allocation38_spill] sm:$0xff] }
 0x844   : > { %v5172_v8 = vsel %vm414_vm0, %v10233_v42, 0.0  ;;  %v7455_v33 = vpop.eup %7454  ;;  %7472 = vpow2.f32 %v4834_v31  ;;  %v11805_v9 = vsub.f32 %v11649_v48, %v9825_v24  ;;  %v5832_v43 = vmul.f32 %v11806_v40, %v5704_v3  ;;  %5176 = vadd.xlane.f32.xlu1 %v5175_v19 }
 0x845   : > { %v5532_v37 = vsub.f32 2.0, %v5404_v38  ;;  %v7457_v14 = vpop.eup %7456  ;;  %7474 = vpow2.f32 %v4832_v28  ;;  %v11807_v5 = vsub.f32 %v11651_v22, %v9832_v0  ;;  %5961 = vst.msk [vmem:[%s9713_s25 + $0x208] sm:$0xff] %vm414_vm0, %v5833_v55  ;;  %v5661_v18 = vmul.f32 %v7447_v25, %v5533_v62  ;;  %5173 = vadd.xlane.f32.xlu0 %v5172_v8  ;;  %v10288_v31 = vpop.xlane.xlu1 %4954  ;;  %v11808_v25 = vld [vmem:[#allocation64_spill] sm:$0xff] }
 0x846   : > { %v4838_v7 = vmul.f32 1.442695, %v11805_v9  ;;  %v5407_v20 = vmul.f32 %v7455_v33, %v10207_v13  ;;  %v10290_v24 = vpop.eup %7458  ;;  %5960 = vst.msk [vmem:[%s9713_s25 + $0x200] sm:$0xff] %vm414_vm0, %v5832_v43  ;;  %v5406_v2 = vmul.f32 %v7457_v14, %v10214_v11  ;;  %7476 = vrcp.f32 %v10288_v31  ;;  %v10296_v22 = vpop.xlane.xlu0 %4951 }
 0x847   : > { %v4836_v46 = vmul.f32 1.442695, %v11807_v5  ;;  %v5660_v48 = vmul.f32 %v7449_v23, %v5532_v37  ;;  %v5181_v0 = vsel %vm414_vm0, %v10240_v4, 0.0  ;;  %v5789_v13 = vmul.f32 %v11808_v25, %v5661_v18  ;;  %v11814_v5 = vld [vmem:[#allocation115_spill] sm:$0xff] }
 0x848   : > { %v5535_v47 = vsub.f32 2.0, %v5407_v20  ;;  %7478 = vrcp.f32 %v10296_v22  ;;  %v5178_v44 = vsel %vm414_vm0, %v10262_v56, 0.0  ;;  %v7461_v23 = vpop.eup %7460  ;;  %v11809_v11 = vsub.f32 %v11658_v15, %v9851_v51  ;;  %5182 = vadd.xlane.f32.xlu1 %v5181_v0 }
 0x849   : > { %7480 = vpow2.f32 %v4838_v7  ;;  %v5788_v29 = vmul.f32 %v11810_v36, %v5660_v48  ;;  %v5534_v3 = vsub.f32 2.0, %v5406_v2  ;;  %v7463_v38 = vpop.eup %7462  ;;  %v11811_v19 = vsub.f32 %v11661_v63, %v9859_v26  ;;  %5917 = vst.msk [vmem:[%s9713_s25 + $0xa8] sm:$0xff] %vm414_vm0, %v5789_v13  ;;  %5179 = vadd.xlane.f32.xlu0 %v5178_v44  ;;  %v10314_v8 = vpop.xlane.xlu1 %5080 }
 0x84a   : > { %v4842_v28 = vmul.f32 1.442695, %v11809_v11  ;;  %7482 = vpow2.f32 %v4836_v46  ;;  %v5663_v55 = vmul.f32 %v7455_v33, %v5535_v47  ;;  %v5451_v62 = vmul.f32 %v7461_v23, %v10231_v41  ;;  %v10316_v51 = vpop.eup %7464  ;;  %v10322_v7 = vpop.xlane.xlu0 %5077  ;;  %v11812_v41 = vld [vmem:[#allocation39_spill] sm:$0xff] }
 0x84b   : > { %v4840_v50 = vmul.f32 1.442695, %v11811_v19  ;;  %5916 = vst.msk [vmem:[%s9713_s25 + $0xa0] sm:$0xff] %vm414_vm0, %v5788_v29  ;;  %v5662_v15 = vmul.f32 %v7457_v14, %v5534_v3  ;;  %v5450_v9 = vmul.f32 %v7463_v38, %v10238_v53  ;;  %7484 = vrcp.f32 %v10314_v8  ;;  %v10326_v63 = vpop.eup %7466  ;;  %v11818_v3 = vld [vmem:[#allocation41_spill] sm:$0xff] }
 0x84c   : > { %v5187_v26 = vsel %vm414_vm0, %v10272_v6, 0.0  ;;  %v5791_v33 = vmul.f32 %v11812_v41, %v5663_v55  ;;  %v5579_v40 = vsub.f32 2.0, %v5451_v62  ;;  %7486 = vrcp.f32 %v10322_v7  ;;  %v7469_v53 = vpop.eup %7468 }
 0x84d   : > { %v5184_v43 = vsel %vm414_vm0, %v10290_v24, 0.0  ;;  %7488 = vpow2.f32 %v4842_v28  ;;  %v11813_v37 = vsub.f32 %v11667_v49, %v9889_v12  ;;  %v5790_v46 = vmul.f32 %v11814_v5, %v5662_v15  ;;  %5188 = vadd.xlane.f32.xlu1 %v5187_v26  ;;  %v7471_v20 = vpop.eup %7470  ;;  %v10342_v13 = vpop.xlane.xlu1 %4960  ;;  %v11822_v5 = vld [vmem:[#allocation42_spill] sm:$0xff] }
 0x84e   : > { %v5578_v18 = vsub.f32 2.0, %v5450_v9  ;;  %7490 = vpow2.f32 %v4840_v50  ;;  %v11815_v48 = vsub.f32 %v11669_v57, %v9896_v54  ;;  %5919 = vst.msk [vmem:[%s9713_s25 + $0xb8] sm:$0xff] %vm414_vm0, %v5791_v33  ;;  %v5707_v0 = vmul.f32 %v7461_v23, %v5579_v40  ;;  %5185 = vadd.xlane.f32.xlu0 %v5184_v43  ;;  %v10344_v12 = vpop.eup %7472  ;;  %v10350_v44 = vpop.xlane.xlu0 %4957 }
 0x84f   : > { %v4846_v14 = vmul.f32 1.442695, %v11813_v37  ;;  %v5409_v25 = vmul.f32 %v7469_v53, %v10260_v45  ;;  %5918 = vst.msk [vmem:[%s9713_s25 + $0xb0] sm:$0xff] %vm414_vm0, %v5790_v46  ;;  %v5408_v47 = vmul.f32 %v7471_v20, %v10268_v34  ;;  %7492 = vrcp.f32 %v10342_v13  ;;  %v10354_v54 = vpop.eup %7474  ;;  %v11816_v45 = vld [vmem:[#allocation40_spill] sm:$0xff] }
 0x850   : > { %v4844_v2 = vmul.f32 1.442695, %v11815_v48  ;;  %v5706_v49 = vmul.f32 %v7463_v38, %v5578_v18  ;;  %v5193_v57 = vsel %vm414_vm0, %v10316_v51, 0.0  ;;  %v5835_v23 = vmul.f32 %v11816_v45, %v5707_v0  ;;  %v7477_v34 = vpop.eup %7476 }
 0x851   : > { %v5537_v11 = vsub.f32 2.0, %v5409_v25  ;;  %7494 = vrcp.f32 %v10350_v44  ;;  %v5190_v28 = vsel %vm414_vm0, %v10326_v63, 0.0  ;;  %v11817_v36 = vsub.f32 %v11677_v61, %v9915_v58  ;;  %5194 = vadd.xlane.f32.xlu1 %v5193_v57  ;;  %v10370_v26 = vpop.xlane.xlu1 %4966 }
 0x852   : > { %7496 = vpow2.f32 %v4846_v14  ;;  %v5834_v38 = vmul.f32 %v11818_v3, %v5706_v49  ;;  %v5536_v19 = vsub.f32 2.0, %v5408_v47  ;;  %v7479_v50 = vpop.eup %7478  ;;  %v11819_v55 = vsub.f32 %v11682_v60, %v9923_v59  ;;  %5963 = vst.msk [vmem:[%s9713_s25 + $0x218] sm:$0xff] %vm414_vm0, %v5835_v23  ;;  %5191 = vadd.xlane.f32.xlu0 %v5190_v28  ;;  %v10378_v33 = vpop.xlane.xlu0 %4963 }
 0x853   : > { %v4850_v29 = vmul.f32 1.442695, %v11817_v36  ;;  %7498 = vpow2.f32 %v4844_v2  ;;  %v5665_v15 = vmul.f32 %v7469_v53, %v5537_v11  ;;  %v5411_v9 = vmul.f32 %v7477_v34, %v10288_v31  ;;  %v10372_v61 = vpop.eup %7480  ;;  %v11820_v31 = vld [vmem:[#allocation68_spill] sm:$0xff] }
 0x854   : > { %v4848_v62 = vmul.f32 1.442695, %v11819_v55  ;;  %5962 = vst.msk [vmem:[%s9713_s25 + $0x210] sm:$0xff] %vm414_vm0, %v5834_v38  ;;  %v5664_v58 = vmul.f32 %v7471_v20, %v5536_v19  ;;  %v5410_v41 = vmul.f32 %v7479_v50, %v10296_v22  ;;  %7500 = vrcp.f32 %v10370_v26  ;;  %v10382_v60 = vpop.eup %7482  ;;  %v11826_v36 = vld [vmem:[#allocation124_spill] sm:$0xff]  ;;  %v11827_v19 = vld [vmem:[#allocation111_spill] sm:$0xff] }
 0x855   : > { %v5199_v59 = vsel %vm414_vm0, %v10344_v12, 0.0  ;;  %v5793_v40 = vmul.f32 %v11820_v31, %v5665_v15  ;;  %v5539_v43 = vsub.f32 2.0, %v5411_v9  ;;  %7502 = vrcp.f32 %v10378_v33  ;;  %v7485_v22 = vpop.eup %7484  ;;  %v10398_v49 = vpop.xlane.xlu1 %5086 }
 0x856   : > { %v5196_v53 = vsel %vm414_vm0, %v10354_v54, 0.0  ;;  %7504 = vpow2.f32 %v4850_v29  ;;  %v11821_v37 = vsub.f32 %v11690_v17, %v9953_v10  ;;  %v5792_v46 = vmul.f32 %v11822_v5, %v5664_v58  ;;  %5200 = vadd.xlane.f32.xlu1 %v5199_v59  ;;  %v7487_v20 = vpop.eup %7486  ;;  %v10406_v57 = vpop.xlane.xlu0 %5083 }
 0x857   : > { %v5538_v18 = vsub.f32 2.0, %v5410_v41  ;;  %7506 = vpow2.f32 %v4848_v62  ;;  %v11823_v48 = vsub.f32 %v11694_v16, %v9960_v30  ;;  %5921 = vst.msk [vmem:[%s9713_s25 + $0xc8] sm:$0xff] %vm414_vm0, %v5793_v40  ;;  %v5667_v0 = vmul.f32 %v7477_v34, %v5539_v43  ;;  %5197 = vadd.xlane.f32.xlu0 %v5196_v53  ;;  %v10400_v10 = vpop.eup %7488 }
 0x858   : > { %v4854_v14 = vmul.f32 1.442695, %v11821_v37  ;;  %v5453_v25 = vmul.f32 %v7485_v22, %v10314_v8  ;;  %5920 = vst.msk [vmem:[%s9713_s25 + $0xc0] sm:$0xff] %vm414_vm0, %v5792_v46  ;;  %v5452_v47 = vmul.f32 %v7487_v20, %v10322_v7  ;;  %7508 = vrcp.f32 %v10398_v49  ;;  %v10410_v30 = vpop.eup %7490  ;;  %v11824_v8 = vld [vmem:[#allocation70_spill] sm:$0xff]  ;;  %v11833_v46 = vld [vmem:[#allocation17_spill] sm:$0xff] }
 0x859   : > { %v4852_v2 = vmul.f32 1.442695, %v11823_v48  ;;  %v5666_v17 = vmul.f32 %v7479_v50, %v5538_v18  ;;  %v5205_v16 = vsel %vm414_vm0, %v10372_v61, 0.0  ;;  %v5795_v45 = vmul.f32 %v11824_v8, %v5667_v0  ;;  %v7493_v7 = vpop.eup %7492  ;;  %v11828_v50 = vld [vmem:[#allocation96_spill] sm:$0xff]  ;;  %v10426_v58 = vpop.xlane.xlu1 %4972  ;;  %v11831_v37 = vld [vmem:[#allocation102_spill] sm:$0xff]  ;;  %v11835_v0 = vld [vmem:[#allocation103_spill] sm:$0xff] }
 0x85a   : > { %v5581_v23 = vsub.f32 2.0, %v5453_v25  ;;  %7510 = vrcp.f32 %v10406_v57  ;;  %v5202_v11 = vsel %vm414_vm0, %v10382_v60, 0.0  ;;  %v11825_v28 = vsub.f32 %v11705_v52, %v9979_v32  ;;  %5206 = vadd.xlane.f32.xlu1 %v5205_v16  ;;  %v10434_v59 = vpop.xlane.xlu0 %4969 }
 0x85b   : > { %7512 = vpow2.f32 %v4854_v14  ;;  %v5794_v29 = vmul.f32 %v11826_v36, %v5666_v17  ;;  %v5580_v3 = vsub.f32 2.0, %v5452_v47  ;;  %v7495_v38 = vpop.eup %7494  ;;  %v11829_v55 = vsub.f32 %v11827_v19, %v11828_v50  ;;  %5923 = vst.msk [vmem:[%s9713_s25 + $0xd8] sm:$0xff] %vm414_vm0, %v5795_v45  ;;  %5203 = vadd.xlane.f32.xlu0 %v5202_v11 }
 0x85c   : > { %v4858_v34 = vmul.f32 1.442695, %v11825_v28  ;;  %7514 = vpow2.f32 %v4852_v2  ;;  %v5709_v15 = vmul.f32 %v7485_v22, %v5581_v23  ;;  %v5413_v9 = vmul.f32 %v7493_v7, %v10342_v13  ;;  %v10428_v52 = vpop.eup %7496  ;;  %v11830_v13 = vld [vmem:[#allocation71_spill] sm:$0xff]  ;;  %v11834_v2 = vld [vmem:[#allocation114_spill] sm:$0xff] }
 0x85d   : > { %v4856_v62 = vmul.f32 1.442695, %v11829_v55  ;;  %5922 = vst.msk [vmem:[%s9713_s25 + $0xd0] sm:$0xff] %vm414_vm0, %v5794_v29  ;;  %v5708_v32 = vmul.f32 %v7487_v20, %v5580_v3  ;;  %v5412_v41 = vmul.f32 %v7495_v38, %v10350_v44  ;;  %7516 = vrcp.f32 %v10426_v58  ;;  %v10438_v40 = vpop.eup %7498  ;;  %v10454_v8 = vpop.xlane.xlu1 %4978  ;;  %v11838_v3 = vld [vmem:[#allocation116_spill] sm:$0xff]  ;;  %v11841_v55 = vld [vmem:[#allocation51_spill] sm:$0xff] }
 0x85e   : > { %v5211_v31 = vsel %vm414_vm0, %v10400_v10, 0.0  ;;  %v5837_v43 = vmul.f32 %v11830_v13, %v5709_v15  ;;  %v5541_v53 = vsub.f32 2.0, %v5413_v9  ;;  %7518 = vrcp.f32 %v10434_v59  ;;  %v7501_v44 = vpop.eup %7500  ;;  %v10462_v11 = vpop.xlane.xlu0 %4975 }
 0x85f   : > { %v5208_v22 = vsel %vm414_vm0, %v10410_v30, 0.0  ;;  %7520 = vpow2.f32 %v4858_v34  ;;  %v11832_v14 = vsub.f32 %v11720_v1, %v11831_v37  ;;  %v5836_v18 = vmul.f32 %v11833_v46, %v5708_v32  ;;  %5212 = vadd.xlane.f32.xlu1 %v5211_v31  ;;  %v7503_v48 = vpop.eup %7502  ;;  %v11842_v32 = vld [vmem:[#allocation117_spill] sm:$0xff] }
 0x860   : > { %v5540_v20 = vsub.f32 2.0, %v5412_v41  ;;  %7522 = vpow2.f32 %v4856_v62  ;;  %v11836_v25 = vsub.f32 %v11834_v2, %v11835_v0  ;;  %5965 = vst.msk [vmem:[%s9713_s25 + $0x228] sm:$0xff] %vm414_vm0, %v5837_v43  ;;  %v5669_v47 = vmul.f32 %v7493_v7, %v5541_v53  ;;  %5209 = vadd.xlane.f32.xlu0 %v5208_v22  ;;  %v10456_v1 = vpop.eup %7504  ;;  %v11843_v41 = vld [vmem:[#allocation104_spill] sm:$0xff]  ;;  %v11846_v0 = vld [vmem:[#allocation66_spill] sm:$0xff] }
 0x861   : > { %v4862_v5 = vmul.f32 1.442695, %v11832_v14  ;;  %v5415_v16 = vmul.f32 %v7501_v44, %v10370_v26  ;;  %5964 = vst.msk [vmem:[%s9713_s25 + $0x220] sm:$0xff] %vm414_vm0, %v5836_v18  ;;  %v5414_v23 = vmul.f32 %v7503_v48, %v10378_v33  ;;  %7524 = vrcp.f32 %v10454_v8  ;;  %v10466_v28 = vpop.eup %7506  ;;  %v11837_v26 = vld [vmem:[#allocation18_spill] sm:$0xff]  ;;  %v10482_v22 = vpop.xlane.xlu1 %5092 }
 0x862   : > { %v4860_v17 = vmul.f32 1.442695, %v11836_v25  ;;  %v5668_v45 = vmul.f32 %v7495_v38, %v5540_v20  ;;  %v5217_v7 = vsel %vm414_vm0, %v10428_v52, 0.0  ;;  %v5797_v34 = vmul.f32 %v11837_v26, %v5669_v47  ;;  %v7509_v33 = vpop.eup %7508  ;;  %v11839_v38 = vld [vmem:[#allocation129_spill] sm:$0xff]  ;;  %v10490_v46 = vpop.xlane.xlu0 %5089  ;;  %v11848_v47 = vld [vmem:[#allocation127_spill] sm:$0xff]  ;;  %v11850_v26 = vld [vmem:[#allocation108_spill] sm:$0xff] }
 0x863   : > { %v5543_v36 = vsub.f32 2.0, %v5415_v16  ;;  %7526 = vrcp.f32 %v10462_v11  ;;  %v5214_v29 = vsel %vm414_vm0, %v10438_v40, 0.0  ;;  %v11840_v19 = vsub.f32 %v11838_v3, %v11839_v38  ;;  %5218 = vadd.xlane.f32.xlu1 %v5217_v7  ;;  %v11849_v7 = vld [vmem:[#allocation119_spill] sm:$0xff] }
 0x864   : > { %7528 = vpow2.f32 %v4862_v5  ;;  %v5796_v62 = vmul.f32 %v11841_v55, %v5668_v45  ;;  %v5542_v15 = vsub.f32 2.0, %v5414_v23  ;;  %v7511_v9 = vpop.eup %7510  ;;  %v11844_v31 = vsub.f32 %v11842_v32, %v11843_v41  ;;  %5925 = vst.msk [vmem:[%s9713_s25 + $0xe8] sm:$0xff] %vm414_vm0, %v5797_v34  ;;  %5215 = vadd.xlane.f32.xlu0 %v5214_v29 }
 0x865   : > { %v4866_v50 = vmul.f32 1.442695, %v11840_v19  ;;  %7530 = vpow2.f32 %v4860_v17  ;;  %v5671_v43 = vmul.f32 %v7501_v44, %v5543_v36  ;;  %v5455_v53 = vmul.f32 %v7509_v33, %v10398_v49  ;;  %v10484_v37 = vpop.eup %7512  ;;  %v11845_v49 = vld [vmem:[#allocation53_spill] sm:$0xff]  ;;  %v10510_v38 = vpop.xlane.xlu1 %4984 }
 0x866   : > { %v4864_v13 = vmul.f32 1.442695, %v11844_v31  ;;  %5924 = vst.msk [vmem:[%s9713_s25 + $0xe0] sm:$0xff] %vm414_vm0, %v5796_v62  ;;  %v5670_v14 = vmul.f32 %v7503_v48, %v5542_v15  ;;  %v5454_v5 = vmul.f32 %v7511_v9, %v10406_v57  ;;  %7532 = vrcp.f32 %v10482_v22  ;;  %v10494_v18 = vpop.eup %7514  ;;  %v10518_v55 = vpop.xlane.xlu0 %4981 }
 0x867   : > { %v5223_v44 = vsel %vm414_vm0, %v10456_v1, 0.0  ;;  %v5799_v20 = vmul.f32 %v11845_v49, %v5671_v43  ;;  %v5583_v2 = vsub.f32 2.0, %v5455_v53  ;;  %7534 = vrcp.f32 %v10490_v46  ;;  %v7517_v57 = vpop.eup %7516 }
 0x868   : > { %v5220_v48 = vsel %vm414_vm0, %v10466_v28, 0.0  ;;  %7536 = vpow2.f32 %v4866_v50  ;;  %v11847_v25 = vsub.f32 %v11760_v27, %v11846_v0  ;;  %v5798_v16 = vmul.f32 %v11848_v47, %v5670_v14  ;;  %5224 = vadd.xlane.f32.xlu1 %v5223_v44  ;;  %v7519_v23 = vpop.eup %7518  ;;  %v11855_v47 = vld [vmem:[#allocation21_spill] sm:$0xff] }
 0x869   : > { %v5582_v45 = vsub.f32 2.0, %v5454_v5  ;;  %7538 = vpow2.f32 %v4864_v13  ;;  %v11851_v34 = vsub.f32 %v11849_v7, %v11850_v26  ;;  %5927 = vst.msk [vmem:[%s9713_s25 + $0xf8] sm:$0xff] %vm414_vm0, %v5799_v20  ;;  %v5711_v29 = vmul.f32 %v7509_v33, %v5583_v2  ;;  %5221 = vadd.xlane.f32.xlu0 %v5220_v48  ;;  %v10512_v27 = vpop.eup %7520  ;;  %v11852_v33 = vld [vmem:[#allocation128_spill] sm:$0xff]  ;;  %v10532_v5 = vpop.xlane.xlu1 %4990 }
 0x86a   : > { %v4870_v17 = vmul.f32 1.442695, %v11847_v25  ;;  %v5417_v3 = vmul.f32 %v7517_v57, %v10426_v58  ;;  %5926 = vst.msk [vmem:[%s9713_s25 + $0xf0] sm:$0xff] %vm414_vm0, %v5798_v16  ;;  %v5416_v50 = vmul.f32 %v7519_v23, %v10434_v59  ;;  %7540 = vrcp.f32 %v10510_v38  ;;  %v10520_v62 = vpop.eup %7522  ;;  %v10540_v2 = vpop.xlane.xlu0 %4987 }
 0x86b   : > { %v4868_v36 = vmul.f32 1.442695, %v11851_v34  ;;  %v5710_v19 = vmul.f32 %v7511_v9, %v5582_v45  ;;  %v5839_v15 = vmul.f32 %v11852_v33, %v5711_v29  ;;  %7542 = vrcp.f32 %v10518_v55  ;;  %v7525_v41 = vpop.eup %7524  ;;  %v11853_v9 = vld [vmem:[#allocation49_spill] sm:$0xff]  ;;  %v11856_v33 = vld [vmem:[#allocation52_spill] sm:$0xff] }
 0x86c   : > { %v5545_v58 = vsub.f32 2.0, %v5417_v3  ;;  %v5229_v32 = vsel %vm414_vm0, %v10484_v37, 0.0  ;;  %7544 = vpow2.f32 %v4870_v17  ;;  %v5544_v31 = vsub.f32 2.0, %v5416_v50 }
 0x86d   : > { %v5838_v59 = vmul.f32 %v11853_v9, %v5710_v19  ;;  %5230 = vadd.xlane.f32.xlu1 %v5229_v32  ;;  %v5226_v13 = vsel %vm414_vm0, %v10494_v18, 0.0  ;;  %v7527_v43 = vpop.eup %7526  ;;  %7546 = vpow2.f32 %v4868_v36  ;;  %5967 = vst.msk [vmem:[%s9713_s25 + $0x238] sm:$0xff] %vm414_vm0, %v5839_v15  ;;  %v5419_v14 = vmul.f32 %v7525_v41, %v10454_v8  ;;  %v5099_v34 = vpop.xlane.xlu1 %5098 }
 0x86e   : > { %v5673_v53 = vmul.f32 %v7517_v57, %v5545_v58  ;;  %5227 = vadd.xlane.f32.xlu0 %v5226_v13  ;;  %v10534_v44 = vpop.eup %7528  ;;  %v5672_v49 = vmul.f32 %v7519_v23, %v5544_v31  ;;  %v5418_v20 = vmul.f32 %v7527_v43, %v10462_v11  ;;  %7548 = vrcp.f32 %v10532_v5  ;;  %v11854_v57 = vld [vmem:[#allocation23_spill] sm:$0xff]  ;;  %v5096_v19 = vpop.xlane.xlu0 %5095 }
 0x86f   : > { %5966 = vst.msk [vmem:[%s9713_s25 + $0x230] sm:$0xff] %vm414_vm0, %v5838_v59  ;;  %v10542_v48 = vpop.eup %7530  ;;  %v5547_v8 = vsub.f32 2.0, %v5419_v14  ;;  %7550 = vrcp.f32 %v10540_v2  ;;  %v5235_v25 = vsel %vm414_vm0, %v10512_v27, 0.0  ;;  %v5232_v11 = vsel %vm414_vm0, %v10520_v62, 0.0 }
 0x870   : > { %v5801_v0 = vmul.f32 %v11854_v57, %v5673_v53  ;;  %v7533_v17 = vpop.eup %7532  ;;  %v5800_v16 = vmul.f32 %v11855_v47, %v5672_v49  ;;  %v5546_v45 = vsub.f32 2.0, %v5418_v20  ;;  %7552 = vrcp.f32 %v5099_v34 }
 0x871   : > { %5236 = vadd.xlane.f32.xlu1 %v5235_v25  ;;  %v7535_v23 = vpop.eup %7534  ;;  %v5675_v7 = vmul.f32 %v7525_v41, %v5547_v8  ;;  %v5457_v26 = vmul.f32 %v7533_v17, %v10482_v22  ;;  %7554 = vrcp.f32 %v5096_v19  ;;  %v5241_v22 = vsel %vm414_vm0, %v10534_v44, 0.0  ;;  %v11857_v41 = vld [vmem:[#allocation56_spill] sm:$0xff]  ;;  %v4997_v53 = vpop.xlane.xlu1 %4996  ;;  %v11858_v8 = vld [vmem:[#allocation131_spill] sm:$0xff] }
 0x872   : > { %5929 = vst.msk [vmem:[%s9713_s25 + $0x108] sm:$0xff] %vm414_vm0, %v5801_v0  ;;  %5233 = vadd.xlane.f32.xlu0 %v5232_v11  ;;  %v10554_v36 = vpop.eup %7536  ;;  %5928 = vst.msk [vmem:[%s9713_s25 + $0x100] sm:$0xff] %vm414_vm0, %v5800_v16  ;;  %v5674_v29 = vmul.f32 %v7527_v43, %v5546_v45  ;;  %v5456_v3 = vmul.f32 %v7535_v23, %v10490_v46  ;;  %v5238_v46 = vsel %vm414_vm0, %v10542_v48, 0.0  ;;  %7556 = vrcp.f32 %v4997_v53  ;;  %v4994_v57 = vpop.xlane.xlu0 %4993  ;;  %v11859_v16 = vld [vmem:[#allocation24_spill] sm:$0xff] }
 0x873   : > { %v10559_v50 = vpop.eup %7538  ;;  %v5803_v15 = vmul.f32 %v11856_v33, %v5675_v7  ;;  %v5585_v58 = vsub.f32 2.0, %v5457_v26  ;;  %7558 = vrcp.f32 %v4994_v57 }
 0x874   : > { %v7541_v32 = vpop.eup %7540  ;;  %v5802_v9 = vmul.f32 %v11857_v41, %v5674_v29  ;;  %v5584_v59 = vsub.f32 2.0, %v5456_v3 }
 0x875   : > { %5242 = vadd.xlane.f32.xlu1 %v5241_v22  ;;  %v7543_v31 = vpop.eup %7542  ;;  %5931 = vst.msk [vmem:[%s9713_s25 + $0x118] sm:$0xff] %vm414_vm0, %v5803_v15  ;;  %v5713_v13 = vmul.f32 %v7533_v17, %v5585_v58  ;;  %v5421_v43 = vmul.f32 %v7541_v32, %v10510_v38  ;;  %v5247_v38 = vsel %vm414_vm0, %v10554_v36, 0.0  ;;  %v5003_v29 = vpop.xlane.xlu1 %5002  ;;  %v11860_v58 = vld [vmem:[#allocation27_spill] sm:$0xff] }
 0x876   : > { %5239 = vadd.xlane.f32.xlu0 %v5238_v46  ;;  %v10570_v14 = vpop.eup %7544  ;;  %5930 = vst.msk [vmem:[%s9713_s25 + $0x110] sm:$0xff] %vm414_vm0, %v5802_v9  ;;  %v5712_v49 = vmul.f32 %v7535_v23, %v5584_v59  ;;  %v5420_v20 = vmul.f32 %v7543_v31, %v10518_v55  ;;  %v5244_v55 = vsel %vm414_vm0, %v10559_v50, 0.0  ;;  %7560 = vrcp.f32 %v5003_v29  ;;  %v5000_v15 = vpop.xlane.xlu0 %4999 }
 0x877   : > { %v10575_v0 = vpop.eup %7546  ;;  %v5841_v25 = vmul.f32 %v11858_v8, %v5713_v13  ;;  %v5549_v17 = vsub.f32 2.0, %v5421_v43  ;;  %7562 = vrcp.f32 %v5000_v15 }
 0x878   : > { %v7549_v47 = vpop.eup %7548  ;;  %v5840_v45 = vmul.f32 %v11859_v16, %v5712_v49  ;;  %v5548_v11 = vsub.f32 2.0, %v5420_v20 }
 0x879   : > { %5248 = vadd.xlane.f32.xlu1 %v5247_v38  ;;  %v7551_v23 = vpop.eup %7550  ;;  %5969 = vst.msk [vmem:[%s9713_s25 + $0x248] sm:$0xff] %vm414_vm0, %v5841_v25  ;;  %v5677_v7 = vmul.f32 %v7541_v32, %v5549_v17  ;;  %v5423_v26 = vmul.f32 %v7549_v47, %v10532_v5  ;;  %v5253_v32 = vsel %vm414_vm0, %v10570_v14, 0.0  ;;  %v11861_v5 = vld [vmem:[#allocation93_spill] sm:$0xff]  ;;  %v5105_v49 = vpop.xlane.xlu1 %5104 }
 0x87a   : > { %5245 = vadd.xlane.f32.xlu0 %v5244_v55  ;;  %5968 = vst.msk [vmem:[%s9713_s25 + $0x240] sm:$0xff] %vm414_vm0, %v5840_v45  ;;  %v5676_v3 = vmul.f32 %v7543_v31, %v5548_v11  ;;  %v5422_v33 = vmul.f32 %v7551_v23, %v10540_v2  ;;  %v7553_v9 = vpop.eup %7552  ;;  %v5250_v31 = vsel %vm414_vm0, %v10575_v0, 0.0  ;;  %7564 = vrcp.f32 %v5105_v49  ;;  %v5102_v25 = vpop.xlane.xlu0 %5101  ;;  %v11862_v17 = vld [vmem:[#allocation25_spill] sm:$0xff]  ;;  %v11863_v11 = vld [vmem:[#allocation28_spill] sm:$0xff] }
 0x87b   : > { %v5805_v22 = vmul.f32 %v11860_v58, %v5677_v7  ;;  %v5551_v41 = vsub.f32 2.0, %v5423_v26  ;;  %v7555_v13 = vpop.eup %7554  ;;  %v5459_v43 = vmul.f32 %v7553_v9, %v5099_v34  ;;  %7566 = vrcp.f32 %v5102_v25  ;;  %v11864_v58 = vld [vmem:[#allocation26_spill] sm:$0xff] }
 0x87c   : > { %v5804_v59 = vmul.f32 %v11861_v5, %v5676_v3  ;;  %v5550_v46 = vsub.f32 2.0, %v5422_v33  ;;  %v5458_v8 = vmul.f32 %v7555_v13, %v5096_v19  ;;  %v7557_v45 = vpop.eup %7556  ;;  %v11865_v5 = vld [vmem:[#allocation57_spill] sm:$0xff] }
 0x87d   : > { %5254 = vadd.xlane.f32.xlu1 %v5253_v32  ;;  %5933 = vst.msk [vmem:[%s9713_s25 + $0x128] sm:$0xff] %vm414_vm0, %v5805_v22  ;;  %v5679_v2 = vmul.f32 %v7549_v47, %v5551_v41  ;;  %v5587_v16 = vsub.f32 2.0, %v5459_v43  ;;  %v7559_v47 = vpop.eup %7558  ;;  %v5425_v26 = vmul.f32 %v7557_v45, %v4997_v53  ;;  %v5009_v3 = vpop.xlane.xlu1 %5008 }
 0x87e   : > { %5251 = vadd.xlane.f32.xlu0 %v5250_v31  ;;  %5932 = vst.msk [vmem:[%s9713_s25 + $0x120] sm:$0xff] %vm414_vm0, %v5804_v59  ;;  %v5678_v20 = vmul.f32 %v7551_v23, %v5550_v46  ;;  %v5586_v7 = vsub.f32 2.0, %v5458_v8  ;;  %v5424_v23 = vmul.f32 %v7559_v47, %v4994_v57  ;;  %7568 = vrcp.f32 %v5009_v3  ;;  %v5006_v33 = vpop.xlane.xlu0 %5005 }
 0x87f   : > { %v5807_v38 = vmul.f32 %v11862_v17, %v5679_v2  ;;  %v5715_v34 = vmul.f32 %v7553_v9, %v5587_v16  ;;  %v5553_v41 = vsub.f32 2.0, %v5425_v26  ;;  %7570 = vrcp.f32 %v5006_v33  ;;  %v11867_v16 = vld [vmem:[#allocation29_spill] sm:$0xff] }
 0x880   : > { %v5806_v55 = vmul.f32 %v11863_v11, %v5678_v20  ;;  %v5714_v19 = vmul.f32 %v7555_v13, %v5586_v7  ;;  %v7561_v32 = vpop.eup %7560  ;;  %v5552_v46 = vsub.f32 2.0, %v5424_v23  ;;  %v11866_v20 = vld [vmem:[#allocation59_spill] sm:$0xff] }
 0x881   : > { %5935 = vst.msk [vmem:[%s9713_s25 + $0x138] sm:$0xff] %vm414_vm0, %v5807_v38  ;;  %v5843_v22 = vmul.f32 %v11864_v58, %v5715_v34  ;;  %v7563_v31 = vpop.eup %7562  ;;  %v5681_v53 = vmul.f32 %v7557_v45, %v5553_v41  ;;  %v5427_v9 = vmul.f32 %v7561_v32, %v5003_v29  ;;  %v5015_v2 = vpop.xlane.xlu1 %5014  ;;  %v11869_v41 = vld [vmem:[#allocation32_spill] sm:$0xff] }
 0x882   : > { %5934 = vst.msk [vmem:[%s9713_s25 + $0x130] sm:$0xff] %vm414_vm0, %v5806_v55  ;;  %v5842_v59 = vmul.f32 %v11865_v5, %v5714_v19  ;;  %v5680_v57 = vmul.f32 %v7559_v47, %v5552_v46  ;;  %v5426_v13 = vmul.f32 %v7563_v31, %v5000_v15  ;;  %7572 = vrcp.f32 %v5015_v2  ;;  %v5012_v43 = vpop.xlane.xlu0 %5011  ;;  %v11868_v19 = vld [vmem:[#allocation30_spill] sm:$0xff] }
 0x883   : > { %5971 = vst.msk [vmem:[%s9713_s25 + $0x258] sm:$0xff] %vm414_vm0, %v5843_v22  ;;  %v5809_v8 = vmul.f32 %v11866_v20, %v5681_v53  ;;  %v5555_v17 = vsub.f32 2.0, %v5427_v9  ;;  %7574 = vrcp.f32 %v5012_v43 }
 0x884   : > { %5970 = vst.msk [vmem:[%s9713_s25 + $0x250] sm:$0xff] %vm414_vm0, %v5842_v59  ;;  %v7565_v38 = vpop.eup %7564  ;;  %v5808_v11 = vmul.f32 %v11867_v16, %v5680_v57  ;;  %v5554_v55 = vsub.f32 2.0, %v5426_v13  ;;  %v11870_v57 = vld [vmem:[#allocation60_spill] sm:$0xff] }
 0x885   : > { %v7567_v7 = vpop.eup %7566  ;;  %5937 = vst.msk [vmem:[%s9713_s25 + $0x148] sm:$0xff] %vm414_vm0, %v5809_v8  ;;  %v5683_v29 = vmul.f32 %v7561_v32, %v5555_v17  ;;  %v5461_v45 = vmul.f32 %v7565_v38, %v5105_v49  ;;  %v5111_v34 = vpop.xlane.xlu1 %5110  ;;  %v11871_v17 = vld [vmem:[#allocation85_spill] sm:$0xff] }
 0x886   : > { %5936 = vst.msk [vmem:[%s9713_s25 + $0x140] sm:$0xff] %vm414_vm0, %v5808_v11  ;;  %v5682_v15 = vmul.f32 %v7563_v31, %v5554_v55  ;;  %v5460_v47 = vmul.f32 %v7567_v7, %v5102_v25  ;;  %7576 = vrcp.f32 %v5111_v34  ;;  %v5108_v26 = vpop.xlane.xlu0 %5107 }
 0x887   : > { %v5811_v23 = vmul.f32 %v11868_v19, %v5683_v29  ;;  %v5589_v58 = vsub.f32 2.0, %v5461_v45  ;;  %7578 = vrcp.f32 %v5108_v26 }
 0x888   : > { %v7569_v22 = vpop.eup %7568  ;;  %v5810_v5 = vmul.f32 %v11869_v41, %v5682_v15  ;;  %v5588_v59 = vsub.f32 2.0, %v5460_v47  ;;  %v11872_v15 = vld [vmem:[#allocation100_spill] sm:$0xff] }
 0x889   : > { %v7571_v46 = vpop.eup %7570  ;;  %5939 = vst.msk [vmem:[%s9713_s25 + $0x158] sm:$0xff] %vm414_vm0, %v5811_v23  ;;  %v5717_v49 = vmul.f32 %v7565_v38, %v5589_v58  ;;  %v5429_v32 = vmul.f32 %v7569_v22, %v5009_v3  ;;  %v5021_v53 = vpop.xlane.xlu1 %5020  ;;  %v11873_v58 = vld [vmem:[#allocation34_spill] sm:$0xff] }
 0x88a   : > { %5938 = vst.msk [vmem:[%s9713_s25 + $0x150] sm:$0xff] %vm414_vm0, %v5810_v5  ;;  %v5716_v25 = vmul.f32 %v7567_v7, %v5588_v59  ;;  %v5428_v31 = vmul.f32 %v7571_v46, %v5006_v33  ;;  %7580 = vrcp.f32 %v5021_v53  ;;  %v5018_v9 = vpop.xlane.xlu0 %5017 }
 0x88b   : > { %v5845_v13 = vmul.f32 %v11870_v57, %v5717_v49  ;;  %v5557_v20 = vsub.f32 2.0, %v5429_v32  ;;  %7582 = vrcp.f32 %v5018_v9 }
 0x88c   : > { %v7573_v8 = vpop.eup %7572  ;;  %v5844_v16 = vmul.f32 %v11871_v17, %v5716_v25  ;;  %v5556_v11 = vsub.f32 2.0, %v5428_v31  ;;  %v11874_v25 = vld [vmem:[#allocation10_spill] sm:$0xff] }
 0x88d   : > { %v7575_v55 = vpop.eup %7574  ;;  %5973 = vst.msk [vmem:[%s9713_s25 + $0x268] sm:$0xff] %vm414_vm0, %v5845_v13  ;;  %v5685_v3 = vmul.f32 %v7569_v22, %v5557_v20  ;;  %v5431_v38 = vmul.f32 %v7573_v8, %v5015_v2  ;;  %v5117_v29 = vpop.xlane.xlu1 %5116  ;;  %v11875_v20 = vld [vmem:[#allocation120_spill] sm:$0xff] }
 0x88e   : > { %5972 = vst.msk [vmem:[%s9713_s25 + $0x260] sm:$0xff] %vm414_vm0, %v5844_v16  ;;  %v5684_v33 = vmul.f32 %v7571_v46, %v5556_v11  ;;  %v5430_v7 = vmul.f32 %v7575_v55, %v5012_v43  ;;  %7584 = vrcp.f32 %v5117_v29  ;;  %v5114_v45 = vpop.xlane.xlu0 %5113 }
 0x88f   : > { %v5813_v47 = vmul.f32 %v11872_v15, %v5685_v3  ;;  %v5559_v19 = vsub.f32 2.0, %v5431_v38  ;;  %7586 = vrcp.f32 %v5114_v45 }
 0x890   : > { %v7577_v23 = vpop.eup %7576  ;;  %v5812_v41 = vmul.f32 %v11873_v58, %v5684_v33  ;;  %v5558_v5 = vsub.f32 2.0, %v5430_v7  ;;  %v11876_v33 = vld [vmem:[#allocation35_spill] sm:$0xff] }
 0x891   : > { %v7579_v59 = vpop.eup %7578  ;;  %5941 = vst.msk [vmem:[%s9713_s25 + $0x168] sm:$0xff] %vm414_vm0, %v5813_v47  ;;  %v5687_v2 = vmul.f32 %v7573_v8, %v5559_v19  ;;  %v5463_v22 = vmul.f32 %v7577_v23, %v5111_v34  ;;  %v5027_v49 = vpop.xlane.xlu1 %5026  ;;  %v11877_v19 = vld [vmem:[#allocation101_spill] sm:$0xff] }
 0x892   : > { %5940 = vst.msk [vmem:[%s9713_s25 + $0x160] sm:$0xff] %vm414_vm0, %v5812_v41  ;;  %v5686_v43 = vmul.f32 %v7575_v55, %v5558_v5  ;;  %v5462_v46 = vmul.f32 %v7579_v59, %v5108_v26  ;;  %7588 = vrcp.f32 %v5027_v49  ;;  %v5024_v32 = vpop.xlane.xlu0 %5023 }
 0x893   : > { %v5815_v31 = vmul.f32 %v11874_v25, %v5687_v2  ;;  %v5591_v57 = vsub.f32 2.0, %v5463_v22  ;;  %7590 = vrcp.f32 %v5024_v32 }
 0x894   : > { %v7581_v13 = vpop.eup %7580  ;;  %v5814_v17 = vmul.f32 %v11875_v20, %v5686_v43  ;;  %v5590_v16 = vsub.f32 2.0, %v5462_v46  ;;  %v11878_v43 = vld [vmem:[#allocation121_spill] sm:$0xff] }
 0x895   : > { %v7583_v11 = vpop.eup %7582  ;;  %5943 = vst.msk [vmem:[%s9713_s25 + $0x178] sm:$0xff] %vm414_vm0, %v5815_v31  ;;  %v5719_v34 = vmul.f32 %v7577_v23, %v5591_v57  ;;  %v5433_v8 = vmul.f32 %v7581_v13, %v5021_v53  ;;  %v5123_v3 = vpop.xlane.xlu1 %5122  ;;  %v11879_v57 = vld [vmem:[#allocation87_spill] sm:$0xff] }
 0x896   : > { %5942 = vst.msk [vmem:[%s9713_s25 + $0x170] sm:$0xff] %vm414_vm0, %v5814_v17  ;;  %v5718_v26 = vmul.f32 %v7579_v59, %v5590_v16  ;;  %v5432_v55 = vmul.f32 %v7583_v11, %v5018_v9  ;;  %7592 = vrcp.f32 %v5123_v3  ;;  %v5120_v38 = vpop.xlane.xlu0 %5119 }
 0x897   : > { %v5847_v7 = vmul.f32 %v11876_v33, %v5719_v34  ;;  %v5561_v15 = vsub.f32 2.0, %v5433_v8  ;;  %7594 = vrcp.f32 %v5120_v38 }
 0x898   : > { %v7585_v47 = vpop.eup %7584  ;;  %v5846_v58 = vmul.f32 %v11877_v19, %v5718_v26  ;;  %v5560_v41 = vsub.f32 2.0, %v5432_v55  ;;  %v11880_v26 = vld [vmem:[#allocation133_spill] sm:$0xff] }
 0x899   : > { %v7587_v5 = vpop.eup %7586  ;;  %5975 = vst.msk [vmem:[%s9713_s25 + $0x278] sm:$0xff] %vm414_vm0, %v5847_v7  ;;  %v5689_v53 = vmul.f32 %v7581_v13, %v5561_v15  ;;  %v5465_v23 = vmul.f32 %v7585_v47, %v5117_v29  ;;  %v5033_v2 = vpop.xlane.xlu1 %5032  ;;  %v11881_v15 = vld [vmem:[#allocation88_spill] sm:$0xff] }
 0x89a   : > { %5974 = vst.msk [vmem:[%s9713_s25 + $0x270] sm:$0xff] %vm414_vm0, %v5846_v58  ;;  %v5688_v9 = vmul.f32 %v7583_v11, %v5560_v41  ;;  %v5464_v59 = vmul.f32 %v7587_v5, %v5114_v45  ;;  %7596 = vrcp.f32 %v5033_v2  ;;  %v5030_v22 = vpop.xlane.xlu0 %5029 }
 0x89b   : > { %v5817_v46 = vmul.f32 %v11878_v43, %v5689_v53  ;;  %v5593_v25 = vsub.f32 2.0, %v5465_v23  ;;  %7598 = vrcp.f32 %v5030_v22 }
 0x89c   : > { %v7589_v31 = vpop.eup %7588  ;;  %v5816_v20 = vmul.f32 %v11879_v57, %v5688_v9  ;;  %v5592_v17 = vsub.f32 2.0, %v5464_v59  ;;  %v11882_v9 = vld [vmem:[#allocation62_spill] sm:$0xff] }
 0x89d   : > { %v7591_v16 = vpop.eup %7590  ;;  %5945 = vst.msk [vmem:[%s9713_s25 + $0x188] sm:$0xff] %vm414_vm0, %v5817_v46  ;;  %v5721_v29 = vmul.f32 %v7585_v47, %v5593_v25  ;;  %v5435_v13 = vmul.f32 %v7589_v31, %v5027_v49  ;;  %v5129_v34 = vpop.xlane.xlu1 %5128  ;;  %v11883_v25 = vld [vmem:[#allocation105_spill] sm:$0xff] }
 0x89e   : > { %5944 = vst.msk [vmem:[%s9713_s25 + $0x180] sm:$0xff] %vm414_vm0, %v5816_v20  ;;  %v5720_v45 = vmul.f32 %v7587_v5, %v5592_v17  ;;  %v5434_v11 = vmul.f32 %v7591_v16, %v5024_v32  ;;  %7600 = vrcp.f32 %v5129_v34  ;;  %v5126_v8 = vpop.xlane.xlu0 %5125 }
 0x89f   : > { %v5849_v55 = vmul.f32 %v11880_v26, %v5721_v29  ;;  %v5563_v33 = vsub.f32 2.0, %v5435_v13  ;;  %7602 = vrcp.f32 %v5126_v8 }
 0x8a0   : > { %v7593_v7 = vpop.eup %7592  ;;  %v5848_v19 = vmul.f32 %v11881_v15, %v5720_v45  ;;  %v5562_v58 = vsub.f32 2.0, %v5434_v11  ;;  %v11884_v45 = vld [vmem:[#allocation89_spill] sm:$0xff] }
 0x8a1   : > { %v7595_v41 = vpop.eup %7594  ;;  %5977 = vst.msk [vmem:[%s9713_s25 + $0x288] sm:$0xff] %vm414_vm0, %v5849_v55  ;;  %v5691_v49 = vmul.f32 %v7589_v31, %v5563_v33  ;;  %v5467_v47 = vmul.f32 %v7593_v7, %v5123_v3  ;;  %v5039_v53 = vpop.xlane.xlu1 %5038  ;;  %v11885_v33 = vld [vmem:[#allocation90_spill] sm:$0xff] }
 0x8a2   : > { %5976 = vst.msk [vmem:[%s9713_s25 + $0x280] sm:$0xff] %vm414_vm0, %v5848_v19  ;;  %v5690_v32 = vmul.f32 %v7591_v16, %v5562_v58  ;;  %v5466_v5 = vmul.f32 %v7595_v41, %v5120_v38  ;;  %7604 = vrcp.f32 %v5039_v53  ;;  %v5036_v23 = vpop.xlane.xlu0 %5035 }
 0x8a3   : > { %v5819_v59 = vmul.f32 %v11882_v9, %v5691_v49  ;;  %v5595_v43 = vsub.f32 2.0, %v5467_v47  ;;  %7606 = vrcp.f32 %v5036_v23 }
 0x8a4   : > { %v7597_v46 = vpop.eup %7596  ;;  %v5818_v57 = vmul.f32 %v11883_v25, %v5690_v32  ;;  %v5594_v20 = vsub.f32 2.0, %v5466_v5  ;;  %v11886_v32 = vld [vmem:[#allocation122_spill] sm:$0xff] }
 0x8a5   : > { %v7599_v17 = vpop.eup %7598  ;;  %5947 = vst.msk [vmem:[%s9713_s25 + $0x198] sm:$0xff] %vm414_vm0, %v5819_v59  ;;  %v5723_v3 = vmul.f32 %v7593_v7, %v5595_v43  ;;  %v5437_v31 = vmul.f32 %v7597_v46, %v5033_v2  ;;  %v5135_v29 = vpop.xlane.xlu1 %5134  ;;  %v11887_v43 = vld [vmem:[#allocation12_spill] sm:$0xff] }
 0x8a6   : > { %5946 = vst.msk [vmem:[%s9713_s25 + $0x190] sm:$0xff] %vm414_vm0, %v5818_v57  ;;  %v5722_v38 = vmul.f32 %v7595_v41, %v5594_v20  ;;  %v5436_v16 = vmul.f32 %v7599_v17, %v5030_v22  ;;  %7608 = vrcp.f32 %v5135_v29  ;;  %v5132_v13 = vpop.xlane.xlu0 %5131 }
 0x8a7   : > { %v5851_v11 = vmul.f32 %v11884_v45, %v5723_v3  ;;  %v5565_v26 = vsub.f32 2.0, %v5437_v31  ;;  %7610 = vrcp.f32 %v5132_v13 }
 0x8a8   : > { %v7601_v55 = vpop.eup %7600  ;;  %v5850_v15 = vmul.f32 %v11885_v33, %v5722_v38  ;;  %v5564_v19 = vsub.f32 2.0, %v5436_v16  ;;  %v11888_v38 = vld [vmem:[#allocation123_spill] sm:$0xff] }
 0x8a9   : > { %v7603_v58 = vpop.eup %7602  ;;  %5979 = vst.msk [vmem:[%s9713_s25 + $0x298] sm:$0xff] %vm414_vm0, %v5851_v11  ;;  %v5693_v2 = vmul.f32 %v7597_v46, %v5565_v26  ;;  %v5469_v7 = vmul.f32 %v7601_v55, %v5129_v34  ;;  %v5045_v49 = vpop.xlane.xlu1 %5044  ;;  %v11889_v26 = vld [vmem:[#allocation91_spill] sm:$0xff] }
 0x8aa   : > { %5978 = vst.msk [vmem:[%s9713_s25 + $0x290] sm:$0xff] %vm414_vm0, %v5850_v15  ;;  %v5692_v22 = vmul.f32 %v7599_v17, %v5564_v19  ;;  %v5468_v41 = vmul.f32 %v7603_v58, %v5126_v8  ;;  %7612 = vrcp.f32 %v5045_v49  ;;  %v5042_v47 = vpop.xlane.xlu0 %5041 }
 0x8ab   : > { %v5821_v5 = vmul.f32 %v11886_v32, %v5693_v2  ;;  %v5597_v9 = vsub.f32 2.0, %v5469_v7  ;;  %7614 = vrcp.f32 %v5042_v47 }
 0x8ac   : > { %v7605_v59 = vpop.eup %7604  ;;  %v5820_v25 = vmul.f32 %v11887_v43, %v5692_v22  ;;  %v5596_v57 = vsub.f32 2.0, %v5468_v41  ;;  %v11890_v22 = vld [vmem:[#allocation92_spill] sm:$0xff] }
 0x8ad   : > { %v7607_v20 = vpop.eup %7606  ;;  %5949 = vst.msk [vmem:[%s9713_s25 + $0x1a8] sm:$0xff] %vm414_vm0, %v5821_v5  ;;  %v5725_v34 = vmul.f32 %v7601_v55, %v5597_v9  ;;  %v5439_v46 = vmul.f32 %v7605_v59, %v5039_v53  ;;  %v5141_v3 = vpop.xlane.xlu1 %5140  ;;  %v11891_v9 = vld [vmem:[#allocation95_spill] sm:$0xff] }
 0x8ae   : > { %5948 = vst.msk [vmem:[%s9713_s25 + $0x1a0] sm:$0xff] %vm414_vm0, %v5820_v25  ;;  %v5724_v8 = vmul.f32 %v7603_v58, %v5596_v57  ;;  %v5438_v17 = vmul.f32 %v7607_v20, %v5036_v23  ;;  %7616 = vrcp.f32 %v5141_v3  ;;  %v5138_v31 = vpop.xlane.xlu0 %5137 }
 0x8af   : > { %v5853_v16 = vmul.f32 %v11888_v38, %v5725_v34  ;;  %v5567_v45 = vsub.f32 2.0, %v5439_v46  ;;  %7618 = vrcp.f32 %v5138_v31 }
 0x8b0   : > { %v7609_v11 = vpop.eup %7608  ;;  %v5852_v33 = vmul.f32 %v11889_v26, %v5724_v8  ;;  %v5566_v15 = vsub.f32 2.0, %v5438_v17  ;;  %v11892_v8 = vld [vmem:[#allocation19_spill] sm:$0xff] }
 0x8b1   : > { %v7611_v19 = vpop.eup %7610  ;;  %5981 = vst.msk [vmem:[%s9713_s25 + $0x2a8] sm:$0xff] %vm414_vm0, %v5853_v16  ;;  %v5695_v53 = vmul.f32 %v7605_v59, %v5567_v45  ;;  %v5471_v55 = vmul.f32 %v7609_v11, %v5135_v29  ;;  %v5051_v2 = vpop.xlane.xlu1 %5050  ;;  %v11893_v45 = vld [vmem:[#allocation125_spill] sm:$0xff] }
 0x8b2   : > { %5980 = vst.msk [vmem:[%s9713_s25 + $0x2a0] sm:$0xff] %vm414_vm0, %v5852_v33  ;;  %v5694_v23 = vmul.f32 %v7607_v20, %v5566_v15  ;;  %v5470_v58 = vmul.f32 %v7611_v19, %v5132_v13  ;;  %7620 = vrcp.f32 %v5051_v2  ;;  %v5048_v7 = vpop.xlane.xlu0 %5047 }
 0x8b3   : > { %v5823_v41 = vmul.f32 %v11890_v22, %v5695_v53  ;;  %v5599_v32 = vsub.f32 2.0, %v5471_v55  ;;  %7622 = vrcp.f32 %v5048_v7 }
 0x8b4   : > { %v7613_v5 = vpop.eup %7612  ;;  %v5822_v43 = vmul.f32 %v11891_v9, %v5694_v23  ;;  %v5598_v25 = vsub.f32 2.0, %v5470_v58  ;;  %v11894_v23 = vld [vmem:[#allocation98_spill] sm:$0xff] }
 0x8b5   : > { %v7615_v57 = vpop.eup %7614  ;;  %5951 = vst.msk [vmem:[%s9713_s25 + $0x1b8] sm:$0xff] %vm414_vm0, %v5823_v41  ;;  %v5727_v29 = vmul.f32 %v7609_v11, %v5599_v32  ;;  %v5441_v59 = vmul.f32 %v7613_v5, %v5045_v49  ;;  %v5147_v34 = vpop.xlane.xlu1 %5146  ;;  %v11895_v32 = vld [vmem:[#allocation99_spill] sm:$0xff] }
 0x8b6   : > { %5950 = vst.msk [vmem:[%s9713_s25 + $0x1b0] sm:$0xff] %vm414_vm0, %v5822_v43  ;;  %v5726_v13 = vmul.f32 %v7611_v19, %v5598_v25  ;;  %v5440_v20 = vmul.f32 %v7615_v57, %v5042_v47  ;;  %7624 = vrcp.f32 %v5147_v34  ;;  %v5144_v46 = vpop.xlane.xlu0 %5143 }
 0x8b7   : > { %v5855_v17 = vmul.f32 %v11892_v8, %v5727_v29  ;;  %v5569_v38 = vsub.f32 2.0, %v5441_v59  ;;  %7626 = vrcp.f32 %v5144_v46 }
 0x8b8   : > { %v7617_v16 = vpop.eup %7616  ;;  %v5854_v26 = vmul.f32 %v11893_v45, %v5726_v13  ;;  %v5568_v33 = vsub.f32 2.0, %v5440_v20  ;;  %v11896_v13 = vld [vmem:[#allocation22_spill] sm:$0xff] }
 0x8b9   : > { %v7619_v15 = vpop.eup %7618  ;;  %5983 = vst.msk [vmem:[%s9713_s25 + $0x2b8] sm:$0xff] %vm414_vm0, %v5855_v17  ;;  %v5697_v49 = vmul.f32 %v7613_v5, %v5569_v38  ;;  %v5473_v11 = vmul.f32 %v7617_v16, %v5141_v3  ;;  %v5057_v53 = vpop.xlane.xlu1 %5056  ;;  %v11897_v38 = vld [vmem:[#allocation112_spill] sm:$0xff] }
 0x8ba   : > { %5982 = vst.msk [vmem:[%s9713_s25 + $0x2b0] sm:$0xff] %vm414_vm0, %v5854_v26  ;;  %v5696_v47 = vmul.f32 %v7615_v57, %v5568_v33  ;;  %v5472_v19 = vmul.f32 %v7619_v15, %v5138_v31  ;;  %7628 = vrcp.f32 %v5057_v53  ;;  %v5054_v55 = vpop.xlane.xlu0 %5053 }
 0x8bb   : > { %v5825_v58 = vmul.f32 %v11894_v23, %v5697_v49  ;;  %v5601_v22 = vsub.f32 2.0, %v5473_v11  ;;  %7630 = vrcp.f32 %v5054_v55 }
 0x8bc   : > { %v7621_v41 = vpop.eup %7620  ;;  %v5824_v9 = vmul.f32 %v11895_v32, %v5696_v47  ;;  %v5600_v43 = vsub.f32 2.0, %v5472_v19  ;;  %v11898_v47 = vld [vmem:[#allocation44_spill] sm:$0xff] }
 0x8bd   : > { %v7623_v25 = vpop.eup %7622  ;;  %5953 = vst.msk [vmem:[%s9713_s25 + $0x1c8] sm:$0xff] %vm414_vm0, %v5825_v58  ;;  %v5729_v3 = vmul.f32 %v7617_v16, %v5601_v22  ;;  %v5443_v5 = vmul.f32 %v7621_v41, %v5051_v2  ;;  %v5153_v29 = vpop.xlane.xlu1 %5152  ;;  %v11899_v22 = vld [vmem:[#allocation65_spill] sm:$0xff] }
 0x8be   : > { %5952 = vst.msk [vmem:[%s9713_s25 + $0x1c0] sm:$0xff] %vm414_vm0, %v5824_v9  ;;  %v5728_v31 = vmul.f32 %v7619_v15, %v5600_v43  ;;  %v5442_v57 = vmul.f32 %v7623_v25, %v5048_v7  ;;  %7632 = vrcp.f32 %v5153_v29  ;;  %v5150_v59 = vpop.xlane.xlu0 %5149 }
 0x8bf   : > { %v5857_v20 = vmul.f32 %v11896_v13, %v5729_v3  ;;  %v5571_v8 = vsub.f32 2.0, %v5443_v5  ;;  %7634 = vrcp.f32 %v5150_v59 }
 0x8c0   : > { %v7625_v17 = vpop.eup %7624  ;;  %v5856_v45 = vmul.f32 %v11897_v38, %v5728_v31  ;;  %v5570_v26 = vsub.f32 2.0, %v5442_v57  ;;  %v11900_v31 = vld [vmem:[#allocation106_spill] sm:$0xff] }
 0x8c1   : > { %v7627_v33 = vpop.eup %7626  ;;  %5985 = vst.msk [vmem:[%s9713_s25 + $0x2c8] sm:$0xff] %vm414_vm0, %v5857_v20  ;;  %v5699_v2 = vmul.f32 %v7621_v41, %v5571_v8  ;;  %v5475_v16 = vmul.f32 %v7625_v17, %v5147_v34  ;;  %v5063_v49 = vpop.xlane.xlu1 %5062  ;;  %v11901_v8 = vld [vmem:[#allocation45_spill] sm:$0xff] }
 0x8c2   : > { %5984 = vst.msk [vmem:[%s9713_s25 + $0x2c0] sm:$0xff] %vm414_vm0, %v5856_v45  ;;  %v5698_v7 = vmul.f32 %v7623_v25, %v5570_v26  ;;  %v5474_v15 = vmul.f32 %v7627_v33, %v5144_v46  ;;  %7636 = vrcp.f32 %v5063_v49  ;;  %v5060_v11 = vpop.xlane.xlu0 %5059 }
 0x8c3   : > { %v5827_v19 = vmul.f32 %v11898_v47, %v5699_v2  ;;  %v5603_v23 = vsub.f32 2.0, %v5475_v16  ;;  %7638 = vrcp.f32 %v5060_v11 }
 0x8c4   : > { %v7629_v58 = vpop.eup %7628  ;;  %v5826_v32 = vmul.f32 %v11899_v22, %v5698_v7  ;;  %v5602_v9 = vsub.f32 2.0, %v5474_v15  ;;  %v11902_v7 = vld [vmem:[#allocation72_spill] sm:$0xff] }
 0x8c5   : > { %v7631_v43 = vpop.eup %7630  ;;  %5955 = vst.msk [vmem:[%s9713_s25 + $0x1d8] sm:$0xff] %vm414_vm0, %v5827_v19  ;;  %v5731_v34 = vmul.f32 %v7625_v17, %v5603_v23  ;;  %v5445_v41 = vmul.f32 %v7629_v58, %v5057_v53  ;;  %v5159_v3 = vpop.xlane.xlu1 %5158  ;;  %v11903_v23 = vld [vmem:[#allocation67_spill] sm:$0xff] }
 0x8c6   : > { %5954 = vst.msk [vmem:[%s9713_s25 + $0x1d0] sm:$0xff] %vm414_vm0, %v5826_v32  ;;  %v5730_v46 = vmul.f32 %v7627_v33, %v5602_v9  ;;  %v5444_v25 = vmul.f32 %v7631_v43, %v5054_v55  ;;  %7640 = vrcp.f32 %v5159_v3  ;;  %v5156_v5 = vpop.xlane.xlu0 %5155 }
 0x8c7   : > { %v5859_v57 = vmul.f32 %v11900_v31, %v5731_v34  ;;  %v5573_v13 = vsub.f32 2.0, %v5445_v41  ;;  %7642 = vrcp.f32 %v5156_v5 }
 0x8c8   : > { %v7633_v20 = vpop.eup %7632  ;;  %v5858_v38 = vmul.f32 %v11901_v8, %v5730_v46  ;;  %v5572_v45 = vsub.f32 2.0, %v5444_v25  ;;  %v11904_v46 = vld [vmem:[#allocation109_spill] sm:$0xff] }
 0x8c9   : > { %v7635_v26 = vpop.eup %7634  ;;  %5987 = vst.msk [vmem:[%s9713_s25 + $0x2d8] sm:$0xff] %vm414_vm0, %v5859_v57  ;;  %v5701_v53 = vmul.f32 %v7629_v58, %v5573_v13  ;;  %v5477_v17 = vmul.f32 %v7633_v20, %v5153_v29  ;;  %v5165_v2 = vpop.xlane.xlu1 %5164  ;;  %v11905_v13 = vld [vmem:[#allocation47_spill] sm:$0xff] }
 0x8ca   : > { %5986 = vst.msk [vmem:[%s9713_s25 + $0x2d0] sm:$0xff] %vm414_vm0, %v5858_v38  ;;  %v5700_v55 = vmul.f32 %v7631_v43, %v5572_v45  ;;  %v5476_v33 = vmul.f32 %v7635_v26, %v5150_v59  ;;  %7644 = vrcp.f32 %v5165_v2  ;;  %v5162_v16 = vpop.xlane.xlu0 %5161 }
 0x8cb   : > { %v5829_v15 = vmul.f32 %v11902_v7, %v5701_v53  ;;  %v5605_v47 = vsub.f32 2.0, %v5477_v17  ;;  %7646 = vrcp.f32 %v5162_v16 }
 0x8cc   : > { %v7637_v19 = vpop.eup %7636  ;;  %v5828_v22 = vmul.f32 %v11903_v23, %v5700_v55  ;;  %v5604_v32 = vsub.f32 2.0, %v5476_v33  ;;  %v11906_v55 = vld [vmem:[#allocation43_spill] sm:$0xff] }
 0x8cd   : > { %v7639_v9 = vpop.eup %7638  ;;  %5957 = vst.msk [vmem:[%s9713_s25 + $0x1e8] sm:$0xff] %vm414_vm0, %v5829_v15  ;;  %v5733_v29 = vmul.f32 %v7633_v20, %v5605_v47  ;;  %v5447_v58 = vmul.f32 %v7637_v19, %v5063_v49  ;;  %v5171_v34 = vpop.xlane.xlu1 %5170 }
 0x8ce   : > { %5956 = vst.msk [vmem:[%s9713_s25 + $0x1e0] sm:$0xff] %vm414_vm0, %v5828_v22  ;;  %v5732_v59 = vmul.f32 %v7635_v26, %v5604_v32  ;;  %v5446_v43 = vmul.f32 %v7639_v9, %v5060_v11  ;;  %7648 = vrcp.f32 %v5171_v34  ;;  %v5168_v41 = vpop.xlane.xlu0 %5167 }
 0x8cf   : > { %v5861_v25 = vmul.f32 %v11904_v46, %v5733_v29  ;;  %v5575_v31 = vsub.f32 2.0, %v5447_v58  ;;  %7650 = vrcp.f32 %v5168_v41  ;;  %v11907_v58 = vld [vmem:[#allocation6_spill] sm:$0xff]  ;;  %v11908_v46 = vld [vmem:[#allocation48_spill] sm:$0xff] }
 0x8d0   : > { %v7641_v57 = vpop.eup %7640  ;;  %v5860_v8 = vmul.f32 %v11905_v13, %v5732_v59  ;;  %v5574_v38 = vsub.f32 2.0, %v5446_v43 }
 0x8d1   : > { %v7643_v45 = vpop.eup %7642  ;;  %5989 = vst.msk [vmem:[%s9713_s25 + $0x2e8] sm:$0xff] %vm414_vm0, %v5861_v25  ;;  %v5703_v49 = vmul.f32 %v7637_v19, %v5575_v31  ;;  %v5479_v20 = vmul.f32 %v7641_v57, %v5159_v3  ;;  %v5177_v53 = vpop.xlane.xlu1 %5176 }
 0x8d2   : > { %5988 = vst.msk [vmem:[%s9713_s25 + $0x2e0] sm:$0xff] %vm414_vm0, %v5860_v8  ;;  %v5702_v11 = vmul.f32 %v7639_v9, %v5574_v38  ;;  %v5478_v26 = vmul.f32 %v7643_v45, %v5156_v5  ;;  %7652 = vrcp.f32 %v5177_v53  ;;  %v5174_v17 = vpop.xlane.xlu0 %5173 }
 0x8d3   : > { %v5831_v33 = vmul.f32 %v11906_v55, %v5703_v49  ;;  %v5607_v7 = vsub.f32 2.0, %v5479_v20  ;;  %7654 = vrcp.f32 %v5174_v17  ;;  %v11909_v49 = vld [vmem:[#allocation69_spill] sm:$0xff]  ;;  %v11910_v55 = vld [vmem:[#allocation94_spill] sm:$0xff] }
 0x8d4   : > { %v7645_v15 = vpop.eup %7644  ;;  %v5830_v47 = vmul.f32 %v10149_v39, %v5702_v11  ;;  %v5606_v23 = vsub.f32 2.0, %v5478_v26 }
 0x8d5   : > { %v7647_v22 = vpop.eup %7646  ;;  %5959 = vst.msk [vmem:[%s9713_s25 + $0x1f8] sm:$0xff] %vm414_vm0, %v5831_v33  ;;  %v5735_v3 = vmul.f32 %v7641_v57, %v5607_v7  ;;  %v5481_v19 = vmul.f32 %v7645_v15, %v5165_v2  ;;  %v5183_v32 = vpop.xlane.xlu1 %5182 }
 0x8d6   : > { %5958 = vst.msk [vmem:[%s9713_s25 + $0x1f0] sm:$0xff] %vm414_vm0, %v5830_v47  ;;  %v5734_v5 = vmul.f32 %v7643_v45, %v5606_v23  ;;  %v5480_v9 = vmul.f32 %v7647_v22, %v5162_v16  ;;  %7656 = vrcp.f32 %v5183_v32  ;;  %v5180_v29 = vpop.xlane.xlu0 %5179 }
 0x8d7   : > { %v5863_v59 = vmul.f32 %v11907_v58, %v5735_v3  ;;  %v5609_v43 = vsub.f32 2.0, %v5481_v19  ;;  %7658 = vrcp.f32 %v5180_v29  ;;  %v11911_v19 = vld [vmem:[#allocation110_spill] sm:$0xff] }
 0x8d8   : > { %v7649_v39 = vpop.eup %7648  ;;  %v5862_v25 = vmul.f32 %v11908_v46, %v5734_v5  ;;  %v5608_v31 = vsub.f32 2.0, %v5480_v9 }
 0x8d9   : > { %v7651_v13 = vpop.eup %7650  ;;  %5991 = vst.msk [vmem:[%s9713_s25 + $0x2f8] sm:$0xff] %vm414_vm0, %v5863_v59  ;;  %v5737_v2 = vmul.f32 %v7645_v15, %v5609_v43  ;;  %v5483_v57 = vmul.f32 %v7649_v39, %v5171_v34 }
 0x8da   : > { %v5189_v8 = vpop.xlane.xlu1 %5188  ;;  %5990 = vst.msk [vmem:[%s9713_s25 + $0x2f0] sm:$0xff] %vm414_vm0, %v5862_v25  ;;  %v5736_v16 = vmul.f32 %v7647_v22, %v5608_v31  ;;  %v5482_v38 = vmul.f32 %v7651_v13, %v5168_v41 }
 0x8db   : > { %7660 = vrcp.f32 %v5189_v8  ;;  %v5186_v45 = vpop.xlane.xlu0 %5185  ;;  %v5865_v20 = vmul.f32 %v11909_v49, %v5737_v2  ;;  %v5611_v11 = vsub.f32 2.0, %v5483_v57 }
 0x8dc   : > { %7662 = vrcp.f32 %v5186_v45  ;;  %v7653_v26 = vpop.eup %7652  ;;  %v5864_v33 = vmul.f32 %v11910_v55, %v5736_v16  ;;  %v5610_v7 = vsub.f32 2.0, %v5482_v38 }
 0x8dd   : > { %v7655_v47 = vpop.eup %7654  ;;  %5993 = vst.msk [vmem:[%s9713_s25 + $0x308] sm:$0xff] %vm414_vm0, %v5865_v20  ;;  %v5739_v34 = vmul.f32 %v7649_v39, %v5611_v11  ;;  %v5485_v15 = vmul.f32 %v7653_v26, %v5177_v53 }
 0x8de   : > { %v5195_v23 = vpop.xlane.xlu1 %5194  ;;  %5992 = vst.msk [vmem:[%s9713_s25 + $0x300] sm:$0xff] %vm414_vm0, %v5864_v33  ;;  %v5738_v41 = vmul.f32 %v7651_v13, %v5610_v7  ;;  %v5484_v22 = vmul.f32 %v7655_v47, %v5174_v17 }
 0x8df   : > { %7664 = vrcp.f32 %v5195_v23  ;;  %v5192_v3 = vpop.xlane.xlu0 %5191  ;;  %v5867_v5 = vmul.f32 %v11911_v19, %v5739_v34  ;;  %v5613_v9 = vsub.f32 2.0, %v5485_v15 }
 0x8e0   : > { %7666 = vrcp.f32 %v5192_v3  ;;  %v7657_v58 = vpop.eup %7656  ;;  %v5866_v59 = vmul.f32 %v10211_v35, %v5738_v41  ;;  %v5612_v43 = vsub.f32 2.0, %v5484_v22 }
 0x8e1   : > { %v7659_v46 = vpop.eup %7658  ;;  %5995 = vst.msk [vmem:[%s9713_s25 + $0x318] sm:$0xff] %vm414_vm0, %v5867_v5  ;;  %v5741_v53 = vmul.f32 %v7653_v26, %v5613_v9  ;;  %v5487_v39 = vmul.f32 %v7657_v58, %v5183_v32 }
 0x8e2   : > { %5994 = vst.msk [vmem:[%s9713_s25 + $0x310] sm:$0xff] %vm414_vm0, %v5866_v59  ;;  %v5740_v17 = vmul.f32 %v7655_v47, %v5612_v43  ;;  %v5486_v31 = vmul.f32 %v7659_v46, %v5180_v29 }
 0x8e3   : > { %v5201_v25 = vpop.xlane.xlu1 %5200  ;;  %v5869_v2 = vmul.f32 %v10218_v21, %v5741_v53  ;;  %v5615_v57 = vsub.f32 2.0, %v5487_v39 }
 0x8e4   : > { %7668 = vrcp.f32 %v5201_v25  ;;  %v5198_v13 = vpop.xlane.xlu0 %5197  ;;  %v5868_v16 = vmul.f32 %v10233_v42, %v5740_v17  ;;  %v5614_v38 = vsub.f32 2.0, %v5486_v31 }
 0x8e5   : > { %7670 = vrcp.f32 %v5198_v13  ;;  %v7661_v35 = vpop.eup %7660  ;;  %5997 = vst.msk [vmem:[%s9713_s25 + $0x328] sm:$0xff] %vm414_vm0, %v5869_v2  ;;  %v5743_v32 = vmul.f32 %v7657_v58, %v5615_v57 }
 0x8e6   : > { %v7663_v49 = vpop.eup %7662  ;;  %v5489_v20 = vmul.f32 %v7661_v35, %v5189_v8  ;;  %5996 = vst.msk [vmem:[%s9713_s25 + $0x320] sm:$0xff] %vm414_vm0, %v5868_v16  ;;  %v5742_v29 = vmul.f32 %v7659_v46, %v5614_v38 }
 0x8e7   : > { %v5207_v11 = vpop.xlane.xlu1 %5206  ;;  %v5488_v26 = vmul.f32 %v7663_v49, %v5186_v45  ;;  %v5871_v55 = vmul.f32 %v10240_v4, %v5743_v32 }
 0x8e8   : > { %7672 = vrcp.f32 %v5207_v11  ;;  %v5204_v21 = vpop.xlane.xlu0 %5203  ;;  %v5617_v33 = vsub.f32 2.0, %v5489_v20  ;;  %v5870_v7 = vmul.f32 %v10262_v56, %v5742_v29 }
 0x8e9   : > { %7674 = vrcp.f32 %v5204_v21  ;;  %v7665_v42 = vpop.eup %7664  ;;  %v5616_v47 = vsub.f32 2.0, %v5488_v26  ;;  %5999 = vst.msk [vmem:[%s9713_s25 + $0x338] sm:$0xff] %vm414_vm0, %v5871_v55 }
 0x8ea   : > { %v7667_v34 = vpop.eup %7666  ;;  %v5745_v8 = vmul.f32 %v7661_v35, %v5617_v33  ;;  %v5491_v15 = vmul.f32 %v7665_v42, %v5195_v23  ;;  %5998 = vst.msk [vmem:[%s9713_s25 + $0x330] sm:$0xff] %vm414_vm0, %v5870_v7 }
 0x8eb   : > { %v5744_v45 = vmul.f32 %v7663_v49, %v5616_v47  ;;  %v5490_v22 = vmul.f32 %v7667_v34, %v5192_v3 }
 0x8ec   : > { %v5213_v41 = vpop.xlane.xlu1 %5212  ;;  %v5873_v19 = vmul.f32 %v10272_v6, %v5745_v8  ;;  %v5619_v5 = vsub.f32 2.0, %v5491_v15 }
 0x8ed   : > { %7676 = vrcp.f32 %v5213_v41  ;;  %v5210_v4 = vpop.xlane.xlu0 %5209  ;;  %v5872_v9 = vmul.f32 %v10290_v24, %v5744_v45  ;;  %v5618_v58 = vsub.f32 2.0, %v5490_v22 }
 0x8ee   : > { %7678 = vrcp.f32 %v5210_v4  ;;  %v7669_v56 = vpop.eup %7668  ;;  %6001 = vst.msk [vmem:[%s9713_s25 + $0x348] sm:$0xff] %vm414_vm0, %v5873_v19  ;;  %v5747_v23 = vmul.f32 %v7665_v42, %v5619_v5 }
 0x8ef   : > { %v7671_v59 = vpop.eup %7670  ;;  %v5493_v43 = vmul.f32 %v7669_v56, %v5201_v25  ;;  %6000 = vst.msk [vmem:[%s9713_s25 + $0x340] sm:$0xff] %vm414_vm0, %v5872_v9  ;;  %v5746_v3 = vmul.f32 %v7667_v34, %v5618_v58 }
 0x8f0   : > { %v5219_v46 = vpop.xlane.xlu1 %5218  ;;  %v5492_v53 = vmul.f32 %v7671_v59, %v5198_v13  ;;  %v5875_v39 = vmul.f32 %v10316_v51, %v5747_v23 }
 0x8f1   : > { %7680 = vrcp.f32 %v5219_v46  ;;  %v5216_v6 = vpop.xlane.xlu0 %5215  ;;  %v5621_v17 = vsub.f32 2.0, %v5493_v43  ;;  %v5874_v31 = vmul.f32 %v10326_v63, %v5746_v3 }
 0x8f2   : > { %7682 = vrcp.f32 %v5216_v6  ;;  %v7673_v24 = vpop.eup %7672  ;;  %v5620_v2 = vsub.f32 2.0, %v5492_v53  ;;  %6003 = vst.msk [vmem:[%s9713_s25 + $0x358] sm:$0xff] %vm414_vm0, %v5875_v39 }
 0x8f3   : > { %v7675_v57 = vpop.eup %7674  ;;  %v5749_v25 = vmul.f32 %v7669_v56, %v5621_v17  ;;  %v5495_v35 = vmul.f32 %v7673_v24, %v5207_v11  ;;  %6002 = vst.msk [vmem:[%s9713_s25 + $0x350] sm:$0xff] %vm414_vm0, %v5874_v31 }
 0x8f4   : > { %v5748_v13 = vmul.f32 %v7671_v59, %v5620_v2  ;;  %v5494_v38 = vmul.f32 %v7675_v57, %v5204_v21 }
 0x8f5   : > { %v5225_v16 = vpop.xlane.xlu1 %5224  ;;  %v5877_v49 = vmul.f32 %v10344_v12, %v5749_v25  ;;  %v5623_v32 = vsub.f32 2.0, %v5495_v35 }
 0x8f6   : > { %7684 = vrcp.f32 %v5225_v16  ;;  %v5222_v51 = vpop.xlane.xlu0 %5221  ;;  %v5876_v20 = vmul.f32 %v10354_v54, %v5748_v13  ;;  %v5622_v29 = vsub.f32 2.0, %v5494_v38 }
 0x8f7   : > { %7686 = vrcp.f32 %v5222_v51  ;;  %v7677_v63 = vpop.eup %7676  ;;  %6005 = vst.msk [vmem:[%s9713_s25 + $0x368] sm:$0xff] %vm414_vm0, %v5877_v49  ;;  %v5751_v11 = vmul.f32 %v7673_v24, %v5623_v32 }
 0x8f8   : > { %v7679_v26 = vpop.eup %7678  ;;  %v5497_v55 = vmul.f32 %v7677_v63, %v5213_v41  ;;  %6004 = vst.msk [vmem:[%s9713_s25 + $0x360] sm:$0xff] %vm414_vm0, %v5876_v20  ;;  %v5750_v21 = vmul.f32 %v7675_v57, %v5622_v29 }
 0x8f9   : > { %v5496_v42 = vmul.f32 %v7679_v26, %v5210_v4  ;;  %v5879_v7 = vmul.f32 %v10372_v61, %v5751_v11 }
 0x8fa   : > { %v5231_v33 = vpop.xlane.xlu1 %5230  ;;  %v5625_v47 = vsub.f32 2.0, %v5497_v55  ;;  %v5878_v34 = vmul.f32 %v10382_v60, %v5750_v21 }
 0x8fb   : > { %7688 = vrcp.f32 %v5231_v33  ;;  %v5228_v12 = vpop.xlane.xlu0 %5227  ;;  %v7681_v54 = vpop.eup %7680  ;;  %v5624_v8 = vsub.f32 2.0, %v5496_v42  ;;  %6007 = vst.msk [vmem:[%s9713_s25 + $0x378] sm:$0xff] %vm414_vm0, %v5879_v7 }
 0x8fc   : > { %7690 = vrcp.f32 %v5228_v12  ;;  %v7683_v15 = vpop.eup %7682  ;;  %v5753_v41 = vmul.f32 %v7677_v63, %v5625_v47  ;;  %v5499_v45 = vmul.f32 %v7681_v54, %v5219_v46  ;;  %6006 = vst.msk [vmem:[%s9713_s25 + $0x370] sm:$0xff] %vm414_vm0, %v5878_v34 }
 0x8fd   : > { %v5752_v4 = vmul.f32 %v7679_v26, %v5624_v8  ;;  %v5498_v19 = vmul.f32 %v7683_v15, %v5216_v6 }
 0x8fe   : > { %v5237_v22 = vpop.xlane.xlu1 %5236  ;;  %v5881_v5 = vmul.f32 %v10400_v10, %v5753_v41  ;;  %v5627_v56 = vsub.f32 2.0, %v5499_v45 }
 0x8ff   : > { %7692 = vrcp.f32 %v5237_v22  ;;  %v5234_v61 = vpop.xlane.xlu0 %5233  ;;  %v5880_v9 = vmul.f32 %v10410_v30, %v5752_v4  ;;  %v5626_v58 = vsub.f32 2.0, %v5498_v19 }
 0x900   : > { %7694 = vrcp.f32 %v5234_v61  ;;  %v7685_v60 = vpop.eup %7684  ;;  %6009 = vst.msk [vmem:[%s9713_s25 + $0x388] sm:$0xff] %vm414_vm0, %v5881_v5  ;;  %v5755_v23 = vmul.f32 %v7681_v54, %v5627_v56 }
 0x901   : > { %v7687_v59 = vpop.eup %7686  ;;  %v5501_v43 = vmul.f32 %v7685_v60, %v5225_v16  ;;  %6008 = vst.msk [vmem:[%s9713_s25 + $0x380] sm:$0xff] %vm414_vm0, %v5880_v9  ;;  %v5754_v3 = vmul.f32 %v7683_v15, %v5626_v58 }
 0x902   : > { %v5243_v46 = vpop.xlane.xlu1 %5242  ;;  %v5500_v53 = vmul.f32 %v7687_v59, %v5222_v51  ;;  %v5883_v6 = vmul.f32 %v10428_v52, %v5755_v23 }
 0x903   : > { %7696 = vrcp.f32 %v5243_v46  ;;  %v5240_v10 = vpop.xlane.xlu0 %5239  ;;  %v5629_v39 = vsub.f32 2.0, %v5501_v43  ;;  %v5882_v17 = vmul.f32 %v10438_v40, %v5754_v3 }
 0x904   : > { %7698 = vrcp.f32 %v5240_v10  ;;  %v5628_v24 = vsub.f32 2.0, %v5500_v53  ;;  %6011 = vst.msk [vmem:[%s9713_s25 + $0x398] sm:$0xff] %vm414_vm0, %v5883_v6 }
 0x905   : > { %v7689_v30 = vpop.eup %7688  ;;  %v5757_v2 = vmul.f32 %v7685_v60, %v5629_v39  ;;  %6010 = vst.msk [vmem:[%s9713_s25 + $0x390] sm:$0xff] %vm414_vm0, %v5882_v17 }
 0x906   : > { %v7691_v31 = vpop.eup %7690  ;;  %v5503_v57 = vmul.f32 %v7689_v30, %v5231_v33  ;;  %v5249_v25 = vpop.xlane.xlu1 %5248  ;;  %v5756_v35 = vmul.f32 %v7687_v59, %v5628_v24 }
 0x907   : > { %v5502_v16 = vmul.f32 %v7691_v31, %v5228_v12  ;;  %7700 = vrcp.f32 %v5249_v25  ;;  %v5246_v52 = vpop.xlane.xlu0 %5245  ;;  %v5885_v13 = vmul.f32 %v10456_v1, %v5757_v2 }
 0x908   : > { %v5631_v38 = vsub.f32 2.0, %v5503_v57  ;;  %7702 = vrcp.f32 %v5246_v52  ;;  %v5884_v51 = vmul.f32 %v10466_v28, %v5756_v35 }
 0x909   : > { %v7693_v40 = vpop.eup %7692  ;;  %v5630_v49 = vsub.f32 2.0, %v5502_v16  ;;  %6013 = vst.msk [vmem:[%s9713_s25 + $0x3a8] sm:$0xff] %vm414_vm0, %v5885_v13 }
 0x90a   : > { %v7695_v32 = vpop.eup %7694  ;;  %v5759_v63 = vmul.f32 %v7689_v30, %v5631_v38  ;;  %v5505_v20 = vmul.f32 %v7693_v40, %v5237_v22  ;;  %v5255_v29 = vpop.xlane.xlu1 %5254  ;;  %6012 = vst.msk [vmem:[%s9713_s25 + $0x3a0] sm:$0xff] %vm414_vm0, %v5884_v51 }
 0x90b   : > { %v5758_v26 = vmul.f32 %v7691_v31, %v5630_v49  ;;  %v5504_v11 = vmul.f32 %v7695_v32, %v5234_v61  ;;  %7704 = vrcp.f32 %v5255_v29  ;;  %v5252_v1 = vpop.xlane.xlu0 %5251 }
 0x90c   : > { %v5887_v55 = vmul.f32 %v10484_v37, %v5759_v63  ;;  %v5633_v33 = vsub.f32 2.0, %v5505_v20  ;;  %7706 = vrcp.f32 %v5252_v1 }
 0x90d   : > { %v7697_v28 = vpop.eup %7696  ;;  %v5886_v21 = vmul.f32 %v10494_v18, %v5758_v26  ;;  %v5632_v42 = vsub.f32 2.0, %v5504_v11 }
 0x90e   : > { %v7699_v12 = vpop.eup %7698  ;;  %6015 = vst.msk [vmem:[%s9713_s25 + $0x3b8] sm:$0xff] %vm414_vm0, %v5887_v55  ;;  %v5761_v7 = vmul.f32 %v7693_v40, %v5633_v33  ;;  %v5507_v47 = vmul.f32 %v7697_v28, %v5243_v46 }
 0x90f   : > { %6014 = vst.msk [vmem:[%s9713_s25 + $0x3b0] sm:$0xff] %vm414_vm0, %v5886_v21  ;;  %v5760_v54 = vmul.f32 %v7695_v32, %v5632_v42  ;;  %v5506_v34 = vmul.f32 %v7699_v12, %v5240_v10 }
 0x910   : > { %v5889_v8 = vmul.f32 %v10512_v27, %v5761_v7  ;;  %v5635_v37 = vsub.f32 2.0, %v5507_v47 }
 0x911   : > { %v7701_v15 = vpop.eup %7700  ;;  %v5888_v41 = vmul.f32 %v10520_v62, %v5760_v54  ;;  %v5634_v45 = vsub.f32 2.0, %v5506_v34 }
 0x912   : > { %v7703_v18 = vpop.eup %7702  ;;  %6017 = vst.msk [vmem:[%s9713_s25 + $0x3c8] sm:$0xff] %vm414_vm0, %v5889_v8  ;;  %v5763_v22 = vmul.f32 %v7697_v28, %v5635_v37  ;;  %v5509_v4 = vmul.f32 %v7701_v15, %v5249_v25 }
 0x913   : > { %6016 = vst.msk [vmem:[%s9713_s25 + $0x3c0] sm:$0xff] %vm414_vm0, %v5888_v41  ;;  %v5762_v19 = vmul.f32 %v7699_v12, %v5634_v45  ;;  %v5508_v61 = vmul.f32 %v7703_v18, %v5246_v52 }
 0x914   : > { %v5891_v5 = vmul.f32 %v10534_v44, %v5763_v22  ;;  %v5637_v27 = vsub.f32 2.0, %v5509_v4 }
 0x915   : > { %v7705_v56 = vpop.eup %7704  ;;  %v5890_v60 = vmul.f32 %v10542_v48, %v5762_v19  ;;  %v5636_v62 = vsub.f32 2.0, %v5508_v61 }
 0x916   : > { %v7707_v9 = vpop.eup %7706  ;;  %6019 = vst.msk [vmem:[%s9713_s25 + $0x3d8] sm:$0xff] %vm414_vm0, %v5891_v5  ;;  %v5765_v58 = vmul.f32 %v7701_v15, %v5637_v27  ;;  %v5511_v59 = vmul.f32 %v7705_v56, %v5255_v29 }
 0x917   : > { %6018 = vst.msk [vmem:[%s9713_s25 + $0x3d0] sm:$0xff] %vm414_vm0, %v5890_v60  ;;  %v5764_v23 = vmul.f32 %v7703_v18, %v5636_v62  ;;  %v5510_v43 = vmul.f32 %v7707_v9, %v5252_v1 }
 0x918   : > { %v5893_v44 = vmul.f32 %v10554_v36, %v5765_v58  ;;  %v5639_v46 = vsub.f32 2.0, %v5511_v59 }
 0x919   : > { %v5892_v3 = vmul.f32 %v10559_v50, %v5764_v23  ;;  %v5638_v53 = vsub.f32 2.0, %v5510_v43 }
 0x91a   : > { %6021 = vst.msk [vmem:[%s9713_s25 + $0x3e8] sm:$0xff] %vm414_vm0, %v5893_v44  ;;  %v5767_v48 = vmul.f32 %v7705_v56, %v5639_v46 }
 0x91b   : > { %6020 = vst.msk [vmem:[%s9713_s25 + $0x3e0] sm:$0xff] %vm414_vm0, %v5892_v3  ;;  %v5766_v10 = vmul.f32 %v7707_v9, %v5638_v53 }
 0x91c   : > { %v5895_v6 = vmul.f32 %v10570_v14, %v5767_v48 }
 0x91d   : > { %v5894_v39 = vmul.f32 %v10575_v0, %v5766_v10 }
 0x91e   : > { %6023 = vst.msk [vmem:[%s9713_s25 + $0x3f8] sm:$0xff] %vm414_vm0, %v5895_v6 }
 0x91f   : > { %6022 = vst.msk [vmem:[%s9713_s25 + $0x3f0] sm:$0xff] %vm414_vm0, %v5894_v39 }
 0x920 PF: > { %s17_s24 = sadd.s32 1, %s7714_s24  }
 0x921   : > { %p14_p4 = scmp.ge.s32.totalorder %s17_s24, 4  }
 0x923   :  { %16 = sbr.rel (!%p14_p4) target bundleno = 1 (0x1), region = 78 }

</bundles_post_ra>
